<compile_context>
chip_gen: v7x
topology: tpu7x:2x2x1
jax: 0.10.0
libtpu: 0.0.40
codegen_flags: <defaults>
</compile_context>

<pallas_src>
import functools

import jax
import jax.numpy as jnp
from jax.experimental import pallas as pl
from jax.experimental.pallas import tpu as pltpu

# ----------------------------- model hyper-params ---------------------------
MAX_PARA_Q = 2      # query paragraphs
MAX_PARA_D = 3      # doc paragraphs
MAX_LEN = 8         # tokens per pair
HIDDEN = 32         # BERT hidden size
NUM_HEADS = 2
HEAD_DIM = HIDDEN // NUM_HEADS
NUM_LAYERS = 2
INTERMEDIATE = 64
VOCAB = 64
TYPE_VOCAB = 2
RNN_HIDDEN = 32     # RNNAttention GRU hidden size
NUM_CLASSES = 2

NUM_PAIRS = MAX_PARA_Q * MAX_PARA_D
TOTAL_TOK = NUM_PAIRS * MAX_LEN          # 48 rows processed in one shot


# ------------------------------ in-kernel helpers ----------------------------
def _ln_rows(x, g, b, eps=1e-12):
    """LayerNorm over the last (lane) axis. x: [rows, H], g/b: [1, H]."""
    mean = jnp.mean(x, axis=-1, keepdims=True)
    var = jnp.mean(jnp.square(x - mean), axis=-1, keepdims=True)
    return (x - mean) * jax.lax.rsqrt(var + eps) * g + b


def _sigmoid(x):
    return 1.0 / (1.0 + jnp.exp(-x))


# ----------------------- single fused BERT-PLI kernel ------------------------
def _bertpli_kernel(x_ref, mask_ref, emb_g_ref, emb_b_ref,
                    wqkv_ref, bqkv_ref, wo_ref, bo_ref,
                    ln1g_ref, ln1b_ref, w1_ref, b1_ref,
                    w2_ref, b2_ref, ln2g_ref, ln2b_ref,
                    pw_ref, pb_ref,
                    wih_ref, bih_ref, whh_ref, bhh_ref,
                    watt_ref, batt_ref, uctx_ref, wfc_ref, bfc_ref,
                    out_ref):
    """Whole BERT-PLI forward for all (query, doc) pairs in one launch."""
    scale = 1.0 / (HEAD_DIM ** 0.5)

    # Embedding LayerNorm over all pairs at once: [N, H], N = pairs * L.
    x = _ln_rows(x_ref[...], emb_g_ref[...], emb_b_ref[...])
    mask = mask_ref[...]                                    # [N, N] block-diag bias

    # -------------------------- BERT encoder stack --------------------------
    for l in range(NUM_LAYERS):
        # Fused QKV projection: [N, H] x [H, 3H] -> [N, 3H]
        qkv = jnp.dot(x, wqkv_ref[l], preferred_element_type=jnp.float32) + bqkv_ref[l]
        q = qkv[:, :HIDDEN]
        k = qkv[:, HIDDEN:2 * HIDDEN]
        v = qkv[:, 2 * HIDDEN:]

        # Per-head attention across ALL pairs; block-diag mask keeps pairs apart.
        heads = []
        for h in range(NUM_HEADS):
            lo = h * HEAD_DIM
            qh = q[:, lo:lo + HEAD_DIM]
            kh = k[:, lo:lo + HEAD_DIM]
            vh = v[:, lo:lo + HEAD_DIM]
            s = jnp.einsum("qd,kd->qk", qh, kh,
                           preferred_element_type=jnp.float32) * scale + mask
            s = s - jnp.max(s, axis=-1, keepdims=True)
            p = jnp.exp(s)
            p = p / jnp.sum(p, axis=-1, keepdims=True)
            heads.append(jnp.dot(p, vh, preferred_element_type=jnp.float32))
        ctx = jnp.concatenate(heads, axis=-1)               # [N, H]

        attn_out = jnp.dot(ctx, wo_ref[l],
                           preferred_element_type=jnp.float32) + bo_ref[l]
        x = _ln_rows(x + attn_out, ln1g_ref[l], ln1b_ref[l])

        # FFN (tanh-approx GELU; HF BERT's exact-erf gelu differs slightly)
        ff = jax.nn.gelu(jnp.dot(x, w1_ref[l],
                                 preferred_element_type=jnp.float32) + b1_ref[l])
        ff = jnp.dot(ff, w2_ref[l], preferred_element_type=jnp.float32) + b2_ref[l]
        x = _ln_rows(x + ff, ln2g_ref[l], ln2b_ref[l])

    # ------------------------- BERT pooler (CLS) ----------------------------
    # CLS token of pair p sits at row p*MAX_LEN (sublane-aligned: L == 8).
    cls = jnp.concatenate(
        [x[p * MAX_LEN:p * MAX_LEN + 1, :] for p in range(NUM_PAIRS)], axis=0)
    pooled = jnp.tanh(jnp.dot(cls, pw_ref[...],
                              preferred_element_type=jnp.float32) + pb_ref[...])

    # ------- nn.MaxPool2d(kernel=(1, max_para_d)) over doc paragraphs -------
    rows = []
    for qi in range(MAX_PARA_Q):
        base = qi * MAX_PARA_D
        acc = pooled[base:base + 1, :]
        for d in range(1, MAX_PARA_D):
            acc = jnp.maximum(acc, pooled[base + d:base + d + 1, :])
        rows.append(acc)
    x_all = jnp.concatenate(rows, axis=0)                   # [Q, H]

    # ---------- GRU over the Q query-paragraph axis (batch = 1) -------------
    R = RNN_HIDDEN
    gx_all = jnp.dot(x_all, wih_ref[...],
                     preferred_element_type=jnp.float32) + bih_ref[...]   # [Q, 3R]
    h = jnp.zeros((1, R), jnp.float32)
    hs = []
    for t in range(MAX_PARA_Q):
        gx = gx_all[t:t + 1, :]
        gh = jnp.dot(h, whh_ref[...],
                     preferred_element_type=jnp.float32) + bhh_ref[...]   # [1, 3R]
        r = _sigmoid(gx[:, :R] + gh[:, :R])
        z = _sigmoid(gx[:, R:2 * R] + gh[:, R:2 * R])
        n = jnp.tanh(gx[:, 2 * R:] + r * gh[:, 2 * R:])
        h = (1.0 - z) * n + z * h
        hs.append(h)
    hseq = jnp.concatenate(hs, axis=0)                      # [Q, R]

    # --------------- attention pooling over the Q paragraphs ----------------
    u = jnp.tanh(jnp.dot(hseq, watt_ref[...],
                         preferred_element_type=jnp.float32) + batt_ref[...])
    scores = jnp.sum(u * uctx_ref[...], axis=-1, keepdims=True)          # [Q, 1]
    scores = scores - jnp.max(scores, axis=0, keepdims=True)
    e = jnp.exp(scores)
    alpha = e / jnp.sum(e, axis=0, keepdims=True)
    context = jnp.sum(alpha * hseq, axis=0, keepdims=True)               # [1, R]

    # -------------------------------- final FC -------------------------------
    out_ref[...] = (jnp.dot(context, wfc_ref[...],
                            preferred_element_type=jnp.float32) + bfc_ref[...])


def _block_diag_mask_bias(attention_mask):
    """[num_pairs, L] 0/1 mask -> [N, N] additive bias (0 inside own pair &
    valid key, -1e9 elsewhere). Precomputed in JAX; XLA fuses it."""
    P, L = attention_mask.shape
    pair_ids = jnp.repeat(jnp.arange(P, dtype=jnp.int32), L)          # [N]
    same_pair = pair_ids[:, None] == pair_ids[None, :]                 # [N, N]
    key_valid = attention_mask.reshape(-1) > 0                        # [N]
    ok = jnp.logical_and(same_pair, key_valid[None, :])
    return jnp.where(ok, 0.0, -1e9).astype(jnp.float32)


def bert_pli_score(params, input_ids, attention_mask, token_type_ids):
    """input_ids/mask/types: [num_pairs, L] -> logits [1, NUM_CLASSES]."""
    bp, ap = params["bert"], params["attn"]
    P, L = input_ids.shape

    # Embedding gathers (plain JAX glue).
    x_emb = (bp["word_emb"][input_ids]
             + bp["pos_emb"][None, :L, :]
             + bp["type_emb"][token_type_ids]).astype(jnp.float32)     # [P, L, H]
    x_emb = x_emb.reshape(P * L, HIDDEN)                               # [N, H]
    mask_bias = _block_diag_mask_bias(attention_mask)                  # [N, N]

    args = (x_emb, mask_bias,
            bp["emb_ln_g"], bp["emb_ln_b"],
            bp["wqkv"], bp["bqkv"], bp["wo"], bp["bo"],
            bp["ln1_g"], bp["ln1_b"], bp["w1"], bp["b1"],
            bp["w2"], bp["b2"], bp["ln2_g"], bp["ln2_b"],
            bp["pooler_w"], bp["pooler_b"],
            ap["w_ih"], ap["b_ih"], ap["w_hh"], ap["b_hh"],
            ap["w_att"], ap["b_att"], ap["u_ctx"], ap["w_fc"], ap["b_fc"])

    vmem = pl.BlockSpec(memory_space=pltpu.MemorySpace.VMEM)
    return pl.pallas_call(
        _bertpli_kernel,
        out_shape=jax.ShapeDtypeStruct((1, NUM_CLASSES), jnp.float32),
        in_specs=[vmem] * len(args),
        out_specs=pl.BlockSpec(memory_space=pltpu.MemorySpace.VMEM),
    )(*args)


# ------------------------------ loss & forward --------------------------------
def cross_entropy(logits, label):
    logp = jax.nn.log_softmax(logits, axis=-1)
    return -jnp.take_along_axis(logp, label[:, None], axis=-1).mean()


def bert_pli_forward(params, data, label, mode="train"):
    input_ids = data["input_ids"]
    batch_size = input_ids.shape[0]                 # = 1 (one case per forward)
    ii = input_ids.reshape(-1, MAX_LEN)
    am = data["attention_mask"].reshape(-1, MAX_LEN)
    tt = data["token_type_ids"].reshape(-1, MAX_LEN)

    score = bert_pli_score(params, ii, am, tt)                # [1, C]
    score = score.reshape(batch_size, NUM_CLASSES)
    loss = cross_entropy(score, label)                        # criterion = CE
    if mode in ("eval", "test"):
        return score, loss
    return loss


# ------------------------------ parameter init --------------------------------
def init_params(key):
    keys = iter(jax.random.split(key, 64))

    def nrm(shape, scale=0.02):
        return scale * jax.random.normal(next(keys), shape, jnp.float32)

    def stack(make):
        return jnp.stack([make() for _ in range(NUM_LAYERS)], axis=0)

    bert = {
        "word_emb": nrm((VOCAB, HIDDEN)),
        "pos_emb": nrm((MAX_LEN, HIDDEN)),
        "type_emb": nrm((TYPE_VOCAB, HIDDEN)),
        "emb_ln_g": jnp.ones((1, HIDDEN), jnp.float32),
        "emb_ln_b": jnp.zeros((1, HIDDEN), jnp.float32),
        # fused QKV weight = wq|wk|wv concatenated along the output axis,
        # all layer params stacked along a leading layer axis (kernel-resident).
        "wqkv": stack(lambda: nrm((HIDDEN, 3 * HIDDEN))),
        "bqkv": jnp.zeros((NUM_LAYERS, 1, 3 * HIDDEN), jnp.float32),
        "wo": stack(lambda: nrm((HIDDEN, HIDDEN))),
        "bo": jnp.zeros((NUM_LAYERS, 1, HIDDEN), jnp.float32),
        "ln1_g": jnp.ones((NUM_LAYERS, 1, HIDDEN), jnp.float32),
        "ln1_b": jnp.zeros((NUM_LAYERS, 1, HIDDEN), jnp.float32),
        "w1": stack(lambda: nrm((HIDDEN, INTERMEDIATE))),
        "b1": jnp.zeros((NUM_LAYERS, 1, INTERMEDIATE), jnp.float32),
        "w2": stack(lambda: nrm((INTERMEDIATE, HIDDEN))),
        "b2": jnp.zeros((NUM_LAYERS, 1, HIDDEN), jnp.float32),
        "ln2_g": jnp.ones((NUM_LAYERS, 1, HIDDEN), jnp.float32),
        "ln2_b": jnp.zeros((NUM_LAYERS, 1, HIDDEN), jnp.float32),
        "pooler_w": nrm((HIDDEN, HIDDEN)),
        "pooler_b": jnp.zeros((1, HIDDEN), jnp.float32),
    }
    attn = {
        "w_ih": nrm((HIDDEN, 3 * RNN_HIDDEN)),
        "b_ih": jnp.zeros((1, 3 * RNN_HIDDEN), jnp.float32),
        "w_hh": nrm((RNN_HIDDEN, 3 * RNN_HIDDEN)),
        "b_hh": jnp.zeros((1, 3 * RNN_HIDDEN), jnp.float32),
        "w_att": nrm((RNN_HIDDEN, RNN_HIDDEN)),
        "b_att": jnp.zeros((1, RNN_HIDDEN), jnp.float32),
        "u_ctx": nrm((1, RNN_HIDDEN)),
        "w_fc": nrm((RNN_HIDDEN, NUM_CLASSES)),
        "b_fc": jnp.zeros((1, NUM_CLASSES), jnp.float32),
    }
    # TODO(synk): real BertPli loads pretrained HuggingFace BERT weights from
    # model_path; here parameters are synthetic / deterministic.
    return {"bert": bert, "attn": attn}


# ----------------------------------- main --------------------------------------
if __name__ == "__main__":
    key = jax.random.PRNGKey(0)
    kp, kd = jax.random.split(key)
    params = init_params(kp)

    B = 1
    input_ids = jax.random.randint(kd, (B, NUM_PAIRS, MAX_LEN), 0, VOCAB,
                                   dtype=jnp.int32)
    attention_mask = jnp.ones((B, NUM_PAIRS, MAX_LEN), jnp.int32)
    token_type_ids = jnp.zeros((B, NUM_PAIRS, MAX_LEN), jnp.int32)
    label = jnp.array([1], jnp.int32)

    data = {
        "input_ids": input_ids,
        "attention_mask": attention_mask,
        "token_type_ids": token_type_ids,
    }

    fwd = jax.jit(functools.partial(bert_pli_forward, mode="eval"))
    score, loss = fwd(params, data, label)
    jax.block_until_ready((score, loss))
    assert score.shape == (B, NUM_CLASSES)
    assert loss.shape == ()
    print("KERNEL_OK")
</pallas_src>

<mosaic_0001>
module attributes {stable_mosaic.version = 11 : i64} {
  func.func @_bertpli_kernel(%arg0: memref<48x32xf32, #tpu.memory_space<vmem>>, %arg1: memref<48x48xf32, #tpu.memory_space<vmem>>, %arg2: memref<1x32xf32, #tpu.memory_space<vmem>>, %arg3: memref<1x32xf32, #tpu.memory_space<vmem>>, %arg4: memref<2x32x96xf32, #tpu.memory_space<vmem>>, %arg5: memref<2x1x96xf32, #tpu.memory_space<vmem>>, %arg6: memref<2x32x32xf32, #tpu.memory_space<vmem>>, %arg7: memref<2x1x32xf32, #tpu.memory_space<vmem>>, %arg8: memref<2x1x32xf32, #tpu.memory_space<vmem>>, %arg9: memref<2x1x32xf32, #tpu.memory_space<vmem>>, %arg10: memref<2x32x64xf32, #tpu.memory_space<vmem>>, %arg11: memref<2x1x64xf32, #tpu.memory_space<vmem>>, %arg12: memref<2x64x32xf32, #tpu.memory_space<vmem>>, %arg13: memref<2x1x32xf32, #tpu.memory_space<vmem>>, %arg14: memref<2x1x32xf32, #tpu.memory_space<vmem>>, %arg15: memref<2x1x32xf32, #tpu.memory_space<vmem>>, %arg16: memref<32x32xf32, #tpu.memory_space<vmem>>, %arg17: memref<1x32xf32, #tpu.memory_space<vmem>>, %arg18: memref<32x96xf32, #tpu.memory_space<vmem>>, %arg19: memref<1x96xf32, #tpu.memory_space<vmem>>, %arg20: memref<32x96xf32, #tpu.memory_space<vmem>>, %arg21: memref<1x96xf32, #tpu.memory_space<vmem>>, %arg22: memref<32x32xf32, #tpu.memory_space<vmem>>, %arg23: memref<1x32xf32, #tpu.memory_space<vmem>>, %arg24: memref<1x32xf32, #tpu.memory_space<vmem>>, %arg25: memref<32x2xf32, #tpu.memory_space<vmem>>, %arg26: memref<1x2xf32, #tpu.memory_space<vmem>>, %arg27: memref<1x2xf32, #tpu.memory_space<vmem>>) attributes {dimension_semantics = [], scalar_prefetch = 0 : i64, scratch_operands = 0 : i64, tpu.core_type = #tpu.core_type<tc>} {
    %c0 = arith.constant 0 : index
    %c0_0 = arith.constant 0 : index
    %0 = vector.load %arg0[%c0, %c0_0] : memref<48x32xf32, #tpu.memory_space<vmem>>, vector<48x32xf32>
    %c0_1 = arith.constant 0 : index
    %c0_2 = arith.constant 0 : index
    %1 = vector.load %arg2[%c0_1, %c0_2] : memref<1x32xf32, #tpu.memory_space<vmem>>, vector<1x32xf32>
    %c0_3 = arith.constant 0 : index
    %c0_4 = arith.constant 0 : index
    %2 = vector.load %arg3[%c0_3, %c0_4] : memref<1x32xf32, #tpu.memory_space<vmem>>, vector<1x32xf32>
    %cst = arith.constant dense<0.000000e+00> : vector<48xf32>
    %3 = vector.multi_reduction <add>, %0, %cst [1] : vector<48x32xf32> to vector<48xf32>
    %4 = vector.shape_cast %3 : vector<48xf32> to vector<48x1xf32>
    %cst_5 = arith.constant 3.200000e+01 : f32
    %5 = vector.broadcast %cst_5 : f32 to vector<48x1xf32>
    %6 = arith.divf %4, %5 : vector<48x1xf32>
    %7 = vector.broadcast %6 : vector<48x1xf32> to vector<48x32xf32>
    %8 = arith.subf %0, %7 : vector<48x32xf32>
    %9 = arith.mulf %8, %8 : vector<48x32xf32>
    %cst_6 = arith.constant dense<0.000000e+00> : vector<48xf32>
    %10 = vector.multi_reduction <add>, %9, %cst_6 [1] : vector<48x32xf32> to vector<48xf32>
    %11 = vector.shape_cast %10 : vector<48xf32> to vector<48x1xf32>
    %cst_7 = arith.constant 3.200000e+01 : f32
    %12 = vector.broadcast %cst_7 : f32 to vector<48x1xf32>
    %13 = arith.divf %11, %12 : vector<48x1xf32>
    %14 = vector.broadcast %6 : vector<48x1xf32> to vector<48x32xf32>
    %15 = arith.subf %0, %14 : vector<48x32xf32>
    %cst_8 = arith.constant 9.99999996E-13 : f32
    %16 = vector.broadcast %cst_8 : f32 to vector<48x1xf32>
    %17 = arith.addf %13, %16 : vector<48x1xf32>
    %18 = math.rsqrt %17 : vector<48x1xf32>
    %19 = vector.broadcast %18 : vector<48x1xf32> to vector<48x32xf32>
    %20 = arith.mulf %15, %19 : vector<48x32xf32>
    %21 = vector.broadcast %1 : vector<1x32xf32> to vector<48x32xf32>
    %22 = arith.mulf %20, %21 : vector<48x32xf32>
    %23 = vector.broadcast %2 : vector<1x32xf32> to vector<48x32xf32>
    %24 = arith.addf %22, %23 : vector<48x32xf32>
    %c0_9 = arith.constant 0 : index
    %c0_10 = arith.constant 0 : index
    %25 = vector.load %arg1[%c0_9, %c0_10] : memref<48x48xf32, #tpu.memory_space<vmem>>, vector<48x48xf32>
    %c0_11 = arith.constant 0 : index
    %c0_12 = arith.constant 0 : index
    %c0_13 = arith.constant 0 : index
    %26 = vector.load %arg4[%c0_11, %c0_12, %c0_13] : memref<2x32x96xf32, #tpu.memory_space<vmem>>, vector<1x32x96xf32>
    %27 = vector.shape_cast %26 : vector<1x32x96xf32> to vector<32x96xf32>
    %cst_14 = arith.constant dense<0.000000e+00> : vector<48x96xf32>
    %28 = tpu.matmul %24, %27, %cst_14 {dimension_numbers = #tpu.dot_dimension_numbers<[1], [0], [0], [1], [0, 0, 1, 1], [], []>} : vector<48x32xf32>, vector<32x96xf32>, vector<48x96xf32> -> vector<48x96xf32>
    %c0_15 = arith.constant 0 : index
    %c0_16 = arith.constant 0 : index
    %c0_17 = arith.constant 0 : index
    %29 = vector.load %arg5[%c0_15, %c0_16, %c0_17] : memref<2x1x96xf32, #tpu.memory_space<vmem>>, vector<1x1x96xf32>
    %30 = vector.shape_cast %29 : vector<1x1x96xf32> to vector<1x96xf32>
    %31 = vector.broadcast %30 : vector<1x96xf32> to vector<48x96xf32>
    %32 = arith.addf %28, %31 : vector<48x96xf32>
    %33 = vector.extract_strided_slice %32 {offsets = [0, 0], sizes = [48, 32], strides = [1, 1]} : vector<48x96xf32> to vector<48x32xf32>
    %34 = vector.extract_strided_slice %32 {offsets = [0, 32], sizes = [48, 32], strides = [1, 1]} : vector<48x96xf32> to vector<48x32xf32>
    %35 = vector.extract_strided_slice %32 {offsets = [0, 64], sizes = [48, 32], strides = [1, 1]} : vector<48x96xf32> to vector<48x32xf32>
    %36 = vector.extract_strided_slice %33 {offsets = [0, 0], sizes = [48, 16], strides = [1, 1]} : vector<48x32xf32> to vector<48x16xf32>
    %37 = vector.extract_strided_slice %34 {offsets = [0, 0], sizes = [48, 16], strides = [1, 1]} : vector<48x32xf32> to vector<48x16xf32>
    %38 = vector.extract_strided_slice %35 {offsets = [0, 0], sizes = [48, 16], strides = [1, 1]} : vector<48x32xf32> to vector<48x16xf32>
    "tpu.trace_start"() <{level = 10 : i32, message = "qd,kd->qk"}> : () -> ()
    %cst_18 = arith.constant dense<0.000000e+00> : vector<48x48xf32>
    %39 = tpu.matmul %36, %37, %cst_18 {dimension_numbers = #tpu.dot_dimension_numbers<[1], [1], [0], [0], [0, 0, 1, 0], [], []>} : vector<48x16xf32>, vector<48x16xf32>, vector<48x48xf32> -> vector<48x48xf32>
    "tpu.trace_stop"() : () -> ()
    %cst_19 = arith.constant 2.500000e-01 : f32
    %40 = vector.broadcast %cst_19 : f32 to vector<48x48xf32>
    %41 = arith.mulf %39, %40 : vector<48x48xf32>
    %42 = arith.addf %41, %25 : vector<48x48xf32>
    %cst_20 = arith.constant dense<0xFF800000> : vector<48xf32>
    %43 = vector.multi_reduction <maximumf>, %42, %cst_20 [1] : vector<48x48xf32> to vector<48xf32>
    %44 = vector.shape_cast %43 : vector<48xf32> to vector<48x1xf32>
    %45 = vector.broadcast %44 : vector<48x1xf32> to vector<48x48xf32>
    %46 = arith.subf %42, %45 : vector<48x48xf32>
    %47 = math.exp %46 : vector<48x48xf32>
    %cst_21 = arith.constant dense<0.000000e+00> : vector<48xf32>
    %48 = vector.multi_reduction <add>, %47, %cst_21 [1] : vector<48x48xf32> to vector<48xf32>
    %49 = vector.shape_cast %48 : vector<48xf32> to vector<48x1xf32>
    %50 = vector.broadcast %49 : vector<48x1xf32> to vector<48x48xf32>
    %51 = arith.divf %47, %50 : vector<48x48xf32>
    %cst_22 = arith.constant dense<0.000000e+00> : vector<48x16xf32>
    %52 = tpu.matmul %51, %38, %cst_22 {dimension_numbers = #tpu.dot_dimension_numbers<[1], [0], [0], [1], [0, 0, 1, 1], [], []>} : vector<48x48xf32>, vector<48x16xf32>, vector<48x16xf32> -> vector<48x16xf32>
    %53 = vector.extract_strided_slice %33 {offsets = [0, 16], sizes = [48, 16], strides = [1, 1]} : vector<48x32xf32> to vector<48x16xf32>
    %54 = vector.extract_strided_slice %34 {offsets = [0, 16], sizes = [48, 16], strides = [1, 1]} : vector<48x32xf32> to vector<48x16xf32>
    %55 = vector.extract_strided_slice %35 {offsets = [0, 16], sizes = [48, 16], strides = [1, 1]} : vector<48x32xf32> to vector<48x16xf32>
    "tpu.trace_start"() <{level = 10 : i32, message = "qd,kd->qk"}> : () -> ()
    %cst_23 = arith.constant dense<0.000000e+00> : vector<48x48xf32>
    %56 = tpu.matmul %53, %54, %cst_23 {dimension_numbers = #tpu.dot_dimension_numbers<[1], [1], [0], [0], [0, 0, 1, 0], [], []>} : vector<48x16xf32>, vector<48x16xf32>, vector<48x48xf32> -> vector<48x48xf32>
    "tpu.trace_stop"() : () -> ()
    %cst_24 = arith.constant 2.500000e-01 : f32
    %57 = vector.broadcast %cst_24 : f32 to vector<48x48xf32>
    %58 = arith.mulf %56, %57 : vector<48x48xf32>
    %59 = arith.addf %58, %25 : vector<48x48xf32>
    %cst_25 = arith.constant dense<0xFF800000> : vector<48xf32>
    %60 = vector.multi_reduction <maximumf>, %59, %cst_25 [1] : vector<48x48xf32> to vector<48xf32>
    %61 = vector.shape_cast %60 : vector<48xf32> to vector<48x1xf32>
    %62 = vector.broadcast %61 : vector<48x1xf32> to vector<48x48xf32>
    %63 = arith.subf %59, %62 : vector<48x48xf32>
    %64 = math.exp %63 : vector<48x48xf32>
    %cst_26 = arith.constant dense<0.000000e+00> : vector<48xf32>
    %65 = vector.multi_reduction <add>, %64, %cst_26 [1] : vector<48x48xf32> to vector<48xf32>
    %66 = vector.shape_cast %65 : vector<48xf32> to vector<48x1xf32>
    %67 = vector.broadcast %66 : vector<48x1xf32> to vector<48x48xf32>
    %68 = arith.divf %64, %67 : vector<48x48xf32>
    %cst_27 = arith.constant dense<0.000000e+00> : vector<48x16xf32>
    %69 = tpu.matmul %68, %55, %cst_27 {dimension_numbers = #tpu.dot_dimension_numbers<[1], [0], [0], [1], [0, 0, 1, 1], [], []>} : vector<48x48xf32>, vector<48x16xf32>, vector<48x16xf32> -> vector<48x16xf32>
    %70 = tpu.concatenate %52, %69 in 1 : vector<48x16xf32>, vector<48x16xf32> -> vector<48x32xf32>
    %c0_28 = arith.constant 0 : index
    %c0_29 = arith.constant 0 : index
    %c0_30 = arith.constant 0 : index
    %71 = vector.load %arg6[%c0_28, %c0_29, %c0_30] : memref<2x32x32xf32, #tpu.memory_space<vmem>>, vector<1x32x32xf32>
    %72 = vector.shape_cast %71 : vector<1x32x32xf32> to vector<32x32xf32>
    %cst_31 = arith.constant dense<0.000000e+00> : vector<48x32xf32>
    %73 = tpu.matmul %70, %72, %cst_31 {dimension_numbers = #tpu.dot_dimension_numbers<[1], [0], [0], [1], [0, 0, 1, 1], [], []>} : vector<48x32xf32>, vector<32x32xf32>, vector<48x32xf32> -> vector<48x32xf32>
    %c0_32 = arith.constant 0 : index
    %c0_33 = arith.constant 0 : index
    %c0_34 = arith.constant 0 : index
    %74 = vector.load %arg7[%c0_32, %c0_33, %c0_34] : memref<2x1x32xf32, #tpu.memory_space<vmem>>, vector<1x1x32xf32>
    %75 = vector.shape_cast %74 : vector<1x1x32xf32> to vector<1x32xf32>
    %76 = vector.broadcast %75 : vector<1x32xf32> to vector<48x32xf32>
    %77 = arith.addf %73, %76 : vector<48x32xf32>
    %78 = arith.addf %24, %77 : vector<48x32xf32>
    %c0_35 = arith.constant 0 : index
    %c0_36 = arith.constant 0 : index
    %c0_37 = arith.constant 0 : index
    %79 = vector.load %arg8[%c0_35, %c0_36, %c0_37] : memref<2x1x32xf32, #tpu.memory_space<vmem>>, vector<1x1x32xf32>
    %80 = vector.shape_cast %79 : vector<1x1x32xf32> to vector<1x32xf32>
    %c0_38 = arith.constant 0 : index
    %c0_39 = arith.constant 0 : index
    %c0_40 = arith.constant 0 : index
    %81 = vector.load %arg9[%c0_38, %c0_39, %c0_40] : memref<2x1x32xf32, #tpu.memory_space<vmem>>, vector<1x1x32xf32>
    %82 = vector.shape_cast %81 : vector<1x1x32xf32> to vector<1x32xf32>
    %cst_41 = arith.constant dense<0.000000e+00> : vector<48xf32>
    %83 = vector.multi_reduction <add>, %78, %cst_41 [1] : vector<48x32xf32> to vector<48xf32>
    %84 = vector.shape_cast %83 : vector<48xf32> to vector<48x1xf32>
    %cst_42 = arith.constant 3.200000e+01 : f32
    %85 = vector.broadcast %cst_42 : f32 to vector<48x1xf32>
    %86 = arith.divf %84, %85 : vector<48x1xf32>
    %87 = vector.broadcast %86 : vector<48x1xf32> to vector<48x32xf32>
    %88 = arith.subf %78, %87 : vector<48x32xf32>
    %89 = arith.mulf %88, %88 : vector<48x32xf32>
    %cst_43 = arith.constant dense<0.000000e+00> : vector<48xf32>
    %90 = vector.multi_reduction <add>, %89, %cst_43 [1] : vector<48x32xf32> to vector<48xf32>
    %91 = vector.shape_cast %90 : vector<48xf32> to vector<48x1xf32>
    %cst_44 = arith.constant 3.200000e+01 : f32
    %92 = vector.broadcast %cst_44 : f32 to vector<48x1xf32>
    %93 = arith.divf %91, %92 : vector<48x1xf32>
    %94 = vector.broadcast %86 : vector<48x1xf32> to vector<48x32xf32>
    %95 = arith.subf %78, %94 : vector<48x32xf32>
    %cst_45 = arith.constant 9.99999996E-13 : f32
    %96 = vector.broadcast %cst_45 : f32 to vector<48x1xf32>
    %97 = arith.addf %93, %96 : vector<48x1xf32>
    %98 = math.rsqrt %97 : vector<48x1xf32>
    %99 = vector.broadcast %98 : vector<48x1xf32> to vector<48x32xf32>
    %100 = arith.mulf %95, %99 : vector<48x32xf32>
    %101 = vector.broadcast %80 : vector<1x32xf32> to vector<48x32xf32>
    %102 = arith.mulf %100, %101 : vector<48x32xf32>
    %103 = vector.broadcast %82 : vector<1x32xf32> to vector<48x32xf32>
    %104 = arith.addf %102, %103 : vector<48x32xf32>
    %c0_46 = arith.constant 0 : index
    %c0_47 = arith.constant 0 : index
    %c0_48 = arith.constant 0 : index
    %105 = vector.load %arg10[%c0_46, %c0_47, %c0_48] : memref<2x32x64xf32, #tpu.memory_space<vmem>>, vector<1x32x64xf32>
    %106 = vector.shape_cast %105 : vector<1x32x64xf32> to vector<32x64xf32>
    %cst_49 = arith.constant dense<0.000000e+00> : vector<48x64xf32>
    %107 = tpu.matmul %104, %106, %cst_49 {dimension_numbers = #tpu.dot_dimension_numbers<[1], [0], [0], [1], [0, 0, 1, 1], [], []>} : vector<48x32xf32>, vector<32x64xf32>, vector<48x64xf32> -> vector<48x64xf32>
    %c0_50 = arith.constant 0 : index
    %c0_51 = arith.constant 0 : index
    %c0_52 = arith.constant 0 : index
    %108 = vector.load %arg11[%c0_50, %c0_51, %c0_52] : memref<2x1x64xf32, #tpu.memory_space<vmem>>, vector<1x1x64xf32>
    %109 = vector.shape_cast %108 : vector<1x1x64xf32> to vector<1x64xf32>
    %110 = vector.broadcast %109 : vector<1x64xf32> to vector<48x64xf32>
    %111 = arith.addf %107, %110 : vector<48x64xf32>
    %112 = arith.mulf %111, %111 : vector<48x64xf32>
    %113 = arith.mulf %111, %112 : vector<48x64xf32>
    %cst_53 = arith.constant 4.471500e-02 : f32
    %114 = vector.broadcast %cst_53 : f32 to vector<48x64xf32>
    %115 = arith.mulf %114, %113 : vector<48x64xf32>
    %116 = arith.addf %111, %115 : vector<48x64xf32>
    %cst_54 = arith.constant 0.797884583 : f32
    %117 = vector.broadcast %cst_54 : f32 to vector<48x64xf32>
    %118 = arith.mulf %117, %116 : vector<48x64xf32>
    %119 = math.tanh %118 : vector<48x64xf32>
    %cst_55 = arith.constant 1.000000e+00 : f32
    %120 = vector.broadcast %cst_55 : f32 to vector<48x64xf32>
    %121 = arith.addf %120, %119 : vector<48x64xf32>
    %cst_56 = arith.constant 5.000000e-01 : f32
    %122 = vector.broadcast %cst_56 : f32 to vector<48x64xf32>
    %123 = arith.mulf %122, %121 : vector<48x64xf32>
    %124 = arith.mulf %111, %123 : vector<48x64xf32>
    %c0_57 = arith.constant 0 : index
    %c0_58 = arith.constant 0 : index
    %c0_59 = arith.constant 0 : index
    %125 = vector.load %arg12[%c0_57, %c0_58, %c0_59] : memref<2x64x32xf32, #tpu.memory_space<vmem>>, vector<1x64x32xf32>
    %126 = vector.shape_cast %125 : vector<1x64x32xf32> to vector<64x32xf32>
    %cst_60 = arith.constant dense<0.000000e+00> : vector<48x32xf32>
    %127 = tpu.matmul %124, %126, %cst_60 {dimension_numbers = #tpu.dot_dimension_numbers<[1], [0], [0], [1], [0, 0, 1, 1], [], []>} : vector<48x64xf32>, vector<64x32xf32>, vector<48x32xf32> -> vector<48x32xf32>
    %c0_61 = arith.constant 0 : index
    %c0_62 = arith.constant 0 : index
    %c0_63 = arith.constant 0 : index
    %128 = vector.load %arg13[%c0_61, %c0_62, %c0_63] : memref<2x1x32xf32, #tpu.memory_space<vmem>>, vector<1x1x32xf32>
    %129 = vector.shape_cast %128 : vector<1x1x32xf32> to vector<1x32xf32>
    %130 = vector.broadcast %129 : vector<1x32xf32> to vector<48x32xf32>
    %131 = arith.addf %127, %130 : vector<48x32xf32>
    %132 = arith.addf %104, %131 : vector<48x32xf32>
    %c0_64 = arith.constant 0 : index
    %c0_65 = arith.constant 0 : index
    %c0_66 = arith.constant 0 : index
    %133 = vector.load %arg14[%c0_64, %c0_65, %c0_66] : memref<2x1x32xf32, #tpu.memory_space<vmem>>, vector<1x1x32xf32>
    %134 = vector.shape_cast %133 : vector<1x1x32xf32> to vector<1x32xf32>
    %c0_67 = arith.constant 0 : index
    %c0_68 = arith.constant 0 : index
    %c0_69 = arith.constant 0 : index
    %135 = vector.load %arg15[%c0_67, %c0_68, %c0_69] : memref<2x1x32xf32, #tpu.memory_space<vmem>>, vector<1x1x32xf32>
    %136 = vector.shape_cast %135 : vector<1x1x32xf32> to vector<1x32xf32>
    %cst_70 = arith.constant dense<0.000000e+00> : vector<48xf32>
    %137 = vector.multi_reduction <add>, %132, %cst_70 [1] : vector<48x32xf32> to vector<48xf32>
    %138 = vector.shape_cast %137 : vector<48xf32> to vector<48x1xf32>
    %cst_71 = arith.constant 3.200000e+01 : f32
    %139 = vector.broadcast %cst_71 : f32 to vector<48x1xf32>
    %140 = arith.divf %138, %139 : vector<48x1xf32>
    %141 = vector.broadcast %140 : vector<48x1xf32> to vector<48x32xf32>
    %142 = arith.subf %132, %141 : vector<48x32xf32>
    %143 = arith.mulf %142, %142 : vector<48x32xf32>
    %cst_72 = arith.constant dense<0.000000e+00> : vector<48xf32>
    %144 = vector.multi_reduction <add>, %143, %cst_72 [1] : vector<48x32xf32> to vector<48xf32>
    %145 = vector.shape_cast %144 : vector<48xf32> to vector<48x1xf32>
    %cst_73 = arith.constant 3.200000e+01 : f32
    %146 = vector.broadcast %cst_73 : f32 to vector<48x1xf32>
    %147 = arith.divf %145, %146 : vector<48x1xf32>
    %148 = vector.broadcast %140 : vector<48x1xf32> to vector<48x32xf32>
    %149 = arith.subf %132, %148 : vector<48x32xf32>
    %cst_74 = arith.constant 9.99999996E-13 : f32
    %150 = vector.broadcast %cst_74 : f32 to vector<48x1xf32>
    %151 = arith.addf %147, %150 : vector<48x1xf32>
    %152 = math.rsqrt %151 : vector<48x1xf32>
    %153 = vector.broadcast %152 : vector<48x1xf32> to vector<48x32xf32>
    %154 = arith.mulf %149, %153 : vector<48x32xf32>
    %155 = vector.broadcast %134 : vector<1x32xf32> to vector<48x32xf32>
    %156 = arith.mulf %154, %155 : vector<48x32xf32>
    %157 = vector.broadcast %136 : vector<1x32xf32> to vector<48x32xf32>
    %158 = arith.addf %156, %157 : vector<48x32xf32>
    %c1 = arith.constant 1 : index
    %c0_75 = arith.constant 0 : index
    %c0_76 = arith.constant 0 : index
    %159 = vector.load %arg4[%c1, %c0_75, %c0_76] : memref<2x32x96xf32, #tpu.memory_space<vmem>>, vector<1x32x96xf32>
    %160 = vector.shape_cast %159 : vector<1x32x96xf32> to vector<32x96xf32>
    %cst_77 = arith.constant dense<0.000000e+00> : vector<48x96xf32>
    %161 = tpu.matmul %158, %160, %cst_77 {dimension_numbers = #tpu.dot_dimension_numbers<[1], [0], [0], [1], [0, 0, 1, 1], [], []>} : vector<48x32xf32>, vector<32x96xf32>, vector<48x96xf32> -> vector<48x96xf32>
    %c1_78 = arith.constant 1 : index
    %c0_79 = arith.constant 0 : index
    %c0_80 = arith.constant 0 : index
    %162 = vector.load %arg5[%c1_78, %c0_79, %c0_80] : memref<2x1x96xf32, #tpu.memory_space<vmem>>, vector<1x1x96xf32>
    %163 = vector.shape_cast %162 : vector<1x1x96xf32> to vector<1x96xf32>
    %164 = vector.broadcast %163 : vector<1x96xf32> to vector<48x96xf32>
    %165 = arith.addf %161, %164 : vector<48x96xf32>
    %166 = vector.extract_strided_slice %165 {offsets = [0, 0], sizes = [48, 32], strides = [1, 1]} : vector<48x96xf32> to vector<48x32xf32>
    %167 = vector.extract_strided_slice %165 {offsets = [0, 32], sizes = [48, 32], strides = [1, 1]} : vector<48x96xf32> to vector<48x32xf32>
    %168 = vector.extract_strided_slice %165 {offsets = [0, 64], sizes = [48, 32], strides = [1, 1]} : vector<48x96xf32> to vector<48x32xf32>
    %169 = vector.extract_strided_slice %166 {offsets = [0, 0], sizes = [48, 16], strides = [1, 1]} : vector<48x32xf32> to vector<48x16xf32>
    %170 = vector.extract_strided_slice %167 {offsets = [0, 0], sizes = [48, 16], strides = [1, 1]} : vector<48x32xf32> to vector<48x16xf32>
    %171 = vector.extract_strided_slice %168 {offsets = [0, 0], sizes = [48, 16], strides = [1, 1]} : vector<48x32xf32> to vector<48x16xf32>
    "tpu.trace_start"() <{level = 10 : i32, message = "qd,kd->qk"}> : () -> ()
    %cst_81 = arith.constant dense<0.000000e+00> : vector<48x48xf32>
    %172 = tpu.matmul %169, %170, %cst_81 {dimension_numbers = #tpu.dot_dimension_numbers<[1], [1], [0], [0], [0, 0, 1, 0], [], []>} : vector<48x16xf32>, vector<48x16xf32>, vector<48x48xf32> -> vector<48x48xf32>
    "tpu.trace_stop"() : () -> ()
    %cst_82 = arith.constant 2.500000e-01 : f32
    %173 = vector.broadcast %cst_82 : f32 to vector<48x48xf32>
    %174 = arith.mulf %172, %173 : vector<48x48xf32>
    %175 = arith.addf %174, %25 : vector<48x48xf32>
    %cst_83 = arith.constant dense<0xFF800000> : vector<48xf32>
    %176 = vector.multi_reduction <maximumf>, %175, %cst_83 [1] : vector<48x48xf32> to vector<48xf32>
    %177 = vector.shape_cast %176 : vector<48xf32> to vector<48x1xf32>
    %178 = vector.broadcast %177 : vector<48x1xf32> to vector<48x48xf32>
    %179 = arith.subf %175, %178 : vector<48x48xf32>
    %180 = math.exp %179 : vector<48x48xf32>
    %cst_84 = arith.constant dense<0.000000e+00> : vector<48xf32>
    %181 = vector.multi_reduction <add>, %180, %cst_84 [1] : vector<48x48xf32> to vector<48xf32>
    %182 = vector.shape_cast %181 : vector<48xf32> to vector<48x1xf32>
    %183 = vector.broadcast %182 : vector<48x1xf32> to vector<48x48xf32>
    %184 = arith.divf %180, %183 : vector<48x48xf32>
    %cst_85 = arith.constant dense<0.000000e+00> : vector<48x16xf32>
    %185 = tpu.matmul %184, %171, %cst_85 {dimension_numbers = #tpu.dot_dimension_numbers<[1], [0], [0], [1], [0, 0, 1, 1], [], []>} : vector<48x48xf32>, vector<48x16xf32>, vector<48x16xf32> -> vector<48x16xf32>
    %186 = vector.extract_strided_slice %166 {offsets = [0, 16], sizes = [48, 16], strides = [1, 1]} : vector<48x32xf32> to vector<48x16xf32>
    %187 = vector.extract_strided_slice %167 {offsets = [0, 16], sizes = [48, 16], strides = [1, 1]} : vector<48x32xf32> to vector<48x16xf32>
    %188 = vector.extract_strided_slice %168 {offsets = [0, 16], sizes = [48, 16], strides = [1, 1]} : vector<48x32xf32> to vector<48x16xf32>
    "tpu.trace_start"() <{level = 10 : i32, message = "qd,kd->qk"}> : () -> ()
    %cst_86 = arith.constant dense<0.000000e+00> : vector<48x48xf32>
    %189 = tpu.matmul %186, %187, %cst_86 {dimension_numbers = #tpu.dot_dimension_numbers<[1], [1], [0], [0], [0, 0, 1, 0], [], []>} : vector<48x16xf32>, vector<48x16xf32>, vector<48x48xf32> -> vector<48x48xf32>
    "tpu.trace_stop"() : () -> ()
    %cst_87 = arith.constant 2.500000e-01 : f32
    %190 = vector.broadcast %cst_87 : f32 to vector<48x48xf32>
    %191 = arith.mulf %189, %190 : vector<48x48xf32>
    %192 = arith.addf %191, %25 : vector<48x48xf32>
    %cst_88 = arith.constant dense<0xFF800000> : vector<48xf32>
    %193 = vector.multi_reduction <maximumf>, %192, %cst_88 [1] : vector<48x48xf32> to vector<48xf32>
    %194 = vector.shape_cast %193 : vector<48xf32> to vector<48x1xf32>
    %195 = vector.broadcast %194 : vector<48x1xf32> to vector<48x48xf32>
    %196 = arith.subf %192, %195 : vector<48x48xf32>
    %197 = math.exp %196 : vector<48x48xf32>
    %cst_89 = arith.constant dense<0.000000e+00> : vector<48xf32>
    %198 = vector.multi_reduction <add>, %197, %cst_89 [1] : vector<48x48xf32> to vector<48xf32>
    %199 = vector.shape_cast %198 : vector<48xf32> to vector<48x1xf32>
    %200 = vector.broadcast %199 : vector<48x1xf32> to vector<48x48xf32>
    %201 = arith.divf %197, %200 : vector<48x48xf32>
    %cst_90 = arith.constant dense<0.000000e+00> : vector<48x16xf32>
    %202 = tpu.matmul %201, %188, %cst_90 {dimension_numbers = #tpu.dot_dimension_numbers<[1], [0], [0], [1], [0, 0, 1, 1], [], []>} : vector<48x48xf32>, vector<48x16xf32>, vector<48x16xf32> -> vector<48x16xf32>
    %203 = tpu.concatenate %185, %202 in 1 : vector<48x16xf32>, vector<48x16xf32> -> vector<48x32xf32>
    %c1_91 = arith.constant 1 : index
    %c0_92 = arith.constant 0 : index
    %c0_93 = arith.constant 0 : index
    %204 = vector.load %arg6[%c1_91, %c0_92, %c0_93] : memref<2x32x32xf32, #tpu.memory_space<vmem>>, vector<1x32x32xf32>
    %205 = vector.shape_cast %204 : vector<1x32x32xf32> to vector<32x32xf32>
    %cst_94 = arith.constant dense<0.000000e+00> : vector<48x32xf32>
    %206 = tpu.matmul %203, %205, %cst_94 {dimension_numbers = #tpu.dot_dimension_numbers<[1], [0], [0], [1], [0, 0, 1, 1], [], []>} : vector<48x32xf32>, vector<32x32xf32>, vector<48x32xf32> -> vector<48x32xf32>
    %c1_95 = arith.constant 1 : index
    %c0_96 = arith.constant 0 : index
    %c0_97 = arith.constant 0 : index
    %207 = vector.load %arg7[%c1_95, %c0_96, %c0_97] : memref<2x1x32xf32, #tpu.memory_space<vmem>>, vector<1x1x32xf32>
    %208 = vector.shape_cast %207 : vector<1x1x32xf32> to vector<1x32xf32>
    %209 = vector.broadcast %208 : vector<1x32xf32> to vector<48x32xf32>
    %210 = arith.addf %206, %209 : vector<48x32xf32>
    %211 = arith.addf %158, %210 : vector<48x32xf32>
    %c1_98 = arith.constant 1 : index
    %c0_99 = arith.constant 0 : index
    %c0_100 = arith.constant 0 : index
    %212 = vector.load %arg8[%c1_98, %c0_99, %c0_100] : memref<2x1x32xf32, #tpu.memory_space<vmem>>, vector<1x1x32xf32>
    %213 = vector.shape_cast %212 : vector<1x1x32xf32> to vector<1x32xf32>
    %c1_101 = arith.constant 1 : index
    %c0_102 = arith.constant 0 : index
    %c0_103 = arith.constant 0 : index
    %214 = vector.load %arg9[%c1_101, %c0_102, %c0_103] : memref<2x1x32xf32, #tpu.memory_space<vmem>>, vector<1x1x32xf32>
    %215 = vector.shape_cast %214 : vector<1x1x32xf32> to vector<1x32xf32>
    %cst_104 = arith.constant dense<0.000000e+00> : vector<48xf32>
    %216 = vector.multi_reduction <add>, %211, %cst_104 [1] : vector<48x32xf32> to vector<48xf32>
    %217 = vector.shape_cast %216 : vector<48xf32> to vector<48x1xf32>
    %cst_105 = arith.constant 3.200000e+01 : f32
    %218 = vector.broadcast %cst_105 : f32 to vector<48x1xf32>
    %219 = arith.divf %217, %218 : vector<48x1xf32>
    %220 = vector.broadcast %219 : vector<48x1xf32> to vector<48x32xf32>
    %221 = arith.subf %211, %220 : vector<48x32xf32>
    %222 = arith.mulf %221, %221 : vector<48x32xf32>
    %cst_106 = arith.constant dense<0.000000e+00> : vector<48xf32>
    %223 = vector.multi_reduction <add>, %222, %cst_106 [1] : vector<48x32xf32> to vector<48xf32>
    %224 = vector.shape_cast %223 : vector<48xf32> to vector<48x1xf32>
    %cst_107 = arith.constant 3.200000e+01 : f32
    %225 = vector.broadcast %cst_107 : f32 to vector<48x1xf32>
    %226 = arith.divf %224, %225 : vector<48x1xf32>
    %227 = vector.broadcast %219 : vector<48x1xf32> to vector<48x32xf32>
    %228 = arith.subf %211, %227 : vector<48x32xf32>
    %cst_108 = arith.constant 9.99999996E-13 : f32
    %229 = vector.broadcast %cst_108 : f32 to vector<48x1xf32>
    %230 = arith.addf %226, %229 : vector<48x1xf32>
    %231 = math.rsqrt %230 : vector<48x1xf32>
    %232 = vector.broadcast %231 : vector<48x1xf32> to vector<48x32xf32>
    %233 = arith.mulf %228, %232 : vector<48x32xf32>
    %234 = vector.broadcast %213 : vector<1x32xf32> to vector<48x32xf32>
    %235 = arith.mulf %233, %234 : vector<48x32xf32>
    %236 = vector.broadcast %215 : vector<1x32xf32> to vector<48x32xf32>
    %237 = arith.addf %235, %236 : vector<48x32xf32>
    %c1_109 = arith.constant 1 : index
    %c0_110 = arith.constant 0 : index
    %c0_111 = arith.constant 0 : index
    %238 = vector.load %arg10[%c1_109, %c0_110, %c0_111] : memref<2x32x64xf32, #tpu.memory_space<vmem>>, vector<1x32x64xf32>
    %239 = vector.shape_cast %238 : vector<1x32x64xf32> to vector<32x64xf32>
    %cst_112 = arith.constant dense<0.000000e+00> : vector<48x64xf32>
    %240 = tpu.matmul %237, %239, %cst_112 {dimension_numbers = #tpu.dot_dimension_numbers<[1], [0], [0], [1], [0, 0, 1, 1], [], []>} : vector<48x32xf32>, vector<32x64xf32>, vector<48x64xf32> -> vector<48x64xf32>
    %c1_113 = arith.constant 1 : index
    %c0_114 = arith.constant 0 : index
    %c0_115 = arith.constant 0 : index
    %241 = vector.load %arg11[%c1_113, %c0_114, %c0_115] : memref<2x1x64xf32, #tpu.memory_space<vmem>>, vector<1x1x64xf32>
    %242 = vector.shape_cast %241 : vector<1x1x64xf32> to vector<1x64xf32>
    %243 = vector.broadcast %242 : vector<1x64xf32> to vector<48x64xf32>
    %244 = arith.addf %240, %243 : vector<48x64xf32>
    %245 = arith.mulf %244, %244 : vector<48x64xf32>
    %246 = arith.mulf %244, %245 : vector<48x64xf32>
    %cst_116 = arith.constant 4.471500e-02 : f32
    %247 = vector.broadcast %cst_116 : f32 to vector<48x64xf32>
    %248 = arith.mulf %247, %246 : vector<48x64xf32>
    %249 = arith.addf %244, %248 : vector<48x64xf32>
    %cst_117 = arith.constant 0.797884583 : f32
    %250 = vector.broadcast %cst_117 : f32 to vector<48x64xf32>
    %251 = arith.mulf %250, %249 : vector<48x64xf32>
    %252 = math.tanh %251 : vector<48x64xf32>
    %cst_118 = arith.constant 1.000000e+00 : f32
    %253 = vector.broadcast %cst_118 : f32 to vector<48x64xf32>
    %254 = arith.addf %253, %252 : vector<48x64xf32>
    %cst_119 = arith.constant 5.000000e-01 : f32
    %255 = vector.broadcast %cst_119 : f32 to vector<48x64xf32>
    %256 = arith.mulf %255, %254 : vector<48x64xf32>
    %257 = arith.mulf %244, %256 : vector<48x64xf32>
    %c1_120 = arith.constant 1 : index
    %c0_121 = arith.constant 0 : index
    %c0_122 = arith.constant 0 : index
    %258 = vector.load %arg12[%c1_120, %c0_121, %c0_122] : memref<2x64x32xf32, #tpu.memory_space<vmem>>, vector<1x64x32xf32>
    %259 = vector.shape_cast %258 : vector<1x64x32xf32> to vector<64x32xf32>
    %cst_123 = arith.constant dense<0.000000e+00> : vector<48x32xf32>
    %260 = tpu.matmul %257, %259, %cst_123 {dimension_numbers = #tpu.dot_dimension_numbers<[1], [0], [0], [1], [0, 0, 1, 1], [], []>} : vector<48x64xf32>, vector<64x32xf32>, vector<48x32xf32> -> vector<48x32xf32>
    %c1_124 = arith.constant 1 : index
    %c0_125 = arith.constant 0 : index
    %c0_126 = arith.constant 0 : index
    %261 = vector.load %arg13[%c1_124, %c0_125, %c0_126] : memref<2x1x32xf32, #tpu.memory_space<vmem>>, vector<1x1x32xf32>
    %262 = vector.shape_cast %261 : vector<1x1x32xf32> to vector<1x32xf32>
    %263 = vector.broadcast %262 : vector<1x32xf32> to vector<48x32xf32>
    %264 = arith.addf %260, %263 : vector<48x32xf32>
    %265 = arith.addf %237, %264 : vector<48x32xf32>
    %c1_127 = arith.constant 1 : index
    %c0_128 = arith.constant 0 : index
    %c0_129 = arith.constant 0 : index
    %266 = vector.load %arg14[%c1_127, %c0_128, %c0_129] : memref<2x1x32xf32, #tpu.memory_space<vmem>>, vector<1x1x32xf32>
    %267 = vector.shape_cast %266 : vector<1x1x32xf32> to vector<1x32xf32>
    %c1_130 = arith.constant 1 : index
    %c0_131 = arith.constant 0 : index
    %c0_132 = arith.constant 0 : index
    %268 = vector.load %arg15[%c1_130, %c0_131, %c0_132] : memref<2x1x32xf32, #tpu.memory_space<vmem>>, vector<1x1x32xf32>
    %269 = vector.shape_cast %268 : vector<1x1x32xf32> to vector<1x32xf32>
    %cst_133 = arith.constant dense<0.000000e+00> : vector<48xf32>
    %270 = vector.multi_reduction <add>, %265, %cst_133 [1] : vector<48x32xf32> to vector<48xf32>
    %271 = vector.shape_cast %270 : vector<48xf32> to vector<48x1xf32>
    %cst_134 = arith.constant 3.200000e+01 : f32
    %272 = vector.broadcast %cst_134 : f32 to vector<48x1xf32>
    %273 = arith.divf %271, %272 : vector<48x1xf32>
    %274 = vector.broadcast %273 : vector<48x1xf32> to vector<48x32xf32>
    %275 = arith.subf %265, %274 : vector<48x32xf32>
    %276 = arith.mulf %275, %275 : vector<48x32xf32>
    %cst_135 = arith.constant dense<0.000000e+00> : vector<48xf32>
    %277 = vector.multi_reduction <add>, %276, %cst_135 [1] : vector<48x32xf32> to vector<48xf32>
    %278 = vector.shape_cast %277 : vector<48xf32> to vector<48x1xf32>
    %cst_136 = arith.constant 3.200000e+01 : f32
    %279 = vector.broadcast %cst_136 : f32 to vector<48x1xf32>
    %280 = arith.divf %278, %279 : vector<48x1xf32>
    %281 = vector.broadcast %273 : vector<48x1xf32> to vector<48x32xf32>
    %282 = arith.subf %265, %281 : vector<48x32xf32>
    %cst_137 = arith.constant 9.99999996E-13 : f32
    %283 = vector.broadcast %cst_137 : f32 to vector<48x1xf32>
    %284 = arith.addf %280, %283 : vector<48x1xf32>
    %285 = math.rsqrt %284 : vector<48x1xf32>
    %286 = vector.broadcast %285 : vector<48x1xf32> to vector<48x32xf32>
    %287 = arith.mulf %282, %286 : vector<48x32xf32>
    %288 = vector.broadcast %267 : vector<1x32xf32> to vector<48x32xf32>
    %289 = arith.mulf %287, %288 : vector<48x32xf32>
    %290 = vector.broadcast %269 : vector<1x32xf32> to vector<48x32xf32>
    %291 = arith.addf %289, %290 : vector<48x32xf32>
    %292 = vector.extract_strided_slice %291 {offsets = [0, 0], sizes = [1, 32], strides = [1, 1]} : vector<48x32xf32> to vector<1x32xf32>
    %293 = vector.extract_strided_slice %291 {offsets = [8, 0], sizes = [1, 32], strides = [1, 1]} : vector<48x32xf32> to vector<1x32xf32>
    %294 = vector.extract_strided_slice %291 {offsets = [16, 0], sizes = [1, 32], strides = [1, 1]} : vector<48x32xf32> to vector<1x32xf32>
    %295 = vector.extract_strided_slice %291 {offsets = [24, 0], sizes = [1, 32], strides = [1, 1]} : vector<48x32xf32> to vector<1x32xf32>
    %296 = vector.extract_strided_slice %291 {offsets = [32, 0], sizes = [1, 32], strides = [1, 1]} : vector<48x32xf32> to vector<1x32xf32>
    %297 = vector.extract_strided_slice %291 {offsets = [40, 0], sizes = [1, 32], strides = [1, 1]} : vector<48x32xf32> to vector<1x32xf32>
    %298 = tpu.concatenate %292, %293, %294, %295, %296, %297 in 0 : vector<1x32xf32>, vector<1x32xf32>, vector<1x32xf32>, vector<1x32xf32>, vector<1x32xf32>, vector<1x32xf32> -> vector<6x32xf32>
    %c0_138 = arith.constant 0 : index
    %c0_139 = arith.constant 0 : index
    %299 = vector.load %arg16[%c0_138, %c0_139] : memref<32x32xf32, #tpu.memory_space<vmem>>, vector<32x32xf32>
    %cst_140 = arith.constant dense<0.000000e+00> : vector<6x32xf32>
    %300 = tpu.matmul %298, %299, %cst_140 {dimension_numbers = #tpu.dot_dimension_numbers<[1], [0], [0], [1], [0, 0, 1, 1], [], []>} : vector<6x32xf32>, vector<32x32xf32>, vector<6x32xf32> -> vector<6x32xf32>
    %c0_141 = arith.constant 0 : index
    %c0_142 = arith.constant 0 : index
    %301 = vector.load %arg17[%c0_141, %c0_142] : memref<1x32xf32, #tpu.memory_space<vmem>>, vector<1x32xf32>
    %302 = vector.broadcast %301 : vector<1x32xf32> to vector<6x32xf32>
    %303 = arith.addf %300, %302 : vector<6x32xf32>
    %304 = math.tanh %303 : vector<6x32xf32>
    %305 = vector.extract_strided_slice %304 {offsets = [0, 0], sizes = [1, 32], strides = [1, 1]} : vector<6x32xf32> to vector<1x32xf32>
    %306 = vector.extract_strided_slice %304 {offsets = [1, 0], sizes = [1, 32], strides = [1, 1]} : vector<6x32xf32> to vector<1x32xf32>
    %307 = arith.maximumf %305, %306 : vector<1x32xf32>
    %308 = vector.extract_strided_slice %304 {offsets = [2, 0], sizes = [1, 32], strides = [1, 1]} : vector<6x32xf32> to vector<1x32xf32>
    %309 = arith.maximumf %307, %308 : vector<1x32xf32>
    %310 = vector.extract_strided_slice %304 {offsets = [3, 0], sizes = [1, 32], strides = [1, 1]} : vector<6x32xf32> to vector<1x32xf32>
    %311 = vector.extract_strided_slice %304 {offsets = [4, 0], sizes = [1, 32], strides = [1, 1]} : vector<6x32xf32> to vector<1x32xf32>
    %312 = arith.maximumf %310, %311 : vector<1x32xf32>
    %313 = vector.extract_strided_slice %304 {offsets = [5, 0], sizes = [1, 32], strides = [1, 1]} : vector<6x32xf32> to vector<1x32xf32>
    %314 = arith.maximumf %312, %313 : vector<1x32xf32>
    %315 = tpu.concatenate %309, %314 in 0 : vector<1x32xf32>, vector<1x32xf32> -> vector<2x32xf32>
    %c0_143 = arith.constant 0 : index
    %c0_144 = arith.constant 0 : index
    %316 = vector.load %arg18[%c0_143, %c0_144] : memref<32x96xf32, #tpu.memory_space<vmem>>, vector<32x96xf32>
    %cst_145 = arith.constant dense<0.000000e+00> : vector<2x96xf32>
    %317 = tpu.matmul %315, %316, %cst_145 {dimension_numbers = #tpu.dot_dimension_numbers<[1], [0], [0], [1], [0, 0, 1, 1], [], []>} : vector<2x32xf32>, vector<32x96xf32>, vector<2x96xf32> -> vector<2x96xf32>
    %c0_146 = arith.constant 0 : index
    %c0_147 = arith.constant 0 : index
    %318 = vector.load %arg19[%c0_146, %c0_147] : memref<1x96xf32, #tpu.memory_space<vmem>>, vector<1x96xf32>
    %319 = vector.broadcast %318 : vector<1x96xf32> to vector<2x96xf32>
    %320 = arith.addf %317, %319 : vector<2x96xf32>
    %cst_148 = arith.constant 0.000000e+00 : f32
    %321 = vector.broadcast %cst_148 : f32 to vector<1x32xf32>
    %322 = vector.extract_strided_slice %320 {offsets = [0, 0], sizes = [1, 96], strides = [1, 1]} : vector<2x96xf32> to vector<1x96xf32>
    %c0_149 = arith.constant 0 : index
    %c0_150 = arith.constant 0 : index
    %323 = vector.load %arg20[%c0_149, %c0_150] : memref<32x96xf32, #tpu.memory_space<vmem>>, vector<32x96xf32>
    %cst_151 = arith.constant dense<0.000000e+00> : vector<1x96xf32>
    %324 = tpu.matmul %321, %323, %cst_151 {dimension_numbers = #tpu.dot_dimension_numbers<[1], [0], [0], [1], [0, 0, 1, 1], [], []>} : vector<1x32xf32>, vector<32x96xf32>, vector<1x96xf32> -> vector<1x96xf32>
    %c0_152 = arith.constant 0 : index
    %c0_153 = arith.constant 0 : index
    %325 = vector.load %arg21[%c0_152, %c0_153] : memref<1x96xf32, #tpu.memory_space<vmem>>, vector<1x96xf32>
    %326 = arith.addf %324, %325 : vector<1x96xf32>
    %327 = vector.extract_strided_slice %322 {offsets = [0, 0], sizes = [1, 32], strides = [1, 1]} : vector<1x96xf32> to vector<1x32xf32>
    %328 = vector.extract_strided_slice %326 {offsets = [0, 0], sizes = [1, 32], strides = [1, 1]} : vector<1x96xf32> to vector<1x32xf32>
    %329 = arith.addf %327, %328 : vector<1x32xf32>
    %cst_154 = arith.constant 0.000000e+00 : f32
    %330 = vector.broadcast %cst_154 : f32 to vector<1x32xf32>
    %331 = arith.subf %330, %329 : vector<1x32xf32>
    %332 = math.exp %331 : vector<1x32xf32>
    %cst_155 = arith.constant 1.000000e+00 : f32
    %333 = vector.broadcast %cst_155 : f32 to vector<1x32xf32>
    %334 = arith.addf %333, %332 : vector<1x32xf32>
    %cst_156 = arith.constant 1.000000e+00 : f32
    %335 = vector.broadcast %cst_156 : f32 to vector<1x32xf32>
    %336 = arith.divf %335, %334 : vector<1x32xf32>
    %337 = vector.extract_strided_slice %322 {offsets = [0, 32], sizes = [1, 32], strides = [1, 1]} : vector<1x96xf32> to vector<1x32xf32>
    %338 = vector.extract_strided_slice %326 {offsets = [0, 32], sizes = [1, 32], strides = [1, 1]} : vector<1x96xf32> to vector<1x32xf32>
    %339 = arith.addf %337, %338 : vector<1x32xf32>
    %cst_157 = arith.constant 0.000000e+00 : f32
    %340 = vector.broadcast %cst_157 : f32 to vector<1x32xf32>
    %341 = arith.subf %340, %339 : vector<1x32xf32>
    %342 = math.exp %341 : vector<1x32xf32>
    %cst_158 = arith.constant 1.000000e+00 : f32
    %343 = vector.broadcast %cst_158 : f32 to vector<1x32xf32>
    %344 = arith.addf %343, %342 : vector<1x32xf32>
    %cst_159 = arith.constant 1.000000e+00 : f32
    %345 = vector.broadcast %cst_159 : f32 to vector<1x32xf32>
    %346 = arith.divf %345, %344 : vector<1x32xf32>
    %347 = vector.extract_strided_slice %322 {offsets = [0, 64], sizes = [1, 32], strides = [1, 1]} : vector<1x96xf32> to vector<1x32xf32>
    %348 = vector.extract_strided_slice %326 {offsets = [0, 64], sizes = [1, 32], strides = [1, 1]} : vector<1x96xf32> to vector<1x32xf32>
    %349 = arith.mulf %336, %348 : vector<1x32xf32>
    %350 = arith.addf %347, %349 : vector<1x32xf32>
    %351 = math.tanh %350 : vector<1x32xf32>
    %cst_160 = arith.constant 1.000000e+00 : f32
    %352 = vector.broadcast %cst_160 : f32 to vector<1x32xf32>
    %353 = arith.subf %352, %346 : vector<1x32xf32>
    %354 = arith.mulf %353, %351 : vector<1x32xf32>
    %355 = arith.mulf %346, %321 : vector<1x32xf32>
    %356 = arith.addf %354, %355 : vector<1x32xf32>
    %357 = vector.extract_strided_slice %320 {offsets = [1, 0], sizes = [1, 96], strides = [1, 1]} : vector<2x96xf32> to vector<1x96xf32>
    %c0_161 = arith.constant 0 : index
    %c0_162 = arith.constant 0 : index
    %358 = vector.load %arg20[%c0_161, %c0_162] : memref<32x96xf32, #tpu.memory_space<vmem>>, vector<32x96xf32>
    %cst_163 = arith.constant dense<0.000000e+00> : vector<1x96xf32>
    %359 = tpu.matmul %356, %358, %cst_163 {dimension_numbers = #tpu.dot_dimension_numbers<[1], [0], [0], [1], [0, 0, 1, 1], [], []>} : vector<1x32xf32>, vector<32x96xf32>, vector<1x96xf32> -> vector<1x96xf32>
    %c0_164 = arith.constant 0 : index
    %c0_165 = arith.constant 0 : index
    %360 = vector.load %arg21[%c0_164, %c0_165] : memref<1x96xf32, #tpu.memory_space<vmem>>, vector<1x96xf32>
    %361 = arith.addf %359, %360 : vector<1x96xf32>
    %362 = vector.extract_strided_slice %357 {offsets = [0, 0], sizes = [1, 32], strides = [1, 1]} : vector<1x96xf32> to vector<1x32xf32>
    %363 = vector.extract_strided_slice %361 {offsets = [0, 0], sizes = [1, 32], strides = [1, 1]} : vector<1x96xf32> to vector<1x32xf32>
    %364 = arith.addf %362, %363 : vector<1x32xf32>
    %cst_166 = arith.constant 0.000000e+00 : f32
    %365 = vector.broadcast %cst_166 : f32 to vector<1x32xf32>
    %366 = arith.subf %365, %364 : vector<1x32xf32>
    %367 = math.exp %366 : vector<1x32xf32>
    %cst_167 = arith.constant 1.000000e+00 : f32
    %368 = vector.broadcast %cst_167 : f32 to vector<1x32xf32>
    %369 = arith.addf %368, %367 : vector<1x32xf32>
    %cst_168 = arith.constant 1.000000e+00 : f32
    %370 = vector.broadcast %cst_168 : f32 to vector<1x32xf32>
    %371 = arith.divf %370, %369 : vector<1x32xf32>
    %372 = vector.extract_strided_slice %357 {offsets = [0, 32], sizes = [1, 32], strides = [1, 1]} : vector<1x96xf32> to vector<1x32xf32>
    %373 = vector.extract_strided_slice %361 {offsets = [0, 32], sizes = [1, 32], strides = [1, 1]} : vector<1x96xf32> to vector<1x32xf32>
    %374 = arith.addf %372, %373 : vector<1x32xf32>
    %cst_169 = arith.constant 0.000000e+00 : f32
    %375 = vector.broadcast %cst_169 : f32 to vector<1x32xf32>
    %376 = arith.subf %375, %374 : vector<1x32xf32>
    %377 = math.exp %376 : vector<1x32xf32>
    %cst_170 = arith.constant 1.000000e+00 : f32
    %378 = vector.broadcast %cst_170 : f32 to vector<1x32xf32>
    %379 = arith.addf %378, %377 : vector<1x32xf32>
    %cst_171 = arith.constant 1.000000e+00 : f32
    %380 = vector.broadcast %cst_171 : f32 to vector<1x32xf32>
    %381 = arith.divf %380, %379 : vector<1x32xf32>
    %382 = vector.extract_strided_slice %357 {offsets = [0, 64], sizes = [1, 32], strides = [1, 1]} : vector<1x96xf32> to vector<1x32xf32>
    %383 = vector.extract_strided_slice %361 {offsets = [0, 64], sizes = [1, 32], strides = [1, 1]} : vector<1x96xf32> to vector<1x32xf32>
    %384 = arith.mulf %371, %383 : vector<1x32xf32>
    %385 = arith.addf %382, %384 : vector<1x32xf32>
    %386 = math.tanh %385 : vector<1x32xf32>
    %cst_172 = arith.constant 1.000000e+00 : f32
    %387 = vector.broadcast %cst_172 : f32 to vector<1x32xf32>
    %388 = arith.subf %387, %381 : vector<1x32xf32>
    %389 = arith.mulf %388, %386 : vector<1x32xf32>
    %390 = arith.mulf %381, %356 : vector<1x32xf32>
    %391 = arith.addf %389, %390 : vector<1x32xf32>
    %392 = tpu.concatenate %356, %391 in 0 : vector<1x32xf32>, vector<1x32xf32> -> vector<2x32xf32>
    %c0_173 = arith.constant 0 : index
    %c0_174 = arith.constant 0 : index
    %393 = vector.load %arg22[%c0_173, %c0_174] : memref<32x32xf32, #tpu.memory_space<vmem>>, vector<32x32xf32>
    %cst_175 = arith.constant dense<0.000000e+00> : vector<2x32xf32>
    %394 = tpu.matmul %392, %393, %cst_175 {dimension_numbers = #tpu.dot_dimension_numbers<[1], [0], [0], [1], [0, 0, 1, 1], [], []>} : vector<2x32xf32>, vector<32x32xf32>, vector<2x32xf32> -> vector<2x32xf32>
    %c0_176 = arith.constant 0 : index
    %c0_177 = arith.constant 0 : index
    %395 = vector.load %arg23[%c0_176, %c0_177] : memref<1x32xf32, #tpu.memory_space<vmem>>, vector<1x32xf32>
    %396 = vector.broadcast %395 : vector<1x32xf32> to vector<2x32xf32>
    %397 = arith.addf %394, %396 : vector<2x32xf32>
    %398 = math.tanh %397 : vector<2x32xf32>
    %c0_178 = arith.constant 0 : index
    %c0_179 = arith.constant 0 : index
    %399 = vector.load %arg24[%c0_178, %c0_179] : memref<1x32xf32, #tpu.memory_space<vmem>>, vector<1x32xf32>
    %400 = vector.broadcast %399 : vector<1x32xf32> to vector<2x32xf32>
    %401 = arith.mulf %398, %400 : vector<2x32xf32>
    %cst_180 = arith.constant dense<0.000000e+00> : vector<2xf32>
    %402 = vector.multi_reduction <add>, %401, %cst_180 [1] : vector<2x32xf32> to vector<2xf32>
    %403 = vector.shape_cast %402 : vector<2xf32> to vector<2x1xf32>
    %cst_181 = arith.constant dense<0xFF800000> : vector<1xf32>
    %404 = vector.multi_reduction <maximumf>, %403, %cst_181 [0] : vector<2x1xf32> to vector<1xf32>
    %405 = vector.shape_cast %404 : vector<1xf32> to vector<1x1xf32>
    %406 = vector.broadcast %405 : vector<1x1xf32> to vector<2x1xf32>
    %407 = arith.subf %403, %406 : vector<2x1xf32>
    %408 = math.exp %407 : vector<2x1xf32>
    %cst_182 = arith.constant dense<0.000000e+00> : vector<1xf32>
    %409 = vector.multi_reduction <add>, %408, %cst_182 [0] : vector<2x1xf32> to vector<1xf32>
    %410 = vector.shape_cast %409 : vector<1xf32> to vector<1x1xf32>
    %411 = vector.broadcast %410 : vector<1x1xf32> to vector<2x1xf32>
    %412 = arith.divf %408, %411 : vector<2x1xf32>
    %413 = vector.broadcast %412 : vector<2x1xf32> to vector<2x32xf32>
    %414 = arith.mulf %413, %392 : vector<2x32xf32>
    %cst_183 = arith.constant dense<0.000000e+00> : vector<32xf32>
    %415 = vector.multi_reduction <add>, %414, %cst_183 [0] : vector<2x32xf32> to vector<32xf32>
    %416 = vector.shape_cast %415 : vector<32xf32> to vector<1x32xf32>
    %c0_184 = arith.constant 0 : index
    %c0_185 = arith.constant 0 : index
    %417 = vector.load %arg25[%c0_184, %c0_185] : memref<32x2xf32, #tpu.memory_space<vmem>>, vector<32x2xf32>
    %cst_186 = arith.constant dense<0.000000e+00> : vector<1x2xf32>
    %418 = tpu.matmul %416, %417, %cst_186 {dimension_numbers = #tpu.dot_dimension_numbers<[1], [0], [0], [1], [0, 0, 1, 1], [], []>} : vector<1x32xf32>, vector<32x2xf32>, vector<1x2xf32> -> vector<1x2xf32>
    %c0_187 = arith.constant 0 : index
    %c0_188 = arith.constant 0 : index
    %419 = vector.load %arg26[%c0_187, %c0_188] : memref<1x2xf32, #tpu.memory_space<vmem>>, vector<1x2xf32>
    %420 = arith.addf %418, %419 : vector<1x2xf32>
    %c0_189 = arith.constant 0 : index
    %c0_190 = arith.constant 0 : index
    %421 = vector.load %arg27[%c0_189, %c0_190] : memref<1x2xf32, #tpu.memory_space<vmem>>, vector<1x2xf32>
    tpu.vector_store %arg27[%c0_189, %c0_190], %420 {strides = array<i32>} : memref<1x2xf32, #tpu.memory_space<vmem>>, vector<1x2xf32>,
    return
  }
}

</mosaic_0001>

<bundles_post_ra>
// kernel: bert_pli_forward.1
= control target key start
LH: loop header
LB: loop body
LE: loop exit
PB: predicated region body
PF: predicated region fallthrough
CT: control target
= control target key end

     0   :  { %vm94_vm0 = vcmask 261120   ;;  %vm346_vm1 = vcmask 130048   ;;  %vm478_vm3 = vcmask 392192   ;;  %s6481_s28 = smov 80   ;;  %vm1485_vm4 = vcmask 523264   ;;  %s6437_s0 = inlined_call_operand.vmem [shape: f32[48,32], index: 0, kind: input, shape index: {}]   ;;  %s6438_s4 = inlined_call_operand.vmem [shape: f32[2,32,96], index: 4, kind: input, shape index: {}]   ;;  %s6439_s2 = inlined_call_operand.vmem [shape: f32[1,32], index: 2, kind: input, shape index: {}]   ;;  %s6440_s3 = inlined_call_operand.vmem [shape: f32[1,32], index: 3, kind: input, shape index: {}]   ;;  %s6441_s5 = inlined_call_operand.vmem [shape: f32[2,1,96], index: 5, kind: input, shape index: {}]   ;;  %s6442_s1 = inlined_call_operand.vmem [shape: f32[48,48], index: 1, kind: input, shape index: {}]   ;;  %s6443_s6 = inlined_call_operand.vmem [shape: f32[2,32,32], index: 6, kind: input, shape index: {}]   ;;  %s6444_s7 = inlined_call_operand.vmem [shape: f32[2,1,32], index: 7, kind: input, shape index: {}]   ;;  %s6445_s10 = inlined_call_operand.vmem [shape: f32[2,32,64], index: 10, kind: input, shape index: {}]   ;;  %s6446_s8 = inlined_call_operand.vmem [shape: f32[2,1,32], index: 8, kind: input, shape index: {}]   ;;  %s6447_s9 = inlined_call_operand.vmem [shape: f32[2,1,32], index: 9, kind: input, shape index: {}]   ;;  %s6448_s12 = inlined_call_operand.vmem [shape: f32[2,64,32], index: 12, kind: input, shape index: {}]   ;;  %s6449_s11 = inlined_call_operand.vmem [shape: f32[2,1,64], index: 11, kind: input, shape index: {}]   ;;  %s6450_s13 = inlined_call_operand.vmem [shape: f32[2,1,32], index: 13, kind: input, shape index: {}]   ;;  %s6451_s14 = inlined_call_operand.vmem [shape: f32[2,1,32], index: 14, kind: input, shape index: {}]   ;;  %s6452_s15 = inlined_call_operand.vmem [shape: f32[2,1,32], index: 15, kind: input, shape index: {}]   ;;  %s6453_s16 = inlined_call_operand.vmem [shape: f32[32,32], index: 16, kind: input, shape index: {}]   ;;  %s6454_s20 = inlined_call_operand.vmem [shape: f32[32,96], index: 20, kind: input, shape index: {}]   ;;  %s6455_s18 = inlined_call_operand.vmem [shape: f32[32,96], index: 18, kind: input, shape index: {}]   ;;  %s6456_s21 = inlined_call_operand.vmem [shape: f32[1,96], index: 21, kind: input, shape index: {}]   ;;  %s6457_s17 = inlined_call_operand.vmem [shape: f32[1,32], index: 17, kind: input, shape index: {}]   ;;  %s6458_s19 = inlined_call_operand.vmem [shape: f32[1,96], index: 19, kind: input, shape index: {}]   ;;  %s6459_s22 = inlined_call_operand.vmem [shape: f32[32,32], index: 22, kind: input, shape index: {}]   ;;  %s6460_s23 = inlined_call_operand.vmem [shape: f32[1,32], index: 23, kind: input, shape index: {}]   ;;  %s6461_s24 = inlined_call_operand.vmem [shape: f32[1,32], index: 24, kind: input, shape index: {}]   ;;  %s6462_s25 = inlined_call_operand.vmem [shape: f32[32,2], index: 25, kind: input, shape index: {}]   ;;  %s6463_s26 = inlined_call_operand.vmem [shape: f32[1,2], index: 26, kind: input, shape index: {}]   ;;  %s6464_s27 = inlined_call_operand.vmem [shape: f32[1,2], index: 27, kind: output, shape index: {}]  }
   0x1   :  { %6487 = sst [smem:[#allocation2_spill]] %s6437_s0  ;;  %vm5485_vm2 = vmpackc.low %vm346_vm1, %vm346_vm1  ;;  %s6477_s0 = smov 112   ;;  %vm5204_vm5 = vmmov 0   ;;  %vm3238_vm6 = vcmask 1040384   ;;  %vm3240_vm7 = vcmask 1041408   ;;  %vm3242_vm8 = vcmask 1042432  }
   0x2   :  { %6488 = sst [smem:[#allocation3_spill]] %s6438_s4  ;;  %vm3244_vm9 = vcmask 1043456   ;;  %vm3246_vm10 = vcmask 1044480   ;;  %vm3733_vm11 = vcmask 254976   ;;  %vm3757_vm12 = vcmask 517376  }
   0x3   :  { %6489 = sst [smem:[#allocation4_spill]] %s6439_s2  ;;  %s6518_s2 = smov 112   ;;  %vm3845_vm13 = vcmask 8192  }
   0x4   :  { %6490 = sst [smem:[#allocation5_spill]] %s6440_s3  ;;  %s6503_s29 = sld [smem:[#allocation4_spill]] }
   0x5   :  { %6491 = sst [smem:[#allocation6_spill]] %s6441_s5 }
   0x6   :  { %6492 = sst [smem:[#allocation7_spill]] %s6442_s1  ;;  %s6505_s5 = sld [smem:[#allocation6_spill]] }
   0x7   :  { %6493 = sst [smem:[#allocation8_spill]] %s6443_s6  ;;  %s6508_s1 = sld [smem:[#allocation7_spill]] }
   0x8   :  { %6494 = sst [smem:[#allocation9_spill]] %s6444_s7  ;;  %s6502_s7 = sld [smem:[#allocation3_spill]] }
   0x9   :  { %6495 = sst [smem:[#allocation10_spill]] %s6445_s10  ;;  %s6509_s6 = sld [smem:[#allocation8_spill]] }
   0xa   :  { %6496 = sst [smem:[#allocation11_spill]] %s6446_s8  ;;  %s6501_s10 = sld [smem:[#allocation2_spill]] }
   0xb   :  { %6497 = sst [smem:[#allocation12_spill]] %s6447_s9  ;;  %s6483_s8 = smov 64  }
   0xc   :  { %6498 = sst [smem:[#allocation13_spill]] %s6448_s12  ;;  %s6475_s9 = smov 48  }
   0xd   :  { %6499 = sst [smem:[#allocation14_spill]] %s6463_s26  ;;  %s6504_s12 = sld [smem:[#allocation5_spill]] }
   0xe   :  { %6500 = sst [smem:[#allocation15_spill]] %s6464_s27  ;;  %v204_v42 = vld [vmem:[%s6502_s7] sm:$0xff]  ;;  %v205_v43 = vld [vmem:[%s6502_s7 + $0x8] sm:$0xff]  ;;  %v206_v45 = vld [vmem:[%s6502_s7 + $0x10] sm:$0xff]  ;;  %s6510_s3 = sld [smem:[#allocation9_spill]] }
   0xf   :  { %v4626_v44 = vpack.c.bf16 %v205_v43, %v204_v42  ;;  %v207_v46 = vld [vmem:[%s6502_s7 + $0x18] sm:$0xff]  ;;  %s6511_s4 = sld [smem:[#allocation10_spill]]  ;;  %s6513_s30 = sld [smem:[#allocation12_spill]] }
  0x10   :  { %v86_v0 = vld [vmem:[%s6501_s10] sm:$0xff]  ;;  %v88_v1 = vld [vmem:[%s6501_s10 + $0x10] sm:$0xff]  ;;  %v87_v2 = vld [vmem:[%s6501_s10 + $0x8] sm:$0xff]  ;;  %v4630_v47 = vpack.c.bf16 %v207_v46, %v206_v45 }
  0x11   :  { %v95_v3 = vsel %vm94_vm0, %v86_v0, 0.0  ;;  %v101_v4 = vsel %vm94_vm0, %v88_v1, 0.0  ;;  %v89_v5 = vld [vmem:[%s6501_s10 + $0x18] sm:$0xff]  ;;  %v98_v6 = vsel %vm94_vm0, %v87_v2, 0.0  ;;  %v90_v8 = vld [vmem:[%s6501_s10 + $0x20] sm:$0xff]  ;;  %v91_v9 = vld [vmem:[%s6501_s10 + $0x28] sm:$0xff]  ;;  %4627 = vmatprep.subr.bf16.mxu0 %v4626_v44 }
  0x12   :  { %96 = vadd.xlane.f32.xlu0 %v95_v3  ;;  %102 = vadd.xlane.f32.xlu1 %v101_v4  ;;  %v104_v7 = vsel %vm94_vm0, %v89_v5, 0.0  ;;  %v107_v10 = vsel %vm94_vm0, %v90_v8, 0.0  ;;  %v110_v11 = vsel %vm94_vm0, %v91_v9, 0.0  ;;  %v3851_v3 = vld [vmem:[%s6503_s29] ss:$0 sm:$0xff]  ;;  %s6485_s10 = smov 96  }
  0x13   :  { %4629 = vmatpush3.bf16.msra.mxu0 %v4626_v44  ;;  %s6479_s29 = smov 16  }
  0x14   :  { %4631 = vmatprep.subr.bf16.mxu0 %v4630_v47 }
  0x16   :  { %99 = vadd.xlane.f32.xlu0 %v98_v6  ;;  %105 = vadd.xlane.f32.xlu1 %v104_v7 }
  0x17   :  { %4633 = vmatpush3.bf16.msra.mxu0 %v4630_v47 }
  0x1a   :  { %108 = vadd.xlane.f32.xlu0 %v107_v10  ;;  %111 = vadd.xlane.f32.xlu1 %v110_v11 }
  0x9f   :  { %v97_v12 = vpop.xlane.xlu0 %96  ;;  %v103_v13 = vpop.xlane.xlu1 %102 }
  0xa0   :  { %v114_v14 = vmul.f32 0.03125, %v97_v12  ;;  %v116_v15 = vmul.f32 0.03125, %v103_v13 }
  0xa2   :  { %v5370_v16 = vsub.f32 %v86_v0, %v114_v14  ;;  %v5372_v17 = vsub.f32 %v88_v1, %v116_v15 }
  0xa3   :  { %v100_v18 = vpop.xlane.xlu0 %99  ;;  %v106_v19 = vpop.xlane.xlu1 %105 }
  0xa4   :  { %v115_v20 = vmul.f32 0.03125, %v100_v18  ;;  %v117_v21 = vmul.f32 0.03125, %v106_v19  ;;  %v126_v22 = vmul.f32 %v5370_v16, %v5370_v16  ;;  %v128_v23 = vmul.f32 %v5372_v17, %v5372_v17 }
  0xa6   :  { %v5378_v24 = vsub.f32 %v87_v2, %v115_v20  ;;  %v5380_v25 = vsub.f32 %v89_v5, %v117_v21  ;;  %v132_v26 = vsel %vm94_vm0, %v126_v22, 0.0  ;;  %v138_v29 = vsel %vm94_vm0, %v128_v23, 0.0  ;;  %v3852_v5 = vld [vmem:[%s6504_s12] ss:$0 sm:$0xff] }
  0xa7   :  { %133 = vadd.xlane.f32.xlu0 %v132_v26  ;;  %v109_v27 = vpop.xlane.xlu0 %108  ;;  %v112_v28 = vpop.xlane.xlu1 %111 }
  0xa8   :  { %v118_v30 = vmul.f32 0.03125, %v109_v27  ;;  %v119_v31 = vmul.f32 0.03125, %v112_v28  ;;  %v127_v32 = vmul.f32 %v5378_v24, %v5378_v24  ;;  %v129_v33 = vmul.f32 %v5380_v25, %v5380_v25  ;;  %v3853_v28 = vld [vmem:[%s6505_s5] ss:$0 sm:$0xff] }
  0xaa   :  { %v5388_v34 = vsub.f32 %v90_v8, %v118_v30  ;;  %v5390_v35 = vsub.f32 %v91_v9, %v119_v31  ;;  %v135_v36 = vsel %vm94_vm0, %v127_v32, 0.0  ;;  %v141_v37 = vsel %vm94_vm0, %v129_v33, 0.0 }
  0xab   :  { %139 = vadd.xlane.f32.xlu0 %v138_v29  ;;  %136 = vadd.xlane.f32.xlu1 %v135_v36 }
  0xac   :  { %v130_v38 = vmul.f32 %v5388_v34, %v5388_v34  ;;  %v131_v39 = vmul.f32 %v5390_v35, %v5390_v35 }
  0xae   :  { %v144_v40 = vsel %vm94_vm0, %v130_v38, 0.0  ;;  %v147_v41 = vsel %vm94_vm0, %v131_v39, 0.0 }
  0xaf   :  { %142 = vadd.xlane.f32.xlu1 %v141_v37  ;;  %145 = vadd.xlane.f32.xlu0 %v144_v40 }
  0xb3   :  { %148 = vadd.xlane.f32.xlu1 %v147_v41 }
 0x134   :  { %v134_v48 = vpop.xlane.xlu0 %133 }
 0x135   :  { %v150_v49 = vmul.f32 0.03125, %v134_v48 }
 0x137   :  { %v156_v50 = vadd.f32 1e-12, %v150_v49 }
 0x138   :  { %v137_v51 = vpop.xlane.xlu1 %136  ;;  %v140_v52 = vpop.xlane.xlu0 %139 }
 0x139   :  { %4991 = vrsqrt.f32 %v156_v50  ;;  %v151_v53 = vmul.f32 0.03125, %v137_v51  ;;  %v152_v54 = vmul.f32 0.03125, %v140_v52 }
 0x13b   :  { %v157_v55 = vadd.f32 1e-12, %v151_v53  ;;  %v158_v56 = vadd.f32 1e-12, %v152_v54 }
 0x13c   :  { %v143_v57 = vpop.xlane.xlu1 %142  ;;  %v146_v58 = vpop.xlane.xlu0 %145 }
 0x13d   :  { %4993 = vrsqrt.f32 %v157_v55  ;;  %v153_v59 = vmul.f32 0.03125, %v143_v57  ;;  %v154_v60 = vmul.f32 0.03125, %v146_v58  ;;  %v5514_v58 = vld [vmem:[%s6508_s1 + $0x8] sm:$0xff] }
 0x13e   :  { %4995 = vrsqrt.f32 %v158_v56 }
 0x13f   :  { %v159_v61 = vadd.f32 1e-12, %v153_v59  ;;  %v160_v62 = vadd.f32 1e-12, %v154_v60 }
 0x140   :  { %v149_v63 = vpop.xlane.xlu1 %148 }
 0x141   :  { %4997 = vrsqrt.f32 %v159_v61  ;;  %v155_v0 = vmul.f32 0.03125, %v149_v63  ;;  %v5519_v61 = vld [vmem:[%s6508_s1] sm:$0xff] }
 0x142   :  { %4999 = vrsqrt.f32 %v160_v62 }
 0x143   :  { %v4992_v1 = vpop.eup %4991  ;;  %v161_v2 = vadd.f32 1e-12, %v155_v0 }
 0x144   :  { %v168_v4 = vmul.f32 %v4992_v1, %v5370_v16 }
 0x145   :  { %5001 = vrsqrt.f32 %v161_v2  ;;  %v5526_v2 = vld [vmem:[%s6508_s1 + $0x18] sm:$0xff] }
 0x146   :  { %v180_v6 = vmul.f32 %v3851_v3, %v168_v4 }
 0x147   :  { %v4994_v7 = vpop.eup %4993 }
 0x148   :  { %v4996_v8 = vpop.eup %4995  ;;  %v5419_v9 = vadd.f32 %v3852_v5, %v180_v6  ;;  %v169_v10 = vmul.f32 %v4994_v7, %v5378_v24 }
 0x149   :  { %v170_v11 = vmul.f32 %v4996_v8, %v5372_v17  ;;  %v5533_v8 = vld [vmem:[%s6508_s1 + $0x10] sm:$0xff] }
 0x14a   :  { %4248 = vmatprep.mubr.msk.f32.mxu0 %vm94_vm0, %v5419_v9  ;;  %v181_v12 = vmul.f32 %v3851_v3, %v169_v10 }
 0x14b   :  { %v4998_v13 = vpop.eup %4997  ;;  %v182_v14 = vmul.f32 %v3851_v3, %v170_v11 }
 0x14c   :  { %v5000_v15 = vpop.eup %4999  ;;  %v5425_v16 = vadd.f32 %v3852_v5, %v181_v12  ;;  %v171_v18 = vmul.f32 %v4998_v13, %v5380_v25 }
 0x14d   :  { %v5428_v19 = vadd.f32 %v3852_v5, %v182_v14  ;;  %v172_v20 = vmul.f32 %v5000_v15, %v5388_v34 }
 0x14e   :  { %4249 = vmatmul.mubr.msk.f32.vlgmr.msra.gmra.mrb[0].mxu0 %vm94_vm0, %v5425_v16  ;;  %v183_v21 = vmul.f32 %v3851_v3, %v171_v18  ;;  %v5541_v18 = vld [vmem:[%s6508_s1 + $0x20] sm:$0xff] }
 0x14f   :  { %v5002_v17 = vpop.eup %5001  ;;  %4251 = vmatprep.mubr.msk.f32.mxu0 %vm94_vm0, %v5428_v19  ;;  %v184_v22 = vmul.f32 %v3851_v3, %v172_v20 }
 0x150   :  { %v5435_v23 = vadd.f32 %v3852_v5, %v183_v21  ;;  %v173_v24 = vmul.f32 %v5002_v17, %v5390_v35  ;;  %v5546_v21 = vld [vmem:[%s6508_s1 + $0x28] sm:$0xff] }
 0x151   :  { %v5438_v26 = vadd.f32 %v3852_v5, %v184_v22 }
 0x152   :  { %4252 = vmatmul.mubr.msk.f32.gmra.mrb[2].mxu0 %vm94_vm0, %v5435_v23  ;;  %v185_v25 = vmul.f32 %v3851_v3, %v173_v24 }
 0x153   :  { %4254 = vmatprep.mubr.msk.f32.mxu0 %vm94_vm0, %v5438_v26 }
 0x154   :  { %v5444_v27 = vadd.f32 %v3852_v5, %v185_v25 }
 0x156   :  { %4255 = vmatmul.mubr.msk.f32.gmra.mrb[4].mxu0 %vm94_vm0, %v5444_v27 }
 0x221   :  { %v4250_v29 = vpop.f32.mrb[0].mxu0 }
 0x222   :  { %v5451_v30 = vadd.f32 %v4250_v29, %v3853_v28  ;;  %v299_v31 = vpop.f32.mrb[1].mxu0 }
 0x223   :  { %v5453_v32 = vadd.f32 %v3853_v28, %v299_v31 }
 0x225   :  { %v4253_v33 = vpop.f32.mrb[2].mxu0  ;;  %4269 = vmatprep.mubr.msk.f32.mxu1 %vm346_vm1, %v5453_v32  ;;  %v5459_v34 = vpack.i.bf16 %v5451_v30, %v5453_v32 }
 0x226   :  { %v5461_v35 = vadd.f32 %v4253_v33, %v3853_v28  ;;  %v309_v36 = vpop.f32.mrb[3].mxu0 }
 0x227   :  { %v5463_v37 = vadd.f32 %v3853_v28, %v309_v36  ;;  %4872 = vrot.lane.b32.xlu0 %v5459_v34, %s6485_s10 }
 0x229   :  { %v4256_v38 = vpop.f32.mrb[4].mxu0  ;;  %v5469_v39 = vpack.i.bf16 %v5461_v35, %v5463_v37 }
 0x22a   :  { %v5471_v40 = vadd.f32 %v4256_v38, %v3853_v28  ;;  %v319_v41 = vpop.f32.mrb[5].mxu0 }
 0x22b   :  { %v5473_v42 = vadd.f32 %v3853_v28, %v319_v41  ;;  %4877 = vrot.lane.b32.xlu1 %v5469_v39, %s6485_s10 }
 0x22d   :  { %v5479_v43 = vpack.i.bf16 %v5471_v40, %v5473_v42 }
 0x22f   :  { %4882 = vrot.lane.b32.xlu1 %v5479_v43, %s6485_s10  ;;  %s6516_s10 = smov 64  }
 0x299   :  { %v4873_v44 = vpop.permute.xlu0 %4872 }
 0x29a   :  { %v4875_v45 = vunpack.i.h.bf16 %v4873_v44  ;;  %v4874_v46 = vunpack.i.l.bf16 %v4873_v44 }
 0x29c   :  { %v4634_v48 = vpack.c.bf16 %v4875_v45, %v4874_v46 }
 0x29d   :  { %v4878_v49 = vpop.permute.xlu1 %4877 }
 0x29e   :  { %v4880_v50 = vunpack.i.h.bf16 %v4878_v49  ;;  %v4879_v51 = vunpack.i.l.bf16 %v4878_v49  ;;  %4636 = vmatprep.subr.msk.bf16.mxu1 %vm5485_vm2, %v4634_v48 }
 0x29f   :  { %4639 = vmatpush3.bf16.xpose.msk.msra.mxu1 %vm5485_vm2, %v4634_v48 }
 0x2a0   :  { %v4640_v52 = vpack.c.bf16 %v4880_v50, %v4879_v51 }
 0x2a1   :  { %v4883_v53 = vpop.permute.xlu1 %4882 }
 0x2a2   :  { %v4885_v54 = vunpack.i.h.bf16 %v4883_v53  ;;  %v4884_v55 = vunpack.i.l.bf16 %v4883_v53  ;;  %4642 = vmatprep.subr.msk.bf16.mxu1 %vm5485_vm2, %v4640_v52 }
 0x2a4   :  { %v4646_v56 = vpack.c.bf16 %v4885_v54, %v4884_v55 }
 0x2a7   :  { %4645 = vmatpush3.bf16.xpose.msk.msra.mxu1 %vm5485_vm2, %v4640_v52 }
 0x2a8   :  { %4648 = vmatprep.subr.msk.bf16.mxu1 %vm5485_vm2, %v4646_v56 }
 0x2af   :  { %4651 = vmatpush3.bf16.xpose.msk.msra.mxu1 %vm5485_vm2, %v4646_v56 }
 0x2b6   :  { %4270 = vmatmul.mubr.msk.f32.vlgmr.msra.gmra.mrb[0].mxu1 %vm346_vm1, %v5451_v30 }
 0x2b7   :  { %4272 = vmatprep.mubr.msk.f32.mxu1 %vm346_vm1, %v5463_v37 }
 0x2ba   :  { %4273 = vmatmul.mubr.msk.f32.gmra.mrb[2].mxu1 %vm346_vm1, %v5461_v35 }
 0x2bb   :  { %4275 = vmatprep.mubr.msk.f32.mxu1 %vm346_vm1, %v5473_v42 }
 0x2be   :  { %4276 = vmatmul.mubr.msk.f32.gmra.mrb[4].mxu1 %vm346_vm1, %v5471_v40 }
 0x389   :  { %v4271_v57 = vpop.f32.mrb[0].mxu1 }
 0x38a   :  { %v467_v59 = vmul.f32 0.25, %v4271_v57  ;;  %v437_v60 = vpop.f32.mrb[1].mxu1 }
 0x38b   :  { %v466_v62 = vmul.f32 0.25, %v437_v60 }
 0x38c   :  { %v473_v63 = vadd.f32 %v467_v59, %v5514_v58 }
 0x38d   :  { %v4274_v0 = vpop.f32.mrb[2].mxu1  ;;  %v472_v1 = vadd.f32 %v466_v62, %v5519_v61 }
 0x38e   :  { %v469_v3 = vmul.f32 0.25, %v4274_v0  ;;  %v447_v4 = vpop.f32.mrb[3].mxu1  ;;  %v482_v5 = vsel %vm478_vm3, %v473_v63, -inf }
 0x38f   :  { %v468_v6 = vmul.f32 0.25, %v447_v4  ;;  %483 = vmax.xlane.f32.xlu0 %v482_v5  ;;  %v479_v7 = vsel %vm478_vm3, %v472_v1, -inf }
 0x390   :  { %480 = vmax.xlane.f32.xlu1 %v479_v7  ;;  %v475_v10 = vadd.f32 %v469_v3, %v5526_v2 }
 0x391   :  { %v4277_v11 = vpop.f32.mrb[4].mxu1  ;;  %v474_v15 = vadd.f32 %v468_v6, %v5533_v8 }
 0x392   :  { %v471_v12 = vmul.f32 0.25, %v4277_v11  ;;  %v457_v13 = vpop.f32.mrb[5].mxu1  ;;  %v488_v14 = vsel %vm478_vm3, %v475_v10, -inf }
 0x393   :  { %v470_v20 = vmul.f32 0.25, %v457_v13  ;;  %489 = vmax.xlane.f32.xlu0 %v488_v14  ;;  %v485_v22 = vsel %vm478_vm3, %v474_v15, -inf }
 0x394   :  { %v477_v24 = vadd.f32 %v471_v12, %v5546_v21 }
 0x395   :  { %v476_v17 = vadd.f32 %v470_v20, %v5541_v18 }
 0x396   :  { %v494_v28 = vsel %vm478_vm3, %v477_v24, -inf }
 0x397   :  { %486 = vmax.xlane.f32.xlu0 %v485_v22  ;;  %v491_v25 = vsel %vm478_vm3, %v476_v17, -inf }
 0x398   :  { %492 = vmax.xlane.f32.xlu1 %v491_v25 }
 0x39b   :  { %495 = vmax.xlane.f32.xlu0 %v494_v28 }
 0x3a9   :  { %4887 = vrot.lane.b32.xlu1 %v5459_v34, %s6483_s8 }
 0x3ad   :  { %4897 = vrot.lane.b32.xlu1 %v5479_v43, %s6483_s8 }
 0x3b1   :  { %4892 = vrot.lane.b32.xlu0 %v5469_v39, %s6483_s8  ;;  %s6514_s8 = sld [smem:[#allocation13_spill]] }
 0x41c   :  { %v484_v29 = vpop.xlane.xlu0 %483 }
 0x41d   :  { %v498_v31 = vsub.f32 %v473_v63, %v484_v29  ;;  %v481_v33 = vpop.xlane.xlu1 %480 }
 0x41e   :  { %v497_v36 = vsub.f32 %v472_v1, %v481_v33 }
 0x41f   :  { %v505_v38 = vmul.f32 1.442695, %v498_v31 }
 0x420   :  { %v503_v41 = vmul.f32 1.442695, %v497_v36  ;;  %v490_v44 = vpop.xlane.xlu0 %489 }
 0x421   :  { %5003 = vpow2.f32 %v505_v38  ;;  %v500_v45 = vsub.f32 %v475_v10, %v490_v44 }
 0x422   :  { %5005 = vpow2.f32 %v503_v41 }
 0x423   :  { %v509_v46 = vmul.f32 1.442695, %v500_v45 }
 0x424   :  { %v487_v48 = vpop.xlane.xlu0 %486 }
 0x425   :  { %5007 = vpow2.f32 %v509_v46  ;;  %v499_v49 = vsub.f32 %v474_v15, %v487_v48  ;;  %v493_v50 = vpop.xlane.xlu1 %492 }
 0x426   :  { %v501_v52 = vsub.f32 %v476_v17, %v493_v50 }
 0x427   :  { %v507_v51 = vmul.f32 1.442695, %v499_v49 }
 0x428   :  { %v496_v53 = vpop.xlane.xlu0 %495  ;;  %v511_v60 = vmul.f32 1.442695, %v501_v52 }
 0x429   :  { %5009 = vpow2.f32 %v507_v51  ;;  %v502_v54 = vsub.f32 %v477_v24, %v496_v53  ;;  %v4888_v55 = vpop.permute.xlu1 %4887 }
 0x42a   :  { %v4890_v56 = vunpack.i.h.bf16 %v4888_v55  ;;  %v4889_v57 = vunpack.i.l.bf16 %v4888_v55 }
 0x42b   :  { %v5004_v59 = vpop.eup %5003  ;;  %v513_v62 = vmul.f32 1.442695, %v502_v54 }
 0x42c   :  { %v5006_v63 = vpop.eup %5005  ;;  %v4893_v0 = vpop.permute.xlu0 %4892  ;;  %v518_v1 = vsel %vm478_vm3, %v5004_v59, 0.0  ;;  %v4652_v3 = vpack.c.bf16 %v4890_v56, %v4889_v57 }
 0x42d   :  { %5011 = vpow2.f32 %v513_v62  ;;  %v4895_v4 = vunpack.i.h.bf16 %v4893_v0  ;;  %v4894_v5 = vunpack.i.l.bf16 %v4893_v0  ;;  %519 = vadd.xlane.f32.xlu0 %v518_v1  ;;  %v4898_v6 = vpop.permute.xlu1 %4897  ;;  %v515_v7 = vsel %vm478_vm3, %v5006_v63, 0.0 }
 0x42e   :  { %v4900_v10 = vunpack.i.h.bf16 %v4898_v6  ;;  %v4899_v11 = vunpack.i.l.bf16 %v4898_v6  ;;  %516 = vadd.xlane.f32.xlu1 %v515_v7  ;;  %4653 = vmatprep.subr.bf16.mxu0 %v4652_v3  ;;  %5013 = vpow2.f32 %v511_v60 }
 0x42f   :  { %v5008_v12 = vpop.eup %5007  ;;  %4655 = vmatpush3.bf16.msra.mxu0 %v4652_v3  ;;  %v4656_v13 = vpack.c.bf16 %v4895_v4, %v4894_v5 }
 0x430   :  { %v524_v14 = vsel %vm478_vm3, %v5008_v12, 0.0  ;;  %v4660_v15 = vpack.c.bf16 %v4900_v10, %v4899_v11 }
 0x431   :  { %525 = vadd.xlane.f32.xlu0 %v524_v14  ;;  %4657 = vmatprep.subr.bf16.mxu0 %v4656_v13 }
 0x433   :  { %v5010_v20 = vpop.eup %5009  ;;  %4659 = vmatpush3.bf16.msra.mxu0 %v4656_v13 }
 0x434   :  { %4661 = vmatprep.subr.bf16.mxu0 %v4660_v15  ;;  %v521_v17 = vsel %vm478_vm3, %v5010_v20, 0.0 }
 0x435   :  { %522 = vadd.xlane.f32.xlu1 %v521_v17 }
 0x437   :  { %v5012_v22 = vpop.eup %5011  ;;  %4663 = vmatpush3.bf16.msra.mxu0 %v4660_v15 }
 0x438   :  { %v530_v24 = vsel %vm478_vm3, %v5012_v22, 0.0  ;;  %v5014_v25 = vpop.eup %5013 }
 0x439   :  { %531 = vadd.xlane.f32.xlu0 %v530_v24  ;;  %v527_v28 = vsel %vm478_vm3, %v5014_v25, 0.0 }
 0x43d   :  { %528 = vadd.xlane.f32.xlu0 %v527_v28 }
 0x446   :  { %4907 = vrot.lane.b32.xlu1 %v5469_v39, %s6481_s28 }
 0x44a   :  { %4912 = vrot.lane.b32.xlu1 %v5479_v43, %s6481_s28 }
 0x44e   :  { %676 = vrot.lane.b32.xlu1 %v5453_v32, %s6477_s0 }
 0x452   :  { %678 = vrot.lane.b32.xlu1 %v5451_v30, %s6477_s0 }
 0x453   :  { %4902 = vrot.lane.b32.xlu0 %v5459_v34, %s6481_s28 }
 0x456   :  { %680 = vrot.lane.b32.xlu1 %v5463_v37, %s6477_s0 }
 0x457   :  { %682 = vrot.lane.b32.xlu0 %v5461_v35, %s6477_s0 }
 0x45a   :  { %684 = vrot.lane.b32.xlu1 %v5473_v42, %s6477_s0 }
 0x45b   :  { %686 = vrot.lane.b32.xlu0 %v5471_v40, %s6477_s0 }
 0x4ba   :  { %v520_v29 = vpop.xlane.xlu0 %519 }
 0x4bb   :  { %5015 = vrcp.f32 %v520_v29  ;;  %v517_v32 = vpop.xlane.xlu1 %516 }
 0x4bc   :  { %5017 = vrcp.f32 %v517_v32 }
 0x4be   :  { %v526_v30 = vpop.xlane.xlu0 %525 }
 0x4bf   :  { %5019 = vrcp.f32 %v526_v30 }
 0x4c2   :  { %v523_v31 = vpop.xlane.xlu1 %522 }
 0x4c3   :  { %5021 = vrcp.f32 %v523_v31 }
 0x4c5   :  { %v5016_v33 = vpop.eup %5015 }
 0x4c6   :  { %v5018_v36 = vpop.eup %5017  ;;  %v532_v37 = vpop.xlane.xlu0 %531  ;;  %v536_v41 = vmul.f32 %v5016_v33, %v5004_v59 }
 0x4c7   :  { %v534_v38 = vmul.f32 %v5018_v36, %v5006_v63  ;;  %5023 = vrcp.f32 %v532_v37  ;;  %v4908_v40 = vpop.permute.xlu1 %4907 }
 0x4c8   :  { %v4910_v45 = vunpack.i.h.bf16 %v4908_v40  ;;  %v4909_v49 = vunpack.i.l.bf16 %v4908_v40 }
 0x4c9   :  { %4290 = vmatprep.mubr.msk.f32.mxu0 %vm478_vm3, %v534_v38  ;;  %v5020_v42 = vpop.eup %5019 }
 0x4ca   :  { %v529_v35 = vpop.xlane.xlu0 %528  ;;  %4291 = vmatmul.mubr.msk.f32.vlgmr.msra.gmra.mrb[6].mxu0 %vm478_vm3, %v536_v41  ;;  %v540_v52 = vmul.f32 %v5020_v42, %v5008_v12  ;;  %v4670_v54 = vpack.c.bf16 %v4910_v45, %v4909_v49 }
 0x4cb   :  { %5025 = vrcp.f32 %v529_v35  ;;  %v4913_v55 = vpop.permute.xlu1 %4912 }
 0x4cc   :  { %v4915_v60 = vunpack.i.h.bf16 %v4913_v55  ;;  %v4914_v62 = vunpack.i.l.bf16 %v4913_v55 }
 0x4cd   :  { %v5022_v44 = vpop.eup %5021 }
 0x4ce   :  { %v4903_v46 = vpop.permute.xlu0 %4902  ;;  %v538_v48 = vmul.f32 %v5022_v44, %v5010_v20  ;;  %v4676_v1 = vpack.c.bf16 %v4915_v60, %v4914_v62 }
 0x4cf   :  { %v4905_v50 = vunpack.i.h.bf16 %v4903_v46  ;;  %v4904_v51 = vunpack.i.l.bf16 %v4903_v46  ;;  %v677_v0 = vpop.permute.xlu1 %676 }
 0x4d0   :  { %4293 = vmatprep.mubr.msk.f32.mxu0 %vm478_vm3, %v538_v48 }
 0x4d1   :  { %v4664_v53 = vpack.c.bf16 %v4905_v50, %v4904_v51  ;;  %4294 = vmatmul.mubr.msk.f32.gmra.mrb[8].mxu0 %vm478_vm3, %v540_v52  ;;  %v5024_v56 = vpop.eup %5023 }
 0x4d2   :  { %v544_v63 = vmul.f32 %v5024_v56, %v5012_v22  ;;  %v683_v5 = vpop.permute.xlu0 %682 }
 0x4d3   :  { %4666 = vmatprep.subr.msk.bf16.mxu0 %vm5485_vm2, %v4664_v53  ;;  %v679_v3 = vpop.permute.xlu1 %678 }
 0x4d4   :  { %4669 = vmatpush3.bf16.xpose.msk.msra.mxu0 %vm5485_vm2, %v4664_v53 }
 0x4d5   :  { %v5026_v57 = vpop.eup %5025  ;;  %4672 = vmatprep.subr.msk.bf16.mxu0 %vm5485_vm2, %v4670_v54 }
 0x4d6   :  { %v542_v59 = vmul.f32 %v5026_v57, %v5014_v25  ;;  %v687_v7 = vpop.permute.xlu0 %686 }
 0x4d7   :  { %v681_v4 = vpop.permute.xlu1 %680 }
 0x4d8   :  { %4296 = vmatprep.mubr.msk.f32.mxu0 %vm478_vm3, %v542_v59 }
 0x4d9   :  { %4297 = vmatmul.mubr.msk.f32.gmra.mrb[10].mxu0 %vm478_vm3, %v544_v63 }
 0x4da   :  { %4311 = vmatprep.mubr.msk.f32.mxu0 %vm346_vm1, %v677_v0 }
 0x4db   :  { %v685_v6 = vpop.permute.xlu1 %684 }
 0x4dc   :  { %4675 = vmatpush3.bf16.xpose.msk.msra.mxu0 %vm5485_vm2, %v4670_v54 }
 0x4dd   :  { %4678 = vmatprep.subr.msk.bf16.mxu0 %vm5485_vm2, %v4676_v1 }
 0x4e4   :  { %4681 = vmatpush3.bf16.xpose.msk.msra.mxu0 %vm5485_vm2, %v4676_v1 }
 0x4eb   :  { %4312 = vmatmul.mubr.msk.f32.vlgmr.msra.gmra.mrb[12].mxu0 %vm346_vm1, %v679_v3 }
 0x4ec   :  { %4314 = vmatprep.mubr.msk.f32.mxu0 %vm346_vm1, %v681_v4 }
 0x4ef   :  { %4315 = vmatmul.mubr.msk.f32.gmra.mrb[14].mxu0 %vm346_vm1, %v683_v5 }
 0x4f0   :  { %4317 = vmatprep.mubr.msk.f32.mxu0 %vm346_vm1, %v685_v6 }
 0x4f3   :  { %4318 = vmatmul.mubr.msk.f32.gmra.mrb[16].mxu0 %vm346_vm1, %v687_v7 }
 0x59d   :  { %v5607_v10 = vpop.f32.mrb[6].mxu0 }
 0x59e   :  { %v5609_v11 = vpop.f32.mrb[7].mxu0 }
 0x5a4   :  { %v5611_v12 = vpop.f32.mrb[8].mxu0 }
 0x5a5   :  { %v5613_v13 = vpop.f32.mrb[9].mxu0 }
 0x5ac   :  { %v5615_v14 = vpop.f32.mrb[10].mxu0 }
 0x5ad   :  { %v5617_v15 = vpop.f32.mrb[11].mxu0 }
 0x5be   :  { %v4313_v20 = vpop.f32.mrb[12].mxu0 }
 0x5bf   :  { %v820_v17 = vmul.f32 0.25, %v4313_v20  ;;  %v790_v22 = vpop.f32.mrb[13].mxu0 }
 0x5c0   :  { %v819_v24 = vmul.f32 0.25, %v790_v22 }
 0x5c1   :  { %v826_v25 = vadd.f32 %v820_v17, %v5514_v58 }
 0x5c2   :  { %v4316_v28 = vpop.f32.mrb[14].mxu0  ;;  %v825_v29 = vadd.f32 %v819_v24, %v5519_v61 }
 0x5c3   :  { %v800_v32 = vpop.f32.mrb[15].mxu0  ;;  %v834_v30 = vsel %vm478_vm3, %v826_v25, -inf  ;;  %v822_v31 = vmul.f32 0.25, %v4316_v28 }
 0x5c4   :  { %v821_v33 = vmul.f32 0.25, %v800_v32  ;;  %835 = vmax.xlane.f32.xlu0 %v834_v30  ;;  %v831_v36 = vsel %vm478_vm3, %v825_v29, -inf }
 0x5c5   :  { %832 = vmax.xlane.f32.xlu1 %v831_v36  ;;  %v828_v42 = vadd.f32 %v822_v31, %v5526_v2 }
 0x5c6   :  { %v4319_v37 = vpop.f32.mrb[16].mxu0  ;;  %v827_v38 = vadd.f32 %v821_v33, %v5533_v8 }
 0x5c7   :  { %v810_v41 = vpop.f32.mrb[17].mxu0  ;;  %v824_v35 = vmul.f32 0.25, %v4319_v37  ;;  %v840_v44 = vsel %vm478_vm3, %v828_v42, -inf }
 0x5c8   :  { %v823_v40 = vmul.f32 0.25, %v810_v41  ;;  %v837_v58 = vsel %vm478_vm3, %v827_v38, -inf }
 0x5c9   :  { %838 = vmax.xlane.f32.xlu0 %v837_v58  ;;  %v830_v46 = vadd.f32 %v824_v35, %v5546_v21 }
 0x5ca   :  { %v829_v61 = vadd.f32 %v823_v40, %v5541_v18 }
 0x5cb   :  { %v846_v8 = vsel %vm478_vm3, %v830_v46, -inf }
 0x5cc   :  { %v843_v45 = vsel %vm478_vm3, %v829_v61, -inf }
 0x5cd   :  { %841 = vmax.xlane.f32.xlu0 %v840_v44  ;;  %844 = vmax.xlane.f32.xlu1 %v843_v45 }
 0x5d1   :  { %847 = vmax.xlane.f32.xlu0 %v846_v8 }
 0x5de   :  { %4917 = vrot.lane.b32.xlu1 %v5459_v34, %s6475_s9 }
 0x651   :  { %v836_v48 = vpop.xlane.xlu0 %835 }
 0x652   :  { %v850_v2 = vsub.f32 %v826_v25, %v836_v48  ;;  %v833_v49 = vpop.xlane.xlu1 %832 }
 0x653   :  { %v849_v50 = vsub.f32 %v825_v29, %v833_v49 }
 0x654   :  { %v857_v18 = vmul.f32 1.442695, %v850_v2 }
 0x655   :  { %v855_v51 = vmul.f32 1.442695, %v849_v50 }
 0x656   :  { %5027 = vpow2.f32 %v857_v18  ;;  %v839_v52 = vpop.xlane.xlu0 %838 }
 0x657   :  { %5029 = vpow2.f32 %v855_v51  ;;  %v851_v53 = vsub.f32 %v827_v38, %v839_v52 }
 0x659   :  { %v859_v21 = vmul.f32 1.442695, %v851_v53 }
 0x65a   :  { %v842_v54 = vpop.xlane.xlu0 %841  ;;  %v845_v55 = vpop.xlane.xlu1 %844 }
 0x65b   :  { %5031 = vpow2.f32 %v859_v21  ;;  %v852_v56 = vsub.f32 %v828_v42, %v842_v54  ;;  %v853_v59 = vsub.f32 %v829_v61, %v845_v55  ;;  %v1058_v54 = vld [vmem:[%s6509_s6] sm:$0xff]  ;;  %v1059_v55 = vld [vmem:[%s6509_s6 + $0x8] sm:$0xff] }
 0x65d   :  { %v861_v57 = vmul.f32 1.442695, %v852_v56  ;;  %v863_v4 = vmul.f32 1.442695, %v853_v59  ;;  %v4694_v56 = vpack.c.bf16 %v1059_v55, %v1058_v54  ;;  %v1061_v59 = vld [vmem:[%s6509_s6 + $0x18] sm:$0xff] }
 0x65e   :  { %v848_v60 = vpop.xlane.xlu0 %847  ;;  %v4918_v62 = vpop.permute.xlu1 %4917 }
 0x65f   :  { %5033 = vpow2.f32 %v861_v57  ;;  %v854_v34 = vsub.f32 %v830_v46, %v848_v60  ;;  %v4920_v63 = vunpack.i.h.bf16 %v4918_v62  ;;  %v4919_v0 = vunpack.i.l.bf16 %v4918_v62  ;;  %v1060_v57 = vld [vmem:[%s6509_s6 + $0x10] sm:$0xff] }
 0x660   :  { %v5028_v1 = vpop.eup %5027  ;;  %v4698_v60 = vpack.c.bf16 %v1061_v59, %v1060_v57 }
 0x661   :  { %v5030_v3 = vpop.eup %5029  ;;  %v865_v5 = vmul.f32 1.442695, %v854_v34  ;;  %v870_v6 = vsel %vm478_vm3, %v5028_v1, 0.0  ;;  %v4682_v7 = vpack.c.bf16 %v4920_v63, %v4919_v0 }
 0x662   :  { %871 = vadd.xlane.f32.xlu0 %v870_v6  ;;  %v867_v20 = vsel %vm478_vm3, %v5030_v3, 0.0 }
 0x663   :  { %5035 = vpow2.f32 %v865_v5  ;;  %868 = vadd.xlane.f32.xlu1 %v867_v20  ;;  %4683 = vmatprep.subr.bf16.mxu1 %v4682_v7 }
 0x664   :  { %4685 = vmatpush3.bf16.msra.mxu1 %v4682_v7  ;;  %5037 = vpow2.f32 %v863_v4 }
 0x665   :  { %v5032_v17 = vpop.eup %5031 }
 0x666   :  { %v873_v22 = vsel %vm478_vm3, %v5032_v17, 0.0 }
 0x667   :  { %874 = vadd.xlane.f32.xlu1 %v873_v22 }
 0x669   :  { %v5034_v24 = vpop.eup %5033 }
 0x66a   :  { %v876_v25 = vsel %vm478_vm3, %v5034_v24, 0.0 }
 0x66b   :  { %877 = vadd.xlane.f32.xlu0 %v876_v25 }
 0x66d   :  { %v5036_v28 = vpop.eup %5035 }
 0x66e   :  { %v882_v29 = vsel %vm478_vm3, %v5036_v28, 0.0  ;;  %v5038_v32 = vpop.eup %5037 }
 0x66f   :  { %883 = vadd.xlane.f32.xlu0 %v882_v29  ;;  %v879_v30 = vsel %vm478_vm3, %v5038_v32, 0.0 }
 0x673   :  { %880 = vadd.xlane.f32.xlu0 %v879_v30 }
 0x678   :  { %4927 = vrot.lane.b32.xlu1 %v5479_v43, %s6475_s9 }
 0x689   :  { %4922 = vrot.lane.b32.xlu0 %v5469_v39, %s6475_s9  ;;  %s6515_s9 = smov 96  }
 0x6ef   :  { %v872_v33 = vpop.xlane.xlu0 %871 }
 0x6f0   :  { %v869_v31 = vpop.xlane.xlu1 %868 }
 0x6f1   :  { %5039 = vrcp.f32 %v869_v31 }
 0x6f2   :  { %5041 = vrcp.f32 %v872_v33 }
 0x6f4   :  { %v875_v38 = vpop.xlane.xlu1 %874 }
 0x6f5   :  { %5043 = vrcp.f32 %v875_v38 }
 0x6f8   :  { %v878_v36 = vpop.xlane.xlu0 %877  ;;  %v4928_v58 = vpop.permute.xlu1 %4927 }
 0x6f9   :  { %v4930_v61 = vunpack.i.h.bf16 %v4928_v58  ;;  %v4929_v43 = vunpack.i.l.bf16 %v4928_v58  ;;  %5045 = vrcp.f32 %v878_v36 }
 0x6fb   :  { %v5040_v37 = vpop.eup %5039  ;;  %v4690_v46 = vpack.c.bf16 %v4930_v61, %v4929_v43 }
 0x6fc   :  { %v884_v41 = vpop.xlane.xlu0 %883  ;;  %v886_v35 = vmul.f32 %v5040_v37, %v5030_v3  ;;  %v5042_v8 = vpop.eup %5041 }
 0x6fd   :  { %v888_v2 = vmul.f32 %v5042_v8, %v5028_v1 }
 0x6fe   :  { %4332 = vmatprep.mubr.msk.f32.mxu1 %vm478_vm3, %v886_v35 }
 0x6ff   :  { %v5044_v48 = vpop.eup %5043 }
 0x700   :  { %v881_v40 = vpop.xlane.xlu0 %880  ;;  %v890_v50 = vmul.f32 %v5044_v48, %v5032_v17 }
 0x701   :  { %5047 = vrcp.f32 %v881_v40 }
 0x702   :  { %5049 = vrcp.f32 %v884_v41 }
 0x703   :  { %v5046_v49 = vpop.eup %5045 }
 0x704   :  { %v4923_v42 = vpop.permute.xlu0 %4922  ;;  %v892_v51 = vmul.f32 %v5046_v49, %v5034_v24 }
 0x705   :  { %v4925_v44 = vunpack.i.h.bf16 %v4923_v42  ;;  %v4924_v45 = vunpack.i.l.bf16 %v4923_v42 }
 0x707   :  { %v4686_v39 = vpack.c.bf16 %v4925_v44, %v4924_v45 }
 0x709   :  { %4687 = vmatprep.subr.bf16.mxu1 %v4686_v39 }
 0x70a   :  { %4689 = vmatpush3.bf16.msra.mxu1 %v4686_v39 }
 0x70b   :  { %4691 = vmatprep.subr.bf16.mxu1 %v4690_v46  ;;  %v5048_v18 = vpop.eup %5047 }
 0x70c   :  { %v5050_v52 = vpop.eup %5049  ;;  %v894_v53 = vmul.f32 %v5048_v18, %v5038_v32 }
 0x70d   :  { %v896_v21 = vmul.f32 %v5050_v52, %v5036_v28 }
 0x70e   :  { %4693 = vmatpush3.bf16.msra.mxu1 %v4690_v46 }
 0x70f   :  { %4695 = vmatprep.subr.bf16.mxu1 %v4694_v56 }
 0x711   :  { %4333 = vmatmul.mubr.msk.f32.vlgmr.msra.gmra.mrb[6].mxu1 %vm478_vm3, %v888_v2 }
 0x712   :  { %4335 = vmatprep.mubr.msk.f32.mxu1 %vm478_vm3, %v890_v50  ;;  %4697 = vmatpush3.bf16.msra.mxu1 %v4694_v56 }
 0x713   :  { %4699 = vmatprep.subr.bf16.mxu1 %v4698_v60 }
 0x715   :  { %4336 = vmatmul.mubr.msk.f32.gmra.mrb[8].mxu1 %vm478_vm3, %v892_v51 }
 0x716   :  { %4338 = vmatprep.mubr.msk.f32.mxu1 %vm478_vm3, %v894_v53  ;;  %4701 = vmatpush3.bf16.msra.mxu1 %v4698_v60 }
 0x719   :  { %4339 = vmatmul.mubr.msk.f32.gmra.mrb[10].mxu1 %vm478_vm3, %v896_v21 }
 0x7e4   :  { %v4334_v62 = vpop.f32.mrb[6].mxu1 }
 0x7e5   :  { %v999_v34 = vpop.f32.mrb[7].mxu1 }
 0x7e6   :  { %1034 = vrot.lane.b32.xlu1 %v999_v34, %s6479_s29 }
 0x7e8   :  { %v4337_v63 = vpop.f32.mrb[8].mxu1 }
 0x7e9   :  { %v1009_v0 = vpop.f32.mrb[9].mxu1 }
 0x7ea   :  { %1036 = vrot.lane.b32.xlu1 %v4334_v62, %s6479_s29 }
 0x7ec   :  { %v4340_v1 = vpop.f32.mrb[10].mxu1 }
 0x7ed   :  { %v1019_v3 = vpop.f32.mrb[11].mxu1 }
 0x7ee   :  { %1038 = vrot.lane.b32.xlu1 %v1009_v0, %s6479_s29  ;;  %1042 = vrot.lane.b32.xlu0 %v1019_v3, %s6479_s29 }
 0x7f2   :  { %1040 = vrot.lane.b32.xlu1 %v4337_v63, %s6479_s29 }
 0x7f6   :  { %1044 = vrot.lane.b32.xlu1 %v4340_v1, %s6479_s29  ;;  %s6512_s29 = sld [smem:[#allocation11_spill]] }
 0x858   :  { %v1035_v4 = vpop.permute.xlu1 %1034 }
 0x859   :  { %v1052_v5 = vsel %vm346_vm1, %v5609_v11, %v1035_v4 }
 0x85a   :  { %4349 = vmatprep.mubr.msk.f32.mxu1 %vm94_vm0, %v1052_v5 }
 0x85c   :  { %v1037_v6 = vpop.permute.xlu1 %1036 }
 0x85d   :  { %v1053_v7 = vsel %vm346_vm1, %v5607_v10, %v1037_v6 }
 0x85e   :  { %4350 = vmatmul.mubr.msk.f32.vlgmr.msra.gmra.mrb[12].mxu1 %vm94_vm0, %v1053_v7 }
 0x860   :  { %v1039_v20 = vpop.permute.xlu1 %1038  ;;  %v1043_v22 = vpop.permute.xlu0 %1042 }
 0x861   :  { %v1054_v17 = vsel %vm346_vm1, %v5613_v13, %v1039_v20  ;;  %v1056_v11 = vsel %vm346_vm1, %v5617_v15, %v1043_v22  ;;  %v3896_v13 = vld [vmem:[%s6510_s3] ss:$0 sm:$0xff] }
 0x862   :  { %4352 = vmatprep.mubr.msk.f32.mxu1 %vm94_vm0, %v1054_v17  ;;  %v1292_v20 = vld [vmem:[%s6511_s4] sm:$0xff]  ;;  %v1293_v17 = vld [vmem:[%s6511_s4 + $0x8] sm:$0xff] }
 0x863   :  { %v4702_v22 = vpack.c.bf16 %v1293_v17, %v1292_v20 }
 0x864   :  { %v1041_v24 = vpop.permute.xlu1 %1040 }
 0x865   :  { %v1055_v25 = vsel %vm346_vm1, %v5611_v12, %v1041_v24  ;;  %4703 = vmatprep.subr.bf16.mxu0 %v4702_v22  ;;  %v1294_v24 = vld [vmem:[%s6511_s4 + $0x10] sm:$0xff] }
 0x866   :  { %4353 = vmatmul.mubr.msk.f32.gmra.mrb[14].mxu1 %vm94_vm0, %v1055_v25  ;;  %4705 = vmatpush3.bf16.msra.mxu0 %v4702_v22  ;;  %v1295_v25 = vld [vmem:[%s6511_s4 + $0x18] sm:$0xff] }
 0x867   :  { %4355 = vmatprep.mubr.msk.f32.mxu1 %vm94_vm0, %v1056_v11  ;;  %v4706_v11 = vpack.c.bf16 %v1295_v25, %v1294_v24 }
 0x868   :  { %v1045_v10 = vpop.permute.xlu1 %1044 }
 0x869   :  { %v1057_v28 = vsel %vm346_vm1, %v5615_v14, %v1045_v10  ;;  %4707 = vmatprep.subr.bf16.mxu0 %v4706_v11 }
 0x86a   :  { %4356 = vmatmul.mubr.msk.f32.gmra.mrb[16].mxu1 %vm94_vm0, %v1057_v28  ;;  %4709 = vmatpush3.bf16.msra.mxu0 %v4706_v11 }
 0x931   :  { %v4351_v29 = vpop.f32.mrb[12].mxu1 }
 0x932   :  { %v1159_v32 = vadd.f32 %v4351_v29, %v3896_v13  ;;  %v1153_v12 = vpop.f32.mrb[13].mxu1 }
 0x933   :  { %v1154_v30 = vadd.f32 %v3896_v13, %v1153_v12 }
 0x934   :  { %v1183_v15 = vadd.f32 %v1159_v32, %v5425_v16 }
 0x935   :  { %v1182_v31 = vadd.f32 %v1154_v30, %v5419_v9 }
 0x936   :  { %v1193_v33 = vsel %vm94_vm0, %v1183_v15, 0.0 }
 0x937   :  { %1194 = vadd.xlane.f32.xlu1 %v1193_v33  ;;  %v1190_v36 = vsel %vm94_vm0, %v1182_v31, 0.0 }
 0x938   :  { %1191 = vadd.xlane.f32.xlu0 %v1190_v36 }
 0x939   :  { %v4354_v14 = vpop.f32.mrb[14].mxu1 }
 0x93a   :  { %v1163_v37 = vpop.f32.mrb[15].mxu1  ;;  %v1169_v38 = vadd.f32 %v4354_v14, %v3896_v13 }
 0x93b   :  { %v1164_v41 = vadd.f32 %v3896_v13, %v1163_v37  ;;  %v3903_v37 = vld [vmem:[%s6512_s29] ss:$0 sm:$0xff] }
 0x93c   :  { %v1185_v9 = vadd.f32 %v1169_v38, %v5435_v23 }
 0x93d   :  { %v4357_v35 = vpop.f32.mrb[16].mxu1  ;;  %v1184_v40 = vadd.f32 %v1164_v41, %v5428_v19 }
 0x93e   :  { %v1179_v58 = vadd.f32 %v4357_v35, %v3896_v13  ;;  %v1173_v42 = vpop.f32.mrb[17].mxu1  ;;  %v1199_v45 = vsel %vm94_vm0, %v1185_v9, 0.0 }
 0x93f   :  { %v1174_v61 = vadd.f32 %v3896_v13, %v1173_v42  ;;  %v1196_v16 = vsel %vm94_vm0, %v1184_v40, 0.0 }
 0x940   :  { %1197 = vadd.xlane.f32.xlu0 %v1196_v16  ;;  %v1187_v43 = vadd.f32 %v1179_v58, %v5444_v27 }
 0x941   :  { %v1186_v39 = vadd.f32 %v1174_v61, %v5438_v26 }
 0x942   :  { %v1205_v44 = vsel %vm94_vm0, %v1187_v43, 0.0 }
 0x943   :  { %1206 = vadd.xlane.f32.xlu1 %v1205_v44  ;;  %v1202_v19 = vsel %vm94_vm0, %v1186_v39, 0.0 }
 0x944   :  { %1200 = vadd.xlane.f32.xlu0 %v1199_v45 }
 0x948   :  { %1203 = vadd.xlane.f32.xlu0 %v1202_v19 }
 0x9c4   :  { %v1195_v46 = vpop.xlane.xlu1 %1194 }
 0x9c5   :  { %v1209_v8 = vmul.f32 0.03125, %v1195_v46  ;;  %v1192_v48 = vpop.xlane.xlu0 %1191 }
 0x9c6   :  { %v1208_v2 = vmul.f32 0.03125, %v1192_v48 }
 0x9c7   :  { %v1215_v49 = vsub.f32 %v1183_v15, %v1209_v8 }
 0x9c8   :  { %v5700_v23 = vsub.f32 %v1182_v31, %v1208_v2 }
 0x9c9   :  { %v1221_v50 = vmul.f32 %v1215_v49, %v1215_v49 }
 0x9ca   :  { %v1220_v27 = vmul.f32 %v5700_v23, %v5700_v23 }
 0x9cb   :  { %v1229_v18 = vsel %vm94_vm0, %v1221_v50, 0.0 }
 0x9cc   :  { %1230 = vadd.xlane.f32.xlu1 %v1229_v18  ;;  %v1226_v26 = vsel %vm94_vm0, %v1220_v27, 0.0 }
 0x9cd   :  { %1227 = vadd.xlane.f32.xlu0 %v1226_v26  ;;  %v1198_v51 = vpop.xlane.xlu0 %1197 }
 0x9ce   :  { %v1210_v52 = vmul.f32 0.03125, %v1198_v51 }
 0x9d0   :  { %v5706_v53 = vsub.f32 %v1184_v40, %v1210_v52  ;;  %v1207_v21 = vpop.xlane.xlu1 %1206 }
 0x9d1   :  { %v1213_v54 = vmul.f32 0.03125, %v1207_v21  ;;  %v1201_v55 = vpop.xlane.xlu0 %1200 }
 0x9d2   :  { %v1211_v56 = vmul.f32 0.03125, %v1201_v55  ;;  %v1222_v57 = vmul.f32 %v5706_v53, %v5706_v53 }
 0x9d3   :  { %v5710_v59 = vsub.f32 %v1187_v43, %v1213_v54  ;;  %v3904_v43 = vld [vmem:[%s6513_s30] ss:$0 sm:$0xff] }
 0x9d4   :  { %v5712_v60 = vsub.f32 %v1185_v9, %v1211_v56  ;;  %v1232_v62 = vsel %vm94_vm0, %v1222_v57, 0.0  ;;  %v1470_v57 = vld [vmem:[%s6514_s8] sm:$0xff] }
 0x9d5   :  { %1233 = vadd.xlane.f32.xlu0 %v1232_v62  ;;  %v1204_v34 = vpop.xlane.xlu0 %1203  ;;  %v1225_v4 = vmul.f32 %v5710_v59, %v5710_v59  ;;  %v1472_v62 = vld [vmem:[%s6514_s8 + $0x10] sm:$0xff] }
 0x9d6   :  { %v1212_v63 = vmul.f32 0.03125, %v1204_v34  ;;  %v1223_v0 = vmul.f32 %v5712_v60, %v5712_v60  ;;  %v1473_v34 = vld [vmem:[%s6514_s8 + $0x18] sm:$0xff] }
 0x9d7   :  { %v1241_v6 = vsel %vm94_vm0, %v1225_v4, 0.0  ;;  %v1476_v4 = vld [vmem:[%s6514_s8 + $0x30] sm:$0xff] }
 0x9d8   :  { %v5717_v1 = vsub.f32 %v1186_v39, %v1212_v63  ;;  %v1235_v3 = vsel %vm94_vm0, %v1223_v0, 0.0  ;;  %v4714_v63 = vpack.c.bf16 %v1473_v34, %v1472_v62  ;;  %v1474_v0 = vld [vmem:[%s6514_s8 + $0x20] sm:$0xff] }
 0x9d9   :  { %1236 = vadd.xlane.f32.xlu1 %v1235_v3 }
 0x9da   :  { %v1224_v5 = vmul.f32 %v5717_v1, %v5717_v1 }
 0x9dc   :  { %v1238_v7 = vsel %vm94_vm0, %v1224_v5, 0.0  ;;  %v1477_v5 = vld [vmem:[%s6514_s8 + $0x38] sm:$0xff] }
 0x9dd   :  { %1242 = vadd.xlane.f32.xlu1 %v1241_v6  ;;  %1239 = vadd.xlane.f32.xlu0 %v1238_v7  ;;  %v4722_v6 = vpack.c.bf16 %v1477_v5, %v1476_v4  ;;  %v3905_v7 = vld [vmem:[%s6449_s11] ss:$0 sm:$0xff] }
 0xa59   :  { %v1231_v10 = vpop.xlane.xlu1 %1230 }
 0xa5a   :  { %v1245_v28 = vmul.f32 0.03125, %v1231_v10  ;;  %v1228_v13 = vpop.xlane.xlu0 %1227 }
 0xa5b   :  { %v1244_v29 = vmul.f32 0.03125, %v1228_v13 }
 0xa5c   :  { %v1251_v32 = vadd.f32 1e-12, %v1245_v28 }
 0xa5d   :  { %v1250_v12 = vadd.f32 1e-12, %v1244_v29 }
 0xa5e   :  { %5051 = vrsqrt.f32 %v1251_v32 }
 0xa5f   :  { %5053 = vrsqrt.f32 %v1250_v12 }
 0xa62   :  { %v1234_v30 = vpop.xlane.xlu0 %1233 }
 0xa63   :  { %v1246_v15 = vmul.f32 0.03125, %v1234_v30 }
 0xa65   :  { %v1252_v31 = vadd.f32 1e-12, %v1246_v15 }
 0xa66   :  { %v1237_v33 = vpop.xlane.xlu1 %1236 }
 0xa67   :  { %5055 = vrsqrt.f32 %v1252_v31  ;;  %v1247_v36 = vmul.f32 0.03125, %v1237_v33 }
 0xa68   :  { %v5052_v14 = vpop.eup %5051 }
 0xa69   :  { %v5054_v38 = vpop.eup %5053  ;;  %v1263_v41 = vmul.f32 %v5052_v14, %v1215_v49  ;;  %v1253_v35 = vadd.f32 1e-12, %v1247_v36 }
 0xa6a   :  { %v1243_v40 = vpop.xlane.xlu1 %1242  ;;  %v1240_v58 = vpop.xlane.xlu0 %1239  ;;  %v1262_v42 = vmul.f32 %v5054_v38, %v5700_v23 }
 0xa6b   :  { %v1275_v61 = vmul.f32 %v3903_v37, %v1263_v41  ;;  %5057 = vrsqrt.f32 %v1253_v35  ;;  %v1249_v16 = vmul.f32 0.03125, %v1243_v40  ;;  %v1248_v9 = vmul.f32 0.03125, %v1240_v58 }
 0xa6c   :  { %v1274_v44 = vmul.f32 %v3903_v37, %v1262_v42 }
 0xa6d   :  { %v1255_v45 = vadd.f32 1e-12, %v1249_v16  ;;  %v1254_v39 = vadd.f32 1e-12, %v1248_v9  ;;  %v5747_v46 = vadd.f32 %v3904_v43, %v1275_v61 }
 0xa6e   :  { %v5745_v19 = vadd.f32 %v3904_v43, %v1274_v44 }
 0xa6f   :  { %5059 = vrsqrt.f32 %v1255_v45 }
 0xa70   :  { %5061 = vrsqrt.f32 %v1254_v39  ;;  %4366 = vmatprep.mubr.msk.f32.mxu0 %vm94_vm0, %v5745_v19 }
 0xa71   :  { %v5056_v8 = vpop.eup %5055  ;;  %4367 = vmatmul.mubr.msk.f32.vlgmr.msra.gmra.mrb[18].mxu0 %vm94_vm0, %v5747_v46 }
 0xa72   :  { %v1264_v48 = vmul.f32 %v5056_v8, %v5706_v53 }
 0xa74   :  { %v1276_v2 = vmul.f32 %v3903_v37, %v1264_v48 }
 0xa75   :  { %v5058_v49 = vpop.eup %5057 }
 0xa76   :  { %v5754_v23 = vadd.f32 %v3904_v43, %v1276_v2  ;;  %v1265_v50 = vmul.f32 %v5058_v49, %v5712_v60 }
 0xa78   :  { %4369 = vmatprep.mubr.msk.f32.mxu0 %vm94_vm0, %v5754_v23  ;;  %v1277_v27 = vmul.f32 %v3903_v37, %v1265_v50 }
 0xa79   :  { %v5060_v18 = vpop.eup %5059 }
 0xa7a   :  { %v5062_v26 = vpop.eup %5061  ;;  %v5759_v51 = vadd.f32 %v3904_v43, %v1277_v27  ;;  %v1267_v52 = vmul.f32 %v5060_v18, %v5710_v59  ;;  %v1471_v59 = vld [vmem:[%s6514_s8 + $0x8] sm:$0xff] }
 0xa7b   :  { %v1266_v21 = vmul.f32 %v5062_v26, %v5717_v1  ;;  %v4710_v60 = vpack.c.bf16 %v1471_v59, %v1470_v57  ;;  %v1475_v1 = vld [vmem:[%s6514_s8 + $0x28] sm:$0xff] }
 0xa7c   :  { %4370 = vmatmul.mubr.msk.f32.gmra.mrb[20].mxu0 %vm94_vm0, %v5759_v51  ;;  %v1279_v53 = vmul.f32 %v3903_v37, %v1267_v52  ;;  %v4718_v3 = vpack.c.bf16 %v1475_v1, %v1474_v0 }
 0xa7d   :  { %v1278_v54 = vmul.f32 %v3903_v37, %v1266_v21  ;;  %4711 = vmatprep.subr.bf16.mxu1 %v4710_v60 }
 0xa7e   :  { %v5765_v55 = vadd.f32 %v3904_v43, %v1279_v53  ;;  %4713 = vmatpush3.bf16.msra.mxu1 %v4710_v60 }
 0xa7f   :  { %v5767_v56 = vadd.f32 %v3904_v43, %v1278_v54  ;;  %4715 = vmatprep.subr.bf16.mxu1 %v4714_v63 }
 0xa81   :  { %4372 = vmatprep.mubr.msk.f32.mxu0 %vm94_vm0, %v5767_v56 }
 0xa82   :  { %4373 = vmatmul.mubr.msk.f32.gmra.mrb[22].mxu0 %vm94_vm0, %v5765_v55  ;;  %4717 = vmatpush3.bf16.msra.mxu1 %v4714_v63 }
 0xa83   :  { %4719 = vmatprep.subr.bf16.mxu1 %v4718_v3 }
 0xa86   :  { %4721 = vmatpush3.bf16.msra.mxu1 %v4718_v3 }
 0xa87   :  { %4723 = vmatprep.subr.bf16.mxu1 %v4722_v6 }
 0xa8a   :  { %4725 = vmatpush3.bf16.msra.mxu1 %v4722_v6 }
 0xb44   :  { %v4368_v20 = vpop.f32.mrb[18].mxu0 }
 0xb45   :  { %v1393_v17 = vadd.f32 %v4368_v20, %v3905_v7  ;;  %v1387_v22 = vpop.f32.mrb[19].mxu0 }
 0xb46   :  { %v1388_v24 = vadd.f32 %v3905_v7, %v1387_v22 }
 0xb47   :  { %v1417_v25 = vmul.f32 %v1393_v17, %v1393_v17 }
 0xb48   :  { %v1416_v11 = vmul.f32 %v1388_v24, %v1388_v24 }
 0xb49   :  { %v1423_v10 = vmul.f32 %v1417_v25, %v1393_v17 }
 0xb4a   :  { %v1422_v28 = vmul.f32 %v1416_v11, %v1388_v24 }
 0xb4b   :  { %v1429_v13 = vmul.f32 0.044715, %v1423_v10 }
 0xb4c   :  { %v1428_v29 = vmul.f32 0.044715, %v1422_v28 }
 0xb4d   :  { %v1435_v32 = vadd.f32 %v1429_v13, %v1393_v17 }
 0xb4e   :  { %v1434_v12 = vadd.f32 %v1428_v29, %v1388_v24  ;;  %v3912_v29 = vld [vmem:[%s6450_s13] ss:$0 sm:$0xff] }
 0xb4f   :  { %v1441_v30 = vmul.f32 0.7978846, %v1435_v32  ;;  %v4371_v15 = vpop.f32.mrb[20].mxu0 }
 0xb50   :  { %v1440_v31 = vmul.f32 0.7978846, %v1434_v12  ;;  %v1403_v33 = vadd.f32 %v4371_v15, %v3905_v7  ;;  %v1397_v36 = vpop.f32.mrb[21].mxu0 }
 0xb51   :  { %5063 = vtanh.f32 %v1441_v30  ;;  %v1398_v14 = vadd.f32 %v3905_v7, %v1397_v36 }
 0xb52   :  { %5065 = vtanh.f32 %v1440_v31  ;;  %v1419_v37 = vmul.f32 %v1403_v33, %v1403_v33 }
 0xb53   :  { %v1418_v38 = vmul.f32 %v1398_v14, %v1398_v14 }
 0xb54   :  { %v1425_v41 = vmul.f32 %v1419_v37, %v1403_v33 }
 0xb55   :  { %v1424_v35 = vmul.f32 %v1418_v38, %v1398_v14  ;;  %v4374_v40 = vpop.f32.mrb[22].mxu0 }
 0xb56   :  { %v1431_v58 = vmul.f32 0.044715, %v1425_v41  ;;  %v1413_v42 = vadd.f32 %v4374_v40, %v3905_v7  ;;  %v1407_v61 = vpop.f32.mrb[23].mxu0 }
 0xb57   :  { %v1430_v16 = vmul.f32 0.044715, %v1424_v35  ;;  %v1408_v9 = vadd.f32 %v3905_v7, %v1407_v61 }
 0xb58   :  { %v1437_v43 = vadd.f32 %v1431_v58, %v1403_v33  ;;  %v1421_v44 = vmul.f32 %v1413_v42, %v1413_v42 }
 0xb59   :  { %v1436_v45 = vadd.f32 %v1430_v16, %v1398_v14  ;;  %v1420_v39 = vmul.f32 %v1408_v9, %v1408_v9 }
 0xb5a   :  { %v1443_v8 = vmul.f32 0.7978846, %v1437_v43  ;;  %v1427_v48 = vmul.f32 %v1421_v44, %v1413_v42 }
 0xb5b   :  { %v5064_v2 = vpop.eup %5063  ;;  %v1442_v49 = vmul.f32 0.7978846, %v1436_v45  ;;  %v1426_v50 = vmul.f32 %v1420_v39, %v1408_v9 }
 0xb5c   :  { %v5066_v27 = vpop.eup %5065  ;;  %v1453_v18 = vadd.f32 1.0, %v5064_v2  ;;  %5067 = vtanh.f32 %v1443_v8  ;;  %v1433_v26 = vmul.f32 0.044715, %v1427_v48 }
 0xb5d   :  { %5069 = vtanh.f32 %v1442_v49  ;;  %v1432_v52 = vmul.f32 0.044715, %v1426_v50  ;;  %v1452_v21 = vadd.f32 1.0, %v5066_v27 }
 0xb5e   :  { %v1459_v53 = vmul.f32 0.5, %v1453_v18  ;;  %v1439_v54 = vadd.f32 %v1433_v26, %v1413_v42 }
 0xb5f   :  { %v1438_v57 = vadd.f32 %v1432_v52, %v1408_v9  ;;  %v1458_v59 = vmul.f32 0.5, %v1452_v21 }
 0xb60   :  { %v1445_v60 = vmul.f32 0.7978846, %v1439_v54  ;;  %v1465_v63 = vmul.f32 %v1459_v53, %v1393_v17 }
 0xb61   :  { %v1444_v62 = vmul.f32 0.7978846, %v1438_v57  ;;  %v1464_v34 = vmul.f32 %v1458_v59, %v1388_v24 }
 0xb62   :  { %5071 = vtanh.f32 %v1445_v60 }
 0xb63   :  { %5073 = vtanh.f32 %v1444_v62  ;;  %4391 = vmatprep.mubr.msk.f32.mxu1 %vm1485_vm4, %v1464_v34 }
 0xb64   :  { %4392 = vmatmul.mubr.msk.f32.vlgmr.msra.gmra.mrb[18].mxu1 %vm1485_vm4, %v1465_v63 }
 0xb66   :  { %v5068_v0 = vpop.eup %5067 }
 0xb67   :  { %v5070_v1 = vpop.eup %5069  ;;  %v1455_v3 = vadd.f32 1.0, %v5068_v0 }
 0xb68   :  { %v1454_v4 = vadd.f32 1.0, %v5070_v1 }
 0xb69   :  { %v1461_v5 = vmul.f32 0.5, %v1455_v3 }
 0xb6a   :  { %v1460_v6 = vmul.f32 0.5, %v1454_v4 }
 0xb6b   :  { %v1467_v25 = vmul.f32 %v1461_v5, %v1403_v33 }
 0xb6c   :  { %v5072_v7 = vpop.eup %5071  ;;  %v1466_v20 = vmul.f32 %v1460_v6, %v1398_v14 }
 0xb6d   :  { %v5074_v22 = vpop.eup %5073  ;;  %v1457_v11 = vadd.f32 1.0, %v5072_v7 }
 0xb6e   :  { %4394 = vmatprep.mubr.msk.f32.mxu1 %vm1485_vm4, %v1466_v20  ;;  %v1456_v17 = vadd.f32 1.0, %v5074_v22  ;;  %v3921_v22 = vld [vmem:[%s6502_s7 + $0x20] sm:$0xff] }
 0xb6f   :  { %4395 = vmatmul.mubr.msk.f32.gmra.mrb[20].mxu1 %vm1485_vm4, %v1467_v25  ;;  %v1463_v24 = vmul.f32 0.5, %v1457_v11  ;;  %v3922_v25 = vld [vmem:[%s6502_s7 + $0x28] sm:$0xff] }
 0xb70   :  { %v1462_v10 = vmul.f32 0.5, %v1456_v17  ;;  %v4726_v11 = vpack.c.bf16 %v3922_v25, %v3921_v22  ;;  %v3923_v17 = vld [vmem:[%s6502_s7 + $0x30] sm:$0xff] }
 0xb71   :  { %v1469_v13 = vmul.f32 %v1463_v24, %v1413_v42  ;;  %v3924_v24 = vld [vmem:[%s6502_s7 + $0x38] sm:$0xff]  ;;  %s6519_s7 = smov 48  }
 0xb72   :  { %v1468_v28 = vmul.f32 %v1462_v10, %v1408_v9  ;;  %4727 = vmatprep.subr.bf16.mxu0 %v4726_v11  ;;  %v4730_v10 = vpack.c.bf16 %v3924_v24, %v3923_v17 }
 0xb73   :  { %4729 = vmatpush3.bf16.msra.mxu0 %v4726_v11 }
 0xb74   :  { %4397 = vmatprep.mubr.msk.f32.mxu1 %vm1485_vm4, %v1468_v28  ;;  %4731 = vmatprep.subr.bf16.mxu0 %v4730_v10 }
 0xb75   :  { %4398 = vmatmul.mubr.msk.f32.gmra.mrb[22].mxu1 %vm1485_vm4, %v1469_v13 }
 0xb77   :  { %4733 = vmatpush3.bf16.msra.mxu0 %v4730_v10 }
 0xc37   :  { %v4393_v32 = vpop.f32.mrb[18].mxu1 }
 0xc38   :  { %v1576_v12 = vadd.f32 %v4393_v32, %v3912_v29  ;;  %v1570_v30 = vpop.f32.mrb[19].mxu1 }
 0xc39   :  { %v1571_v15 = vadd.f32 %v3912_v29, %v1570_v30 }
 0xc3a   :  { %v1600_v31 = vadd.f32 %v1576_v12, %v5747_v46 }
 0xc3b   :  { %v1599_v33 = vadd.f32 %v1571_v15, %v5745_v19 }
 0xc3c   :  { %v1610_v36 = vsel %vm94_vm0, %v1600_v31, 0.0 }
 0xc3d   :  { %1611 = vadd.xlane.f32.xlu1 %v1610_v36  ;;  %v1607_v14 = vsel %vm94_vm0, %v1599_v33, 0.0 }
 0xc3e   :  { %1608 = vadd.xlane.f32.xlu0 %v1607_v14 }
 0xc42   :  { %v4396_v37 = vpop.f32.mrb[20].mxu1 }
 0xc43   :  { %v1586_v38 = vadd.f32 %v4396_v37, %v3912_v29  ;;  %v1580_v41 = vpop.f32.mrb[21].mxu1 }
 0xc44   :  { %v1581_v35 = vadd.f32 %v3912_v29, %v1580_v41 }
 0xc45   :  { %v1602_v40 = vadd.f32 %v1586_v38, %v5759_v51  ;;  %v3919_v38 = vld [vmem:[%s6451_s14] ss:$0 sm:$0xff] }
 0xc46   :  { %v1601_v58 = vadd.f32 %v1581_v35, %v5754_v23 }
 0xc47   :  { %v1616_v42 = vsel %vm94_vm0, %v1602_v40, 0.0 }
 0xc48   :  { %v4399_v61 = vpop.f32.mrb[22].mxu1  ;;  %1617 = vadd.xlane.f32.xlu1 %v1616_v42  ;;  %v1613_v19 = vsel %vm94_vm0, %v1601_v58, 0.0 }
 0xc49   :  { %v1596_v46 = vadd.f32 %v4399_v61, %v3912_v29  ;;  %v1590_v16 = vpop.f32.mrb[23].mxu1  ;;  %1614 = vadd.xlane.f32.xlu0 %v1613_v19  ;;  %v3920_v61 = vld [vmem:[%s6452_s15] ss:$0 sm:$0xff] }
 0xc4a   :  { %v1591_v9 = vadd.f32 %v3912_v29, %v1590_v16 }
 0xc4b   :  { %v1604_v43 = vadd.f32 %v1596_v46, %v5765_v55 }
 0xc4c   :  { %v1603_v44 = vadd.f32 %v1591_v9, %v5767_v56 }
 0xc4d   :  { %v1622_v45 = vsel %vm94_vm0, %v1604_v43, 0.0 }
 0xc4e   :  { %1623 = vadd.xlane.f32.xlu1 %v1622_v45  ;;  %v1619_v51 = vsel %vm94_vm0, %v1603_v44, 0.0 }
 0xc4f   :  { %1620 = vadd.xlane.f32.xlu0 %v1619_v51 }
 0xcca   :  { %v1612_v23 = vpop.xlane.xlu1 %1611 }
 0xccb   :  { %v1626_v39 = vmul.f32 0.03125, %v1612_v23  ;;  %v1609_v8 = vpop.xlane.xlu0 %1608 }
 0xccc   :  { %v1625_v48 = vmul.f32 0.03125, %v1609_v8 }
 0xccd   :  { %v1632_v2 = vsub.f32 %v1600_v31, %v1626_v39 }
 0xcce   :  { %v5821_v49 = vsub.f32 %v1599_v33, %v1625_v48 }
 0xccf   :  { %v1638_v50 = vmul.f32 %v1632_v2, %v1632_v2 }
 0xcd0   :  { %v1637_v27 = vmul.f32 %v5821_v49, %v5821_v49 }
 0xcd1   :  { %v1646_v55 = vsel %vm94_vm0, %v1638_v50, 0.0 }
 0xcd2   :  { %1647 = vadd.xlane.f32.xlu1 %v1646_v55  ;;  %v1643_v56 = vsel %vm94_vm0, %v1637_v27, 0.0 }
 0xcd3   :  { %1644 = vadd.xlane.f32.xlu0 %v1643_v56 }
 0xcd5   :  { %v1618_v18 = vpop.xlane.xlu1 %1617 }
 0xcd6   :  { %v1628_v26 = vmul.f32 0.03125, %v1618_v18  ;;  %v1615_v52 = vpop.xlane.xlu0 %1614 }
 0xcd7   :  { %v1627_v21 = vmul.f32 0.03125, %v1615_v52 }
 0xcd8   :  { %v5827_v53 = vsub.f32 %v1602_v40, %v1628_v26 }
 0xcd9   :  { %v5829_v54 = vsub.f32 %v1601_v58, %v1627_v21 }
 0xcda   :  { %v1640_v57 = vmul.f32 %v5827_v53, %v5827_v53 }
 0xcdb   :  { %v1624_v59 = vpop.xlane.xlu1 %1623  ;;  %v1639_v60 = vmul.f32 %v5829_v54, %v5829_v54 }
 0xcdc   :  { %v1630_v62 = vmul.f32 0.03125, %v1624_v59  ;;  %v1621_v34 = vpop.xlane.xlu0 %1620  ;;  %v1652_v63 = vsel %vm94_vm0, %v1640_v57, 0.0  ;;  %v3926_v59 = vld [vmem:[%s6505_s5 + $0x1] ss:$0 sm:$0xff] }
 0xcdd   :  { %v1629_v0 = vmul.f32 0.03125, %v1621_v34  ;;  %1653 = vadd.xlane.f32.xlu1 %v1652_v63  ;;  %v1649_v1 = vsel %vm94_vm0, %v1639_v60, 0.0 }
 0xcde   :  { %v5837_v3 = vsub.f32 %v1604_v43, %v1630_v62  ;;  %1650 = vadd.xlane.f32.xlu0 %v1649_v1 }
 0xcdf   :  { %v5839_v4 = vsub.f32 %v1603_v44, %v1629_v0 }
 0xce0   :  { %v1642_v5 = vmul.f32 %v5837_v3, %v5837_v3 }
 0xce1   :  { %v1641_v6 = vmul.f32 %v5839_v4, %v5839_v4 }
 0xce2   :  { %v1658_v7 = vsel %vm94_vm0, %v1642_v5, 0.0 }
 0xce3   :  { %1659 = vadd.xlane.f32.xlu1 %v1658_v7  ;;  %v1655_v20 = vsel %vm94_vm0, %v1641_v6, 0.0 }
 0xce4   :  { %1656 = vadd.xlane.f32.xlu0 %v1655_v20 }
 0xd5f   :  { %v1648_v28 = vpop.xlane.xlu1 %1647 }
 0xd60   :  { %v1662_v13 = vmul.f32 0.03125, %v1648_v28  ;;  %v1645_v29 = vpop.xlane.xlu0 %1644 }
 0xd61   :  { %v1661_v32 = vmul.f32 0.03125, %v1645_v29 }
 0xd62   :  { %v1668_v12 = vadd.f32 1e-12, %v1662_v13 }
 0xd63   :  { %v1667_v30 = vadd.f32 1e-12, %v1661_v32 }
 0xd64   :  { %5075 = vrsqrt.f32 %v1668_v12 }
 0xd65   :  { %5077 = vrsqrt.f32 %v1667_v30 }
 0xd6a   :  { %v1654_v15 = vpop.xlane.xlu1 %1653 }
 0xd6b   :  { %v1664_v31 = vmul.f32 0.03125, %v1654_v15  ;;  %v1651_v33 = vpop.xlane.xlu0 %1650 }
 0xd6c   :  { %v1663_v36 = vmul.f32 0.03125, %v1651_v33 }
 0xd6d   :  { %v1670_v14 = vadd.f32 1e-12, %v1664_v31 }
 0xd6e   :  { %v5076_v37 = vpop.eup %5075  ;;  %v1669_v41 = vadd.f32 1e-12, %v1663_v36 }
 0xd6f   :  { %v5078_v35 = vpop.eup %5077  ;;  %v1680_v40 = vmul.f32 %v5076_v37, %v1632_v2  ;;  %5079 = vrsqrt.f32 %v1670_v14 }
 0xd70   :  { %5081 = vrsqrt.f32 %v1669_v41  ;;  %v1660_v58 = vpop.xlane.xlu1 %1659  ;;  %v1679_v42 = vmul.f32 %v5078_v35, %v5821_v49  ;;  %v5954_v41 = vld [vmem:[%s6508_s1 + $0x8] sm:$0xff] }
 0xd71   :  { %v1692_v19 = vmul.f32 %v3919_v38, %v1680_v40  ;;  %v1666_v46 = vmul.f32 0.03125, %v1660_v58  ;;  %v1657_v16 = vpop.xlane.xlu0 %1656  ;;  %v5960_v58 = vld [vmem:[%s6508_s1] sm:$0xff] }
 0xd72   :  { %v1665_v9 = vmul.f32 0.03125, %v1657_v16  ;;  %v1691_v43 = vmul.f32 %v3919_v38, %v1679_v42 }
 0xd73   :  { %v1672_v44 = vadd.f32 1e-12, %v1666_v46  ;;  %v5868_v23 = vadd.f32 %v3920_v61, %v1692_v19 }
 0xd74   :  { %v1671_v45 = vadd.f32 1e-12, %v1665_v9  ;;  %v5866_v51 = vadd.f32 %v3920_v61, %v1691_v43  ;;  %v5968_v43 = vld [vmem:[%s6508_s1 + $0x18] sm:$0xff] }
 0xd75   :  { %5083 = vrsqrt.f32 %v1672_v44 }
 0xd76   :  { %5085 = vrsqrt.f32 %v1671_v45  ;;  %4408 = vmatprep.mubr.msk.f32.mxu0 %vm94_vm0, %v5866_v51 }
 0xd77   :  { %4409 = vmatmul.mubr.msk.f32.vlgmr.msra.gmra.mrb[24].mxu0 %vm94_vm0, %v5868_v23 }
 0xd79   :  { %v5080_v39 = vpop.eup %5079 }
 0xd7a   :  { %v5082_v8 = vpop.eup %5081  ;;  %v1682_v48 = vmul.f32 %v5080_v39, %v5827_v53 }
 0xd7b   :  { %v1681_v2 = vmul.f32 %v5082_v8, %v5829_v54 }
 0xd7c   :  { %v1694_v49 = vmul.f32 %v3919_v38, %v1682_v48 }
 0xd7d   :  { %v1693_v50 = vmul.f32 %v3919_v38, %v1681_v2  ;;  %v5975_v2 = vld [vmem:[%s6508_s1 + $0x10] sm:$0xff] }
 0xd7e   :  { %v5878_v18 = vadd.f32 %v3920_v61, %v1694_v49 }
 0xd7f   :  { %v5084_v27 = vpop.eup %5083  ;;  %v5876_v55 = vadd.f32 %v3920_v61, %v1693_v50 }
 0xd80   :  { %v5086_v56 = vpop.eup %5085  ;;  %v1684_v26 = vmul.f32 %v5084_v27, %v5837_v3  ;;  %v5981_v27 = vld [vmem:[%s6508_s1 + $0x20] sm:$0xff] }
 0xd81   :  { %4411 = vmatprep.mubr.msk.f32.mxu0 %vm94_vm0, %v5876_v55  ;;  %v1683_v52 = vmul.f32 %v5086_v56, %v5839_v4 }
 0xd82   :  { %4412 = vmatmul.mubr.msk.f32.gmra.mrb[26].mxu0 %vm94_vm0, %v5878_v18  ;;  %v1696_v21 = vmul.f32 %v3919_v38, %v1684_v26 }
 0xd83   :  { %v1695_v53 = vmul.f32 %v3919_v38, %v1683_v52  ;;  %v5988_v52 = vld [vmem:[%s6508_s1 + $0x28] sm:$0xff]  ;;  %s6517_s1 = smov 80  }
 0xd84   :  { %v5888_v57 = vadd.f32 %v3920_v61, %v1696_v21 }
 0xd85   :  { %v5886_v54 = vadd.f32 %v3920_v61, %v1695_v53 }
 0xd87   :  { %4414 = vmatprep.mubr.msk.f32.mxu0 %vm94_vm0, %v5886_v54 }
 0xd88   :  { %4415 = vmatmul.mubr.msk.f32.gmra.mrb[28].mxu0 %vm94_vm0, %v5888_v57 }
 0xe4a   :  { %v4410_v60 = vpop.f32.mrb[24].mxu0 }
 0xe4b   :  { %v5897_v62 = vadd.f32 %v4410_v60, %v3926_v59  ;;  %v1806_v34 = vpop.f32.mrb[25].mxu0 }
 0xe4c   :  { %v5899_v63 = vadd.f32 %v3926_v59, %v1806_v34 }
 0xe4e   :  { %4429 = vmatprep.mubr.msk.f32.mxu1 %vm346_vm1, %v5899_v63  ;;  %v5905_v0 = vpack.i.bf16 %v5897_v62, %v5899_v63 }
 0xe50   :  { %4932 = vrot.lane.b32.xlu0 %v5905_v0, %s6515_s9 }
 0xe55   :  { %v4413_v1 = vpop.f32.mrb[26].mxu0 }
 0xe56   :  { %v5909_v3 = vadd.f32 %v4413_v1, %v3926_v59  ;;  %v1816_v4 = vpop.f32.mrb[27].mxu0 }
 0xe57   :  { %v5911_v5 = vadd.f32 %v3926_v59, %v1816_v4 }
 0xe59   :  { %v5915_v6 = vpack.i.bf16 %v5909_v3, %v5911_v5 }
 0xe5b   :  { %v4416_v7 = vpop.f32.mrb[28].mxu0  ;;  %4937 = vrot.lane.b32.xlu1 %v5915_v6, %s6515_s9 }
 0xe5c   :  { %v5919_v20 = vadd.f32 %v4416_v7, %v3926_v59  ;;  %v1826_v22 = vpop.f32.mrb[29].mxu0 }
 0xe5d   :  { %v5921_v25 = vadd.f32 %v3926_v59, %v1826_v22 }
 0xe5f   :  { %v5925_v11 = vpack.i.bf16 %v5919_v20, %v5921_v25 }
 0xe61   :  { %4942 = vrot.lane.b32.xlu1 %v5925_v11, %s6515_s9 }
 0xec2   :  { %v4933_v17 = vpop.permute.xlu0 %4932 }
 0xec3   :  { %v4935_v24 = vunpack.i.h.bf16 %v4933_v17  ;;  %v4934_v10 = vunpack.i.l.bf16 %v4933_v17 }
 0xec5   :  { %v4734_v28 = vpack.c.bf16 %v4935_v24, %v4934_v10 }
 0xec7   :  { %4736 = vmatprep.subr.msk.bf16.mxu1 %vm5485_vm2, %v4734_v28 }
 0xec8   :  { %4739 = vmatpush3.bf16.xpose.msk.msra.mxu1 %vm5485_vm2, %v4734_v28 }
 0xecd   :  { %v4938_v13 = vpop.permute.xlu1 %4937 }
 0xece   :  { %v4940_v29 = vunpack.i.h.bf16 %v4938_v13  ;;  %v4939_v32 = vunpack.i.l.bf16 %v4938_v13 }
 0xed0   :  { %v4740_v12 = vpack.c.bf16 %v4940_v29, %v4939_v32 }
 0xed2   :  { %4742 = vmatprep.subr.msk.bf16.mxu1 %vm5485_vm2, %v4740_v12 }
 0xed3   :  { %v4943_v30 = vpop.permute.xlu1 %4942  ;;  %4745 = vmatpush3.bf16.xpose.msk.msra.mxu1 %vm5485_vm2, %v4740_v12 }
 0xed4   :  { %v4945_v15 = vunpack.i.h.bf16 %v4943_v30  ;;  %v4944_v31 = vunpack.i.l.bf16 %v4943_v30 }
 0xed6   :  { %v4746_v33 = vpack.c.bf16 %v4945_v15, %v4944_v31 }
 0xed8   :  { %4748 = vmatprep.subr.msk.bf16.mxu1 %vm5485_vm2, %v4746_v33 }
 0xedb   :  { %4751 = vmatpush3.bf16.xpose.msk.msra.mxu1 %vm5485_vm2, %v4746_v33 }
 0xee2   :  { %4430 = vmatmul.mubr.msk.f32.vlgmr.msra.gmra.mrb[24].mxu1 %vm346_vm1, %v5897_v62 }
 0xee3   :  { %4432 = vmatprep.mubr.msk.f32.mxu1 %vm346_vm1, %v5911_v5 }
 0xee6   :  { %4433 = vmatmul.mubr.msk.f32.gmra.mrb[26].mxu1 %vm346_vm1, %v5909_v3 }
 0xee7   :  { %4435 = vmatprep.mubr.msk.f32.mxu1 %vm346_vm1, %v5921_v25 }
 0xeea   :  { %4436 = vmatmul.mubr.msk.f32.gmra.mrb[28].mxu1 %vm346_vm1, %v5919_v20 }
 0xfb5   :  { %v4431_v36 = vpop.f32.mrb[24].mxu1 }
 0xfb6   :  { %v1973_v14 = vmul.f32 0.25, %v4431_v36  ;;  %v1943_v37 = vpop.f32.mrb[25].mxu1 }
 0xfb7   :  { %v1972_v38 = vmul.f32 0.25, %v1943_v37 }
 0xfb8   :  { %v1979_v35 = vadd.f32 %v5954_v41, %v1973_v14 }
 0xfb9   :  { %v4434_v40 = vpop.f32.mrb[26].mxu1  ;;  %v1978_v42 = vadd.f32 %v5960_v58, %v1972_v38 }
 0xfba   :  { %v1975_v61 = vmul.f32 0.25, %v4434_v40  ;;  %v1953_v19 = vpop.f32.mrb[27].mxu1  ;;  %v1987_v46 = vsel %vm478_vm3, %v1979_v35, -inf }
 0xfbb   :  { %v1974_v16 = vmul.f32 0.25, %v1953_v19  ;;  %1988 = vmax.xlane.f32.xlu0 %v1987_v46  ;;  %v1984_v9 = vsel %vm478_vm3, %v1978_v42, -inf }
 0xfbc   :  { %1985 = vmax.xlane.f32.xlu1 %v1984_v9  ;;  %v1981_v44 = vadd.f32 %v5968_v43, %v1975_v61 }
 0xfbd   :  { %v4437_v45 = vpop.f32.mrb[28].mxu1  ;;  %v1980_v49 = vadd.f32 %v5975_v2, %v1974_v16 }
 0xfbe   :  { %v1977_v39 = vmul.f32 0.25, %v4437_v45  ;;  %v1963_v8 = vpop.f32.mrb[29].mxu1  ;;  %v1993_v48 = vsel %vm478_vm3, %v1981_v44, -inf }
 0xfbf   :  { %v1976_v50 = vmul.f32 0.25, %v1963_v8  ;;  %1994 = vmax.xlane.f32.xlu0 %v1993_v48  ;;  %v1990_v26 = vsel %vm478_vm3, %v1980_v49, -inf }
 0xfc0   :  { %v1983_v21 = vadd.f32 %v5988_v52, %v1977_v39 }
 0xfc1   :  { %v1982_v56 = vadd.f32 %v5981_v27, %v1976_v50 }
 0xfc2   :  { %v1999_v59 = vsel %vm478_vm3, %v1983_v21, -inf }
 0xfc3   :  { %1991 = vmax.xlane.f32.xlu0 %v1990_v26  ;;  %v1996_v53 = vsel %vm478_vm3, %v1982_v56, -inf }
 0xfc4   :  { %1997 = vmax.xlane.f32.xlu1 %v1996_v53 }
 0xfc7   :  { %2000 = vmax.xlane.f32.xlu0 %v1999_v59 }
 0xfd5   :  { %4947 = vrot.lane.b32.xlu1 %v5905_v0, %s6516_s10 }
 0xfd9   :  { %4957 = vrot.lane.b32.xlu1 %v5925_v11, %s6516_s10 }
 0xfdd   :  { %4952 = vrot.lane.b32.xlu0 %v5915_v6, %s6516_s10 }
0x1048   :  { %v1989_v60 = vpop.xlane.xlu0 %1988 }
0x1049   :  { %v2003_v34 = vsub.f32 %v1979_v35, %v1989_v60  ;;  %v1986_v1 = vpop.xlane.xlu1 %1985 }
0x104a   :  { %v2002_v4 = vsub.f32 %v1978_v42, %v1986_v1 }
0x104b   :  { %v2010_v7 = vmul.f32 1.442695, %v2003_v34 }
0x104c   :  { %v2008_v22 = vmul.f32 1.442695, %v2002_v4  ;;  %v1995_v17 = vpop.xlane.xlu0 %1994 }
0x104d   :  { %5087 = vpow2.f32 %v2010_v7  ;;  %v2005_v24 = vsub.f32 %v1981_v44, %v1995_v17 }
0x104e   :  { %5089 = vpow2.f32 %v2008_v22 }
0x104f   :  { %v2014_v10 = vmul.f32 1.442695, %v2005_v24 }
0x1050   :  { %v1992_v28 = vpop.xlane.xlu0 %1991 }
0x1051   :  { %5091 = vpow2.f32 %v2014_v10  ;;  %v2004_v13 = vsub.f32 %v1980_v49, %v1992_v28  ;;  %v1998_v29 = vpop.xlane.xlu1 %1997 }
0x1052   :  { %v2006_v12 = vsub.f32 %v1982_v56, %v1998_v29 }
0x1053   :  { %v2012_v32 = vmul.f32 1.442695, %v2004_v13 }
0x1054   :  { %v2001_v30 = vpop.xlane.xlu0 %2000  ;;  %v2016_v37 = vmul.f32 1.442695, %v2006_v12 }
0x1055   :  { %5093 = vpow2.f32 %v2012_v32  ;;  %v2007_v15 = vsub.f32 %v1983_v21, %v2001_v30  ;;  %v4948_v31 = vpop.permute.xlu1 %4947 }
0x1056   :  { %v4950_v33 = vunpack.i.h.bf16 %v4948_v31  ;;  %v4949_v36 = vunpack.i.l.bf16 %v4948_v31 }
0x1057   :  { %v5088_v14 = vpop.eup %5087  ;;  %v2018_v38 = vmul.f32 1.442695, %v2007_v15 }
0x1058   :  { %v5090_v35 = vpop.eup %5089  ;;  %v4752_v40 = vpack.c.bf16 %v4950_v33, %v4949_v36  ;;  %v4953_v42 = vpop.permute.xlu0 %4952  ;;  %v2023_v61 = vsel %vm478_vm3, %v5088_v14, 0.0 }
0x1059   :  { %5095 = vpow2.f32 %v2018_v38  ;;  %v4955_v19 = vunpack.i.h.bf16 %v4953_v42  ;;  %v4954_v46 = vunpack.i.l.bf16 %v4953_v42  ;;  %2024 = vadd.xlane.f32.xlu0 %v2023_v61  ;;  %v4958_v16 = vpop.permute.xlu1 %4957  ;;  %v2020_v9 = vsel %vm478_vm3, %v5090_v35, 0.0 }
0x105a   :  { %v4960_v44 = vunpack.i.h.bf16 %v4958_v16  ;;  %v4959_v45 = vunpack.i.l.bf16 %v4958_v16  ;;  %2021 = vadd.xlane.f32.xlu1 %v2020_v9  ;;  %4753 = vmatprep.subr.bf16.mxu0 %v4752_v40  ;;  %5097 = vpow2.f32 %v2016_v37 }
0x105b   :  { %v5092_v39 = vpop.eup %5091  ;;  %v4756_v8 = vpack.c.bf16 %v4955_v19, %v4954_v46  ;;  %4755 = vmatpush3.bf16.msra.mxu0 %v4752_v40 }
0x105c   :  { %v2029_v48 = vsel %vm478_vm3, %v5092_v39, 0.0  ;;  %v4760_v49 = vpack.c.bf16 %v4960_v44, %v4959_v45 }
0x105d   :  { %2030 = vadd.xlane.f32.xlu0 %v2029_v48  ;;  %4757 = vmatprep.subr.bf16.mxu0 %v4756_v8 }
0x105f   :  { %v5094_v50 = vpop.eup %5093  ;;  %4759 = vmatpush3.bf16.msra.mxu0 %v4756_v8 }
0x1060   :  { %4761 = vmatprep.subr.bf16.mxu0 %v4760_v49  ;;  %v2026_v56 = vsel %vm478_vm3, %v5094_v50, 0.0 }
0x1061   :  { %2027 = vadd.xlane.f32.xlu1 %v2026_v56 }
0x1063   :  { %v5096_v26 = vpop.eup %5095  ;;  %4763 = vmatpush3.bf16.msra.mxu0 %v4760_v49 }
0x1064   :  { %v2035_v21 = vsel %vm478_vm3, %v5096_v26, 0.0  ;;  %v5098_v53 = vpop.eup %5097 }
0x1065   :  { %2036 = vadd.xlane.f32.xlu0 %v2035_v21  ;;  %v2032_v59 = vsel %vm478_vm3, %v5098_v53, 0.0 }
0x1069   :  { %2033 = vadd.xlane.f32.xlu0 %v2032_v59 }
0x1072   :  { %4967 = vrot.lane.b32.xlu1 %v5915_v6, %s6517_s1 }
0x1076   :  { %4972 = vrot.lane.b32.xlu1 %v5925_v11, %s6517_s1 }
0x107a   :  { %2181 = vrot.lane.b32.xlu1 %v5899_v63, %s6518_s2 }
0x107e   :  { %2183 = vrot.lane.b32.xlu1 %v5897_v62, %s6518_s2 }
0x107f   :  { %4962 = vrot.lane.b32.xlu0 %v5905_v0, %s6517_s1  ;;  %s6521_s1 = sld [smem:[#allocation14_spill]] }
0x1082   :  { %2185 = vrot.lane.b32.xlu1 %v5911_v5, %s6518_s2 }
0x1083   :  { %2187 = vrot.lane.b32.xlu0 %v5909_v3, %s6518_s2 }
0x1086   :  { %2189 = vrot.lane.b32.xlu1 %v5921_v25, %s6518_s2 }
0x1087   :  { %2191 = vrot.lane.b32.xlu0 %v5919_v20, %s6518_s2 }
0x10e6   :  { %v2025_v60 = vpop.xlane.xlu0 %2024 }
0x10e7   :  { %5099 = vrcp.f32 %v2025_v60  ;;  %v2022_v63 = vpop.xlane.xlu1 %2021 }
0x10e8   :  { %5101 = vrcp.f32 %v2022_v63 }
0x10ea   :  { %v2031_v62 = vpop.xlane.xlu0 %2030 }
0x10eb   :  { %5103 = vrcp.f32 %v2031_v62 }
0x10ee   :  { %v2028_v34 = vpop.xlane.xlu1 %2027 }
0x10ef   :  { %5105 = vrcp.f32 %v2028_v34 }
0x10f1   :  { %v5100_v1 = vpop.eup %5099 }
0x10f2   :  { %v5102_v4 = vpop.eup %5101  ;;  %v2037_v5 = vpop.xlane.xlu0 %2036  ;;  %v2041_v22 = vmul.f32 %v5100_v1, %v5088_v14 }
0x10f3   :  { %v2039_v7 = vmul.f32 %v5102_v4, %v5090_v35  ;;  %5107 = vrcp.f32 %v2037_v5  ;;  %v4968_v20 = vpop.permute.xlu1 %4967 }
0x10f4   :  { %v4970_v24 = vunpack.i.h.bf16 %v4968_v20  ;;  %v4969_v13 = vunpack.i.l.bf16 %v4968_v20 }
0x10f5   :  { %4450 = vmatprep.mubr.msk.f32.mxu0 %vm478_vm3, %v2039_v7  ;;  %v5104_v25 = vpop.eup %5103 }
0x10f6   :  { %v2034_v3 = vpop.xlane.xlu0 %2033  ;;  %4451 = vmatmul.mubr.msk.f32.vlgmr.msra.gmra.mrb[30].mxu0 %vm478_vm3, %v2041_v22  ;;  %v2045_v12 = vmul.f32 %v5104_v25, %v5092_v39  ;;  %v4770_v15 = vpack.c.bf16 %v4970_v24, %v4969_v13 }
0x10f7   :  { %5109 = vrcp.f32 %v2034_v3  ;;  %v4973_v31 = vpop.permute.xlu1 %4972 }
0x10f8   :  { %v4975_v37 = vunpack.i.h.bf16 %v4973_v31  ;;  %v4974_v38 = vunpack.i.l.bf16 %v4973_v31 }
0x10f9   :  { %v5106_v17 = vpop.eup %5105 }
0x10fa   :  { %v4963_v10 = vpop.permute.xlu0 %4962  ;;  %v2043_v28 = vmul.f32 %v5106_v17, %v5094_v50  ;;  %v4776_v42 = vpack.c.bf16 %v4975_v37, %v4974_v38 }
0x10fb   :  { %v4965_v29 = vunpack.i.h.bf16 %v4963_v10  ;;  %v4964_v32 = vunpack.i.l.bf16 %v4963_v10  ;;  %v2182_v40 = vpop.permute.xlu1 %2181 }
0x10fc   :  { %4453 = vmatprep.mubr.msk.f32.mxu0 %vm478_vm3, %v2043_v28 }
0x10fd   :  { %v4764_v30 = vpack.c.bf16 %v4965_v29, %v4964_v32  ;;  %4454 = vmatmul.mubr.msk.f32.gmra.mrb[32].mxu0 %vm478_vm3, %v2045_v12  ;;  %v5108_v33 = vpop.eup %5107 }
0x10fe   :  { %v2049_v35 = vmul.f32 %v5108_v33, %v5096_v26  ;;  %v2188_v46 = vpop.permute.xlu0 %2187 }
0x10ff   :  { %4766 = vmatprep.subr.msk.bf16.mxu0 %vm5485_vm2, %v4764_v30  ;;  %v2184_v61 = vpop.permute.xlu1 %2183 }
0x1100   :  { %4769 = vmatpush3.bf16.xpose.msk.msra.mxu0 %vm5485_vm2, %v4764_v30 }
0x1101   :  { %v5110_v36 = vpop.eup %5109  ;;  %4772 = vmatprep.subr.msk.bf16.mxu0 %vm5485_vm2, %v4770_v15 }
0x1102   :  { %v2047_v14 = vmul.f32 %v5110_v36, %v5098_v53  ;;  %v2192_v9 = vpop.permute.xlu0 %2191 }
0x1103   :  { %v2186_v19 = vpop.permute.xlu1 %2185 }
0x1104   :  { %4456 = vmatprep.mubr.msk.f32.mxu0 %vm478_vm3, %v2047_v14 }
0x1105   :  { %4457 = vmatmul.mubr.msk.f32.gmra.mrb[34].mxu0 %vm478_vm3, %v2049_v35 }
0x1106   :  { %4471 = vmatprep.mubr.msk.f32.mxu0 %vm346_vm1, %v2182_v40 }
0x1107   :  { %v2190_v16 = vpop.permute.xlu1 %2189 }
0x1108   :  { %4775 = vmatpush3.bf16.xpose.msk.msra.mxu0 %vm5485_vm2, %v4770_v15 }
0x1109   :  { %4778 = vmatprep.subr.msk.bf16.mxu0 %vm5485_vm2, %v4776_v42 }
0x1110   :  { %4781 = vmatpush3.bf16.xpose.msk.msra.mxu0 %vm5485_vm2, %v4776_v42 }
0x1117   :  { %4472 = vmatmul.mubr.msk.f32.vlgmr.msra.gmra.mrb[36].mxu0 %vm346_vm1, %v2184_v61 }
0x1118   :  { %4474 = vmatprep.mubr.msk.f32.mxu0 %vm346_vm1, %v2186_v19 }
0x111b   :  { %4475 = vmatmul.mubr.msk.f32.gmra.mrb[38].mxu0 %vm346_vm1, %v2188_v46 }
0x111c   :  { %4477 = vmatprep.mubr.msk.f32.mxu0 %vm346_vm1, %v2190_v16 }
0x111f   :  { %4478 = vmatmul.mubr.msk.f32.gmra.mrb[40].mxu0 %vm346_vm1, %v2192_v9 }
0x11c9   :  { %v6047_v44 = vpop.f32.mrb[30].mxu0 }
0x11ca   :  { %v6049_v45 = vpop.f32.mrb[31].mxu0 }
0x11d0   :  { %v6051_v47 = vpop.f32.mrb[32].mxu0 }
0x11d1   :  { %v6053_v39 = vpop.f32.mrb[33].mxu0 }
0x11d8   :  { %v6055_v8 = vpop.f32.mrb[34].mxu0 }
0x11d9   :  { %v6057_v48 = vpop.f32.mrb[35].mxu0 }
0x11ea   :  { %v4473_v49 = vpop.f32.mrb[36].mxu0 }
0x11eb   :  { %v2325_v50 = vmul.f32 0.25, %v4473_v49  ;;  %v2295_v56 = vpop.f32.mrb[37].mxu0 }
0x11ec   :  { %v2324_v26 = vmul.f32 0.25, %v2295_v56 }
0x11ed   :  { %v2331_v21 = vadd.f32 %v5954_v41, %v2325_v50 }
0x11ee   :  { %v2330_v53 = vadd.f32 %v5960_v58, %v2324_v26  ;;  %v4476_v59 = vpop.f32.mrb[38].mxu0 }
0x11ef   :  { %v2305_v60 = vpop.f32.mrb[39].mxu0  ;;  %v2339_v63 = vsel %vm478_vm3, %v2331_v21, -inf  ;;  %v2327_v62 = vmul.f32 0.25, %v4476_v59 }
0x11f0   :  { %v2326_v34 = vmul.f32 0.25, %v2305_v60  ;;  %2340 = vmax.xlane.f32.xlu0 %v2339_v63  ;;  %v2336_v1 = vsel %vm478_vm3, %v2330_v53, -inf }
0x11f1   :  { %2337 = vmax.xlane.f32.xlu1 %v2336_v1  ;;  %v2333_v22 = vadd.f32 %v5968_v43, %v2327_v62 }
0x11f2   :  { %v2332_v4 = vadd.f32 %v5975_v2, %v2326_v34  ;;  %v4479_v5 = vpop.f32.mrb[40].mxu0 }
0x11f3   :  { %v2315_v7 = vpop.f32.mrb[41].mxu0  ;;  %v2329_v3 = vmul.f32 0.25, %v4479_v5  ;;  %v2345_v17 = vsel %vm478_vm3, %v2333_v22, -inf }
0x11f4   :  { %v2328_v41 = vmul.f32 0.25, %v2315_v7  ;;  %v2342_v58 = vsel %vm478_vm3, %v2332_v4, -inf }
0x11f5   :  { %2343 = vmax.xlane.f32.xlu0 %v2342_v58  ;;  %v2335_v25 = vadd.f32 %v5988_v52, %v2329_v3 }
0x11f6   :  { %v2334_v20 = vadd.f32 %v5981_v27, %v2328_v41 }
0x11f7   :  { %v2351_v2 = vsel %vm478_vm3, %v2335_v25, -inf }
0x11f8   :  { %v2348_v24 = vsel %vm478_vm3, %v2334_v20, -inf }
0x11f9   :  { %2346 = vmax.xlane.f32.xlu0 %v2345_v17  ;;  %2349 = vmax.xlane.f32.xlu1 %v2348_v24 }
0x11fd   :  { %2352 = vmax.xlane.f32.xlu0 %v2351_v2 }
0x120a   :  { %4977 = vrot.lane.b32.xlu1 %v5905_v0, %s6519_s7 }
0x127d   :  { %v2341_v43 = vpop.xlane.xlu0 %2340 }
0x127e   :  { %v2355_v10 = vsub.f32 %v2331_v21, %v2341_v43  ;;  %v2338_v28 = vpop.xlane.xlu1 %2337 }
0x127f   :  { %v2354_v13 = vsub.f32 %v2330_v53, %v2338_v28 }
0x1280   :  { %v2362_v29 = vmul.f32 1.442695, %v2355_v10 }
0x1281   :  { %v2360_v27 = vmul.f32 1.442695, %v2354_v13 }
0x1282   :  { %5111 = vpow2.f32 %v2362_v29  ;;  %v2344_v52 = vpop.xlane.xlu0 %2343 }
0x1283   :  { %5113 = vpow2.f32 %v2360_v27  ;;  %v2356_v32 = vsub.f32 %v2332_v4, %v2344_v52 }
0x1285   :  { %v2364_v12 = vmul.f32 1.442695, %v2356_v32 }
0x1286   :  { %v2347_v30 = vpop.xlane.xlu0 %2346  ;;  %v2350_v15 = vpop.xlane.xlu1 %2349 }
0x1287   :  { %5115 = vpow2.f32 %v2364_v12  ;;  %v2357_v31 = vsub.f32 %v2333_v22, %v2347_v30  ;;  %v2358_v33 = vsub.f32 %v2334_v20, %v2350_v15  ;;  %v3969_v12 = vld [vmem:[%s6509_s6 + $0x20] sm:$0xff]  ;;  %v3970_v30 = vld [vmem:[%s6509_s6 + $0x28] sm:$0xff]  ;;  %v3971_v15 = vld [vmem:[%s6509_s6 + $0x30] sm:$0xff] }
0x1289   :  { %v2366_v36 = vmul.f32 1.442695, %v2357_v31  ;;  %v2368_v14 = vmul.f32 1.442695, %v2358_v33  ;;  %v4794_v31 = vpack.c.bf16 %v3970_v30, %v3969_v12  ;;  %v3972_v33 = vld [vmem:[%s6509_s6 + $0x38] sm:$0xff] }
0x128a   :  { %v2353_v37 = vpop.xlane.xlu0 %2352  ;;  %v4978_v0 = vpop.permute.xlu1 %4977 }
0x128b   :  { %5117 = vpow2.f32 %v2366_v36  ;;  %v2359_v38 = vsub.f32 %v2335_v25, %v2353_v37  ;;  %v4980_v35 = vunpack.i.h.bf16 %v4978_v0  ;;  %v4979_v40 = vunpack.i.l.bf16 %v4978_v0 }
0x128c   :  { %v5112_v42 = vpop.eup %5111  ;;  %5119 = vpow2.f32 %v2368_v14  ;;  %v4798_v36 = vpack.c.bf16 %v3972_v33, %v3971_v15 }
0x128d   :  { %v5114_v61 = vpop.eup %5113  ;;  %v2370_v19 = vmul.f32 1.442695, %v2359_v38  ;;  %v4782_v46 = vpack.c.bf16 %v4980_v35, %v4979_v40  ;;  %v2375_v16 = vsel %vm478_vm3, %v5112_v42, 0.0 }
0x128e   :  { %2376 = vadd.xlane.f32.xlu0 %v2375_v16  ;;  %v2372_v9 = vsel %vm478_vm3, %v5114_v61, 0.0 }
0x128f   :  { %5121 = vpow2.f32 %v2370_v19  ;;  %2373 = vadd.xlane.f32.xlu1 %v2372_v9  ;;  %4783 = vmatprep.subr.bf16.mxu1 %v4782_v46 }
0x1290   :  { %4785 = vmatpush3.bf16.msra.mxu1 %v4782_v46 }
0x1291   :  { %v5116_v49 = vpop.eup %5115 }
0x1292   :  { %v2378_v50 = vsel %vm478_vm3, %v5116_v49, 0.0 }
0x1293   :  { %2379 = vadd.xlane.f32.xlu1 %v2378_v50 }
0x1295   :  { %v5118_v56 = vpop.eup %5117 }
0x1296   :  { %v5120_v26 = vpop.eup %5119  ;;  %v2381_v21 = vsel %vm478_vm3, %v5118_v56, 0.0 }
0x1297   :  { %2382 = vadd.xlane.f32.xlu0 %v2381_v21  ;;  %v2384_v53 = vsel %vm478_vm3, %v5120_v26, 0.0 }
0x1298   :  { %2385 = vadd.xlane.f32.xlu1 %v2384_v53 }
0x1299   :  { %v5122_v59 = vpop.eup %5121 }
0x129a   :  { %v2387_v60 = vsel %vm478_vm3, %v5122_v59, 0.0 }
0x129b   :  { %2388 = vadd.xlane.f32.xlu0 %v2387_v60 }
0x12a9   :  { %4987 = vrot.lane.b32.xlu1 %v5925_v11, %s6519_s7 }
0x12b1   :  { %4982 = vrot.lane.b32.xlu0 %v5915_v6, %s6519_s7  ;;  %s6520_s7 = smov 16  }
0x131b   :  { %v2377_v62 = vpop.xlane.xlu0 %2376 }
0x131c   :  { %v2374_v63 = vpop.xlane.xlu1 %2373 }
0x131d   :  { %5123 = vrcp.f32 %v2374_v63 }
0x131e   :  { %5125 = vrcp.f32 %v2377_v62 }
0x1320   :  { %v2380_v34 = vpop.xlane.xlu1 %2379 }
0x1321   :  { %5127 = vrcp.f32 %v2380_v34 }
0x1324   :  { %v2383_v1 = vpop.xlane.xlu0 %2382 }
0x1325   :  { %v2386_v4 = vpop.xlane.xlu1 %2385  ;;  %5129 = vrcp.f32 %v2383_v1 }
0x1326   :  { %5131 = vrcp.f32 %v2386_v4 }
0x1327   :  { %v5124_v5 = vpop.eup %5123 }
0x1328   :  { %v2389_v7 = vpop.xlane.xlu0 %2388  ;;  %v2391_v22 = vmul.f32 %v5124_v5, %v5114_v61  ;;  %v5126_v24 = vpop.eup %5125 }
0x1329   :  { %v4988_v3 = vpop.permute.xlu1 %4987  ;;  %5133 = vrcp.f32 %v2389_v7  ;;  %v2393_v43 = vmul.f32 %v5126_v24, %v5112_v42 }
0x132a   :  { %4492 = vmatprep.mubr.msk.f32.mxu1 %vm478_vm3, %v2391_v22  ;;  %v4990_v58 = vunpack.i.h.bf16 %v4988_v3  ;;  %v4989_v11 = vunpack.i.l.bf16 %v4988_v3 }
0x132b   :  { %v5128_v2 = vpop.eup %5127 }
0x132c   :  { %v4983_v41 = vpop.permute.xlu0 %4982  ;;  %v4790_v17 = vpack.c.bf16 %v4990_v58, %v4989_v11  ;;  %v2395_v28 = vmul.f32 %v5128_v2, %v5116_v49 }
0x132d   :  { %v4985_v20 = vunpack.i.h.bf16 %v4983_v41  ;;  %v4984_v25 = vunpack.i.l.bf16 %v4983_v41 }
0x132f   :  { %v4786_v6 = vpack.c.bf16 %v4985_v20, %v4984_v25  ;;  %v5130_v10 = vpop.eup %5129 }
0x1330   :  { %v5132_v13 = vpop.eup %5131  ;;  %v2397_v29 = vmul.f32 %v5130_v10, %v5118_v56 }
0x1331   :  { %4787 = vmatprep.subr.bf16.mxu1 %v4786_v6  ;;  %v2399_v52 = vmul.f32 %v5132_v13, %v5120_v26  ;;  %v3974_v26 = vld [vmem:[%s6510_s3 + $0x1] ss:$0 sm:$0xff] }
0x1332   :  { %4789 = vmatpush3.bf16.msra.mxu1 %v4786_v6 }
0x1333   :  { %4791 = vmatprep.subr.bf16.mxu1 %v4790_v17  ;;  %v5134_v27 = vpop.eup %5133 }
0x1334   :  { %v2401_v32 = vmul.f32 %v5134_v27, %v5122_v59 }
0x1336   :  { %4793 = vmatpush3.bf16.msra.mxu1 %v4790_v17 }
0x1337   :  { %4795 = vmatprep.subr.bf16.mxu1 %v4794_v31 }
0x1339   :  { %4493 = vmatmul.mubr.msk.f32.vlgmr.msra.gmra.mrb[30].mxu1 %vm478_vm3, %v2393_v43 }
0x133a   :  { %4495 = vmatprep.mubr.msk.f32.mxu1 %vm478_vm3, %v2395_v28  ;;  %4797 = vmatpush3.bf16.msra.mxu1 %v4794_v31 }
0x133b   :  { %4799 = vmatprep.subr.bf16.mxu1 %v4798_v36 }
0x133d   :  { %4496 = vmatmul.mubr.msk.f32.gmra.mrb[32].mxu1 %vm478_vm3, %v2397_v29 }
0x133e   :  { %4498 = vmatprep.mubr.msk.f32.mxu1 %vm478_vm3, %v2399_v52  ;;  %4801 = vmatpush3.bf16.msra.mxu1 %v4798_v36 }
0x1341   :  { %4499 = vmatmul.mubr.msk.f32.gmra.mrb[34].mxu1 %vm478_vm3, %v2401_v32 }
0x140c   :  { %v4494_v14 = vpop.f32.mrb[30].mxu1 }
0x140d   :  { %v2504_v37 = vpop.f32.mrb[31].mxu1 }
0x140e   :  { %2539 = vrot.lane.b32.xlu1 %v2504_v37, %s6520_s7 }
0x1410   :  { %v4497_v0 = vpop.f32.mrb[32].mxu1 }
0x1411   :  { %v2514_v38 = vpop.f32.mrb[33].mxu1 }
0x1412   :  { %2541 = vrot.lane.b32.xlu1 %v4494_v14, %s6520_s7  ;;  %2543 = vrot.lane.b32.xlu0 %v2514_v38, %s6520_s7 }
0x1414   :  { %v4500_v35 = vpop.f32.mrb[34].mxu1 }
0x1415   :  { %v2524_v40 = vpop.f32.mrb[35].mxu1 }
0x1416   :  { %2545 = vrot.lane.b32.xlu1 %v4497_v0, %s6520_s7  ;;  %2547 = vrot.lane.b32.xlu0 %v2524_v40, %s6520_s7 }
0x141a   :  { %2549 = vrot.lane.b32.xlu1 %v4500_v35, %s6520_s7  ;;  %s6522_s7 = sld [smem:[#allocation15_spill]] }
0x1480   :  { %v2540_v42 = vpop.permute.xlu1 %2539 }
0x1481   :  { %v2557_v61 = vsel %vm346_vm1, %v6049_v45, %v2540_v42 }
0x1482   :  { %4509 = vmatprep.mubr.msk.f32.mxu1 %vm94_vm0, %v2557_v61 }
0x1484   :  { %v2542_v19 = vpop.permute.xlu1 %2541  ;;  %v2544_v46 = vpop.permute.xlu0 %2543 }
0x1485   :  { %v2558_v16 = vsel %vm346_vm1, %v6047_v44, %v2542_v19  ;;  %v2559_v9 = vsel %vm346_vm1, %v6053_v39, %v2544_v46  ;;  %v3985_v46 = vld [vmem:[%s6511_s4 + $0x20] sm:$0xff] }
0x1486   :  { %4510 = vmatmul.mubr.msk.f32.vlgmr.msra.gmra.mrb[36].mxu1 %vm94_vm0, %v2558_v16  ;;  %v3986_v16 = vld [vmem:[%s6511_s4 + $0x28] sm:$0xff] }
0x1487   :  { %4512 = vmatprep.mubr.msk.f32.mxu1 %vm94_vm0, %v2559_v9  ;;  %v4802_v9 = vpack.c.bf16 %v3986_v16, %v3985_v46 }
0x1488   :  { %v2546_v49 = vpop.permute.xlu1 %2545  ;;  %v2548_v50 = vpop.permute.xlu0 %2547 }
0x1489   :  { %v2560_v56 = vsel %vm346_vm1, %v6051_v47, %v2546_v49  ;;  %v2561_v45 = vsel %vm346_vm1, %v6057_v48, %v2548_v50  ;;  %4803 = vmatprep.subr.bf16.mxu0 %v4802_v9  ;;  %v3987_v49 = vld [vmem:[%s6511_s4 + $0x30] sm:$0xff]  ;;  %v3988_v50 = vld [vmem:[%s6511_s4 + $0x38] sm:$0xff] }
0x148a   :  { %4513 = vmatmul.mubr.msk.f32.gmra.mrb[38].mxu1 %vm94_vm0, %v2560_v56  ;;  %4805 = vmatpush3.bf16.msra.mxu0 %v4802_v9  ;;  %v4806_v56 = vpack.c.bf16 %v3988_v50, %v3987_v49 }
0x148b   :  { %4515 = vmatprep.mubr.msk.f32.mxu1 %vm94_vm0, %v2561_v45 }
0x148c   :  { %v2550_v44 = vpop.permute.xlu1 %2549  ;;  %4807 = vmatprep.subr.bf16.mxu0 %v4806_v56 }
0x148d   :  { %v2562_v39 = vsel %vm346_vm1, %v6055_v8, %v2550_v44 }
0x148e   :  { %4516 = vmatmul.mubr.msk.f32.gmra.mrb[40].mxu1 %vm94_vm0, %v2562_v39  ;;  %4809 = vmatpush3.bf16.msra.mxu0 %v4806_v56 }
0x1559   :  { %v4511_v21 = vpop.f32.mrb[36].mxu1 }
0x155a   :  { %v2666_v53 = vadd.f32 %v4511_v21, %v3974_v26  ;;  %v2660_v47 = vpop.f32.mrb[37].mxu1 }
0x155b   :  { %v2661_v59 = vadd.f32 %v3974_v26, %v2660_v47 }
0x155c   :  { %v2690_v48 = vadd.f32 %v2666_v53, %v5868_v23 }
0x155d   :  { %v2689_v60 = vadd.f32 %v2661_v59, %v5866_v51  ;;  %v4514_v63 = vpop.f32.mrb[38].mxu1 }
0x155e   :  { %v2676_v62 = vadd.f32 %v4514_v63, %v3974_v26  ;;  %v2670_v34 = vpop.f32.mrb[39].mxu1  ;;  %v2702_v1 = vsel %vm94_vm0, %v2690_v48, 0.0 }
0x155f   :  { %v2671_v8 = vadd.f32 %v3974_v26, %v2670_v34  ;;  %2703 = vadd.xlane.f32.xlu1 %v2702_v1  ;;  %v2699_v4 = vsel %vm94_vm0, %v2689_v60, 0.0 }
0x1560   :  { %v2692_v5 = vadd.f32 %v2676_v62, %v5878_v18  ;;  %2700 = vadd.xlane.f32.xlu0 %v2699_v4 }
0x1561   :  { %v4517_v7 = vpop.f32.mrb[40].mxu1  ;;  %v2691_v23 = vadd.f32 %v2671_v8, %v5876_v55 }
0x1562   :  { %v2686_v22 = vadd.f32 %v4517_v7, %v3974_v26  ;;  %v2680_v3 = vpop.f32.mrb[41].mxu1  ;;  %v2708_v41 = vsel %vm94_vm0, %v2692_v5, 0.0 }
0x1563   :  { %v2681_v51 = vadd.f32 %v3974_v26, %v2680_v3  ;;  %v2705_v25 = vsel %vm94_vm0, %v2691_v23, 0.0 }
0x1564   :  { %v2694_v58 = vadd.f32 %v2686_v22, %v5888_v57  ;;  %2709 = vadd.xlane.f32.xlu0 %v2708_v41  ;;  %v3983_v22 = vld [vmem:[%s6512_s29 + $0x1] ss:$0 sm:$0xff] }
0x1565   :  { %v2693_v20 = vadd.f32 %v2681_v51, %v5886_v54 }
0x1566   :  { %v2714_v11 = vsel %vm94_vm0, %v2694_v58, 0.0 }
0x1567   :  { %2715 = vadd.xlane.f32.xlu1 %v2714_v11  ;;  %v2711_v18 = vsel %vm94_vm0, %v2693_v20, 0.0 }
0x1568   :  { %2706 = vadd.xlane.f32.xlu0 %v2705_v25 }
0x156c   :  { %2712 = vadd.xlane.f32.xlu0 %v2711_v18 }
0x15ec   :  { %v2704_v6 = vpop.xlane.xlu1 %2703 }
0x15ed   :  { %v2718_v17 = vmul.f32 0.03125, %v2704_v6  ;;  %v2701_v24 = vpop.xlane.xlu0 %2700 }
0x15ee   :  { %v2717_v2 = vmul.f32 0.03125, %v2701_v24 }
0x15ef   :  { %v6140_v55 = vsub.f32 %v2690_v48, %v2718_v17 }
0x15f0   :  { %v6142_v43 = vsub.f32 %v2689_v60, %v2717_v2 }
0x15f1   :  { %v2710_v57 = vpop.xlane.xlu0 %2709  ;;  %v2730_v10 = vmul.f32 %v6140_v55, %v6140_v55 }
0x15f2   :  { %v2720_v54 = vmul.f32 0.03125, %v2710_v57  ;;  %v2729_v28 = vmul.f32 %v6142_v43, %v6142_v43 }
0x15f3   :  { %v2738_v13 = vsel %vm94_vm0, %v2730_v10, 0.0 }
0x15f4   :  { %v6149_v29 = vsub.f32 %v2692_v5, %v2720_v54  ;;  %2739 = vadd.xlane.f32.xlu1 %v2738_v13  ;;  %v2716_v27 = vpop.xlane.xlu1 %2715  ;;  %v2735_v52 = vsel %vm94_vm0, %v2729_v28, 0.0 }
0x15f5   :  { %v2722_v32 = vmul.f32 0.03125, %v2716_v27  ;;  %2736 = vadd.xlane.f32.xlu0 %v2735_v52  ;;  %v2707_v12 = vpop.xlane.xlu0 %2706 }
0x15f6   :  { %v2719_v30 = vmul.f32 0.03125, %v2707_v12  ;;  %v2732_v15 = vmul.f32 %v6149_v29, %v6149_v29 }
0x15f7   :  { %v6154_v31 = vsub.f32 %v2694_v58, %v2722_v32  ;;  %v3984_v58 = vld [vmem:[%s6513_s30 + $0x1] ss:$0 sm:$0xff] }
0x15f8   :  { %v6156_v33 = vsub.f32 %v2691_v23, %v2719_v30  ;;  %v2744_v36 = vsel %vm94_vm0, %v2732_v15, 0.0  ;;  %v3997_v30 = vld [vmem:[%s6514_s8 + $0x40] sm:$0xff]  ;;  %v3998_v15 = vld [vmem:[%s6514_s8 + $0x48] sm:$0xff] }
0x15f9   :  { %2745 = vadd.xlane.f32.xlu1 %v2744_v36  ;;  %v2713_v14 = vpop.xlane.xlu0 %2712  ;;  %v2734_v37 = vmul.f32 %v6154_v31, %v6154_v31  ;;  %v4000_v36 = vld [vmem:[%s6514_s8 + $0x58] sm:$0xff] }
0x15fa   :  { %v2721_v0 = vmul.f32 0.03125, %v2713_v14  ;;  %v2731_v38 = vmul.f32 %v6156_v33, %v6156_v33 }
0x15fb   :  { %v2750_v35 = vsel %vm94_vm0, %v2734_v37, 0.0  ;;  %v4001_v37 = vld [vmem:[%s6514_s8 + $0x60] sm:$0xff] }
0x15fc   :  { %v2727_v40 = vsub.f32 %v2693_v20, %v2721_v0  ;;  %v2741_v42 = vsel %vm94_vm0, %v2731_v38, 0.0  ;;  %v4002_v0 = vld [vmem:[%s6514_s8 + $0x68] sm:$0xff] }
0x15fd   :  { %2751 = vadd.xlane.f32.xlu1 %v2750_v35  ;;  %2742 = vadd.xlane.f32.xlu0 %v2741_v42  ;;  %v4818_v38 = vpack.c.bf16 %v4002_v0, %v4001_v37  ;;  %v4003_v35 = vld [vmem:[%s6514_s8 + $0x70] sm:$0xff] }
0x15fe   :  { %v2733_v61 = vmul.f32 %v2727_v40, %v2727_v40 }
0x1600   :  { %v2747_v19 = vsel %vm94_vm0, %v2733_v61, 0.0  ;;  %v3990_v61 = vld [vmem:[%s6449_s11 + $0x1] ss:$0 sm:$0xff] }
0x1601   :  { %2748 = vadd.xlane.f32.xlu0 %v2747_v19 }
0x1681   :  { %v2740_v45 = vpop.xlane.xlu1 %2739 }
0x1682   :  { %v2754_v44 = vmul.f32 0.03125, %v2740_v45  ;;  %v2737_v39 = vpop.xlane.xlu0 %2736 }
0x1683   :  { %v2753_v26 = vmul.f32 0.03125, %v2737_v39 }
0x1684   :  { %v2760_v21 = vadd.f32 1e-12, %v2754_v44 }
0x1685   :  { %v2759_v53 = vadd.f32 1e-12, %v2753_v26 }
0x1686   :  { %5135 = vrsqrt.f32 %v2760_v21  ;;  %v2746_v47 = vpop.xlane.xlu1 %2745 }
0x1687   :  { %5137 = vrsqrt.f32 %v2759_v53  ;;  %v2756_v59 = vmul.f32 0.03125, %v2746_v47 }
0x1689   :  { %v2762_v48 = vadd.f32 1e-12, %v2756_v59 }
0x168a   :  { %v2752_v60 = vpop.xlane.xlu1 %2751  ;;  %v2743_v63 = vpop.xlane.xlu0 %2742 }
0x168b   :  { %5139 = vrsqrt.f32 %v2762_v48  ;;  %v2758_v62 = vmul.f32 0.03125, %v2752_v60  ;;  %v2755_v34 = vmul.f32 0.03125, %v2743_v63 }
0x168d   :  { %v2764_v1 = vadd.f32 1e-12, %v2758_v62  ;;  %v2761_v8 = vadd.f32 1e-12, %v2755_v34 }
0x168e   :  { %v2749_v4 = vpop.xlane.xlu0 %2748 }
0x168f   :  { %5141 = vrsqrt.f32 %v2764_v1  ;;  %v2757_v5 = vmul.f32 0.03125, %v2749_v4 }
0x1690   :  { %v5136_v7 = vpop.eup %5135  ;;  %5143 = vrsqrt.f32 %v2761_v8 }
0x1691   :  { %v5138_v3 = vpop.eup %5137  ;;  %v2772_v41 = vmul.f32 %v5136_v7, %v6140_v55  ;;  %v2763_v23 = vadd.f32 1e-12, %v2757_v5 }
0x1692   :  { %v2771_v51 = vmul.f32 %v5138_v3, %v6142_v43 }
0x1693   :  { %v2784_v11 = vmul.f32 %v3983_v22, %v2772_v41  ;;  %5145 = vrsqrt.f32 %v2763_v23 }
0x1694   :  { %v2783_v20 = vmul.f32 %v3983_v22, %v2771_v51 }
0x1695   :  { %v5140_v25 = vpop.eup %5139  ;;  %v6188_v6 = vadd.f32 %v3984_v58, %v2784_v11 }
0x1696   :  { %v6186_v18 = vadd.f32 %v3984_v58, %v2783_v20  ;;  %v2774_v17 = vmul.f32 %v5140_v25, %v6149_v29 }
0x1698   :  { %4526 = vmatprep.mubr.msk.f32.mxu0 %vm94_vm0, %v6186_v18  ;;  %v2786_v43 = vmul.f32 %v3983_v22, %v2774_v17 }
0x1699   :  { %v5142_v24 = vpop.eup %5141  ;;  %4527 = vmatmul.mubr.msk.f32.vlgmr.msra.gmra.mrb[42].mxu0 %vm94_vm0, %v6188_v6 }
0x169a   :  { %v5144_v2 = vpop.eup %5143  ;;  %v2776_v57 = vmul.f32 %v5142_v24, %v6154_v31  ;;  %v6199_v27 = vadd.f32 %v3984_v58, %v2786_v43  ;;  %v4810_v31 = vpack.c.bf16 %v3998_v15, %v3997_v30 }
0x169b   :  { %v2773_v55 = vmul.f32 %v5144_v2, %v6156_v33  ;;  %v3999_v33 = vld [vmem:[%s6514_s8 + $0x50] sm:$0xff] }
0x169c   :  { %v2788_v32 = vmul.f32 %v3983_v22, %v2776_v57  ;;  %4811 = vmatprep.subr.bf16.mxu1 %v4810_v31  ;;  %v4814_v14 = vpack.c.bf16 %v4000_v36, %v3999_v33 }
0x169d   :  { %v5146_v10 = vpop.eup %5145  ;;  %v2785_v54 = vmul.f32 %v3983_v22, %v2773_v55  ;;  %4813 = vmatpush3.bf16.msra.mxu1 %v4810_v31 }
0x169e   :  { %v2775_v28 = vmul.f32 %v5146_v10, %v2727_v40  ;;  %v6209_v12 = vadd.f32 %v3984_v58, %v2788_v32  ;;  %4815 = vmatprep.subr.bf16.mxu1 %v4814_v14  ;;  %v4004_v40 = vld [vmem:[%s6514_s8 + $0x78] sm:$0xff] }
0x169f   :  { %v6197_v13 = vadd.f32 %v3984_v58, %v2785_v54  ;;  %v4822_v42 = vpack.c.bf16 %v4004_v40, %v4003_v35 }
0x16a0   :  { %v2787_v52 = vmul.f32 %v3983_v22, %v2775_v28 }
0x16a1   :  { %4529 = vmatprep.mubr.msk.f32.mxu0 %vm94_vm0, %v6197_v13  ;;  %4817 = vmatpush3.bf16.msra.mxu1 %v4814_v14 }
0x16a2   :  { %4530 = vmatmul.mubr.msk.f32.gmra.mrb[44].mxu0 %vm94_vm0, %v6199_v27  ;;  %v6205_v29 = vadd.f32 %v3984_v58, %v2787_v52  ;;  %4819 = vmatprep.subr.bf16.mxu1 %v4818_v38 }
0x16a4   :  { %4532 = vmatprep.mubr.msk.f32.mxu0 %vm94_vm0, %v6205_v29 }
0x16a5   :  { %4821 = vmatpush3.bf16.msra.mxu1 %v4818_v38 }
0x16a6   :  { %4533 = vmatmul.mubr.msk.f32.gmra.mrb[46].mxu0 %vm94_vm0, %v6209_v12  ;;  %4823 = vmatprep.subr.bf16.mxu1 %v4822_v42 }
0x16a9   :  { %4825 = vmatpush3.bf16.msra.mxu1 %v4822_v42 }
0x176c   :  { %v4528_v19 = vpop.f32.mrb[42].mxu0 }
0x176d   :  { %v2904_v46 = vadd.f32 %v4528_v19, %v3990_v61  ;;  %v2898_v16 = vpop.f32.mrb[43].mxu0 }
0x176e   :  { %v2899_v9 = vadd.f32 %v3990_v61, %v2898_v16 }
0x176f   :  { %v2928_v49 = vmul.f32 %v2904_v46, %v2904_v46 }
0x1770   :  { %v2927_v50 = vmul.f32 %v2899_v9, %v2899_v9 }
0x1771   :  { %v2934_v56 = vmul.f32 %v2928_v49, %v2904_v46 }
0x1772   :  { %v2933_v45 = vmul.f32 %v2927_v50, %v2899_v9 }
0x1773   :  { %v2940_v44 = vmul.f32 0.044715, %v2934_v56 }
0x1774   :  { %v2939_v39 = vmul.f32 0.044715, %v2933_v45 }
0x1775   :  { %v2946_v26 = vadd.f32 %v2940_v44, %v2904_v46  ;;  %v4531_v21 = vpop.f32.mrb[44].mxu0  ;;  %v4006_v44 = vld [vmem:[%s6450_s13 + $0x1] ss:$0 sm:$0xff] }
0x1776   :  { %v2945_v53 = vadd.f32 %v2939_v39, %v2899_v9  ;;  %v2914_v47 = vadd.f32 %v4531_v21, %v3990_v61  ;;  %v2908_v59 = vpop.f32.mrb[45].mxu0 }
0x1777   :  { %v2952_v48 = vmul.f32 0.7978846, %v2946_v26  ;;  %v2909_v60 = vadd.f32 %v3990_v61, %v2908_v59 }
0x1778   :  { %v2951_v63 = vmul.f32 0.7978846, %v2945_v53  ;;  %v2930_v62 = vmul.f32 %v2914_v47, %v2914_v47 }
0x1779   :  { %5147 = vtanh.f32 %v2952_v48  ;;  %v2929_v34 = vmul.f32 %v2909_v60, %v2909_v60  ;;  %v4534_v1 = vpop.f32.mrb[46].mxu0 }
0x177a   :  { %5149 = vtanh.f32 %v2951_v63  ;;  %v2936_v8 = vmul.f32 %v2930_v62, %v2914_v47  ;;  %v2924_v4 = vadd.f32 %v4534_v1, %v3990_v61  ;;  %v2918_v5 = vpop.f32.mrb[47].mxu0 }
0x177b   :  { %v2935_v7 = vmul.f32 %v2929_v34, %v2909_v60  ;;  %v2919_v22 = vadd.f32 %v3990_v61, %v2918_v5 }
0x177c   :  { %v2942_v3 = vmul.f32 0.044715, %v2936_v8  ;;  %v2932_v41 = vmul.f32 %v2924_v4, %v2924_v4 }
0x177d   :  { %v2941_v23 = vmul.f32 0.044715, %v2935_v7  ;;  %v2931_v51 = vmul.f32 %v2919_v22, %v2919_v22 }
0x177e   :  { %v2948_v58 = vadd.f32 %v2942_v3, %v2914_v47  ;;  %v2938_v11 = vmul.f32 %v2932_v41, %v2924_v4 }
0x177f   :  { %v2947_v20 = vadd.f32 %v2941_v23, %v2909_v60  ;;  %v2937_v25 = vmul.f32 %v2931_v51, %v2919_v22 }
0x1780   :  { %v2954_v17 = vmul.f32 0.7978846, %v2948_v58  ;;  %v2944_v24 = vmul.f32 0.044715, %v2938_v11 }
0x1781   :  { %v2953_v2 = vmul.f32 0.7978846, %v2947_v20  ;;  %v2943_v55 = vmul.f32 0.044715, %v2937_v25 }
0x1782   :  { %5151 = vtanh.f32 %v2954_v17  ;;  %v2950_v43 = vadd.f32 %v2944_v24, %v2924_v4 }
0x1783   :  { %v5148_v57 = vpop.eup %5147  ;;  %5153 = vtanh.f32 %v2953_v2  ;;  %v2949_v10 = vadd.f32 %v2943_v55, %v2919_v22 }
0x1784   :  { %v5150_v54 = vpop.eup %5149  ;;  %v2964_v28 = vadd.f32 1.0, %v5148_v57  ;;  %v2956_v52 = vmul.f32 0.7978846, %v2950_v43 }
0x1785   :  { %v2955_v32 = vmul.f32 0.7978846, %v2949_v10  ;;  %v2963_v30 = vadd.f32 1.0, %v5150_v54 }
0x1786   :  { %v2970_v15 = vmul.f32 0.5, %v2964_v28  ;;  %5155 = vtanh.f32 %v2956_v52 }
0x1787   :  { %5157 = vtanh.f32 %v2955_v32  ;;  %v2969_v31 = vmul.f32 0.5, %v2963_v30 }
0x1788   :  { %v2976_v36 = vmul.f32 %v2970_v15, %v2904_v46 }
0x1789   :  { %v2975_v33 = vmul.f32 %v2969_v31, %v2899_v9 }
0x178b   :  { %4551 = vmatprep.mubr.msk.f32.mxu1 %vm1485_vm4, %v2975_v33 }
0x178c   :  { %v5152_v14 = vpop.eup %5151  ;;  %4552 = vmatmul.mubr.msk.f32.vlgmr.msra.gmra.mrb[42].mxu1 %vm1485_vm4, %v2976_v36 }
0x178d   :  { %v5154_v37 = vpop.eup %5153  ;;  %v2966_v0 = vadd.f32 1.0, %v5152_v14 }
0x178e   :  { %v2965_v38 = vadd.f32 1.0, %v5154_v37 }
0x178f   :  { %v2972_v35 = vmul.f32 0.5, %v2966_v0 }
0x1790   :  { %v5156_v40 = vpop.eup %5155  ;;  %v2971_v42 = vmul.f32 0.5, %v2965_v38 }
0x1791   :  { %v5158_v61 = vpop.eup %5157  ;;  %v2968_v19 = vadd.f32 1.0, %v5156_v40  ;;  %v2978_v50 = vmul.f32 %v2972_v35, %v2914_v47 }
0x1792   :  { %v2977_v16 = vmul.f32 %v2971_v42, %v2909_v60  ;;  %v2967_v49 = vadd.f32 1.0, %v5158_v61  ;;  %v3248_v61 = vld [vmem:[%s6453_s16] sm:$0xff] }
0x1793   :  { %v2974_v56 = vmul.f32 0.5, %v2968_v19  ;;  %v3249_v19 = vld [vmem:[%s6453_s16 + $0x8] sm:$0xff] }
0x1794   :  { %4554 = vmatprep.mubr.msk.f32.mxu1 %vm1485_vm4, %v2977_v16  ;;  %v2973_v46 = vmul.f32 0.5, %v2967_v49  ;;  %v4827_v16 = vpack.c.bf16 %v3249_v19, %v3248_v61  ;;  %v5203_v49 = vmov 0.0|0.0  }
0x1795   :  { %4555 = vmatmul.mubr.msk.f32.gmra.mrb[44].mxu1 %vm1485_vm4, %v2978_v50  ;;  %v2980_v45 = vmul.f32 %v2974_v56, %v2924_v4  ;;  %4826 = vmatprep.subr.bf16.mxu0 %v5203_v49  ;;  %v3250_v50 = vld [vmem:[%s6453_s16 + $0x10] sm:$0xff]  ;;  %v3251_v56 = vld [vmem:[%s6453_s16 + $0x18] sm:$0xff] }
0x1796   :  { %v2979_v9 = vmul.f32 %v2973_v46, %v2919_v22  ;;  %4838 = vmatprep.subr.bf16.mxu1 %v5203_v49  ;;  %4828 = vmatpush3.bf16.msra.mxu0 %v4827_v16  ;;  %v4830_v46 = vpack.c.bf16 %v3251_v56, %v3250_v50  ;;  %v3344_v56 = vld [vmem:[%s6455_s18] sm:$0xff] }
0x1797   :  { %4829 = vmatprep.subr.bf16.mxu0 %v5203_v49 }
0x1798   :  { %4557 = vmatprep.mubr.msk.f32.mxu1 %vm1485_vm4, %v2979_v9  ;;  %v5205_v9 = vmov 0.0  }
0x1799   :  { %4558 = vmatmul.mubr.msk.f32.gmra.mrb[46].mxu1 %vm1485_vm4, %v2980_v45  ;;  %4568 = vmatprep.mubr.msk.f32.mxu0 %vm5204_vm5, %v5205_v9  ;;  %v3428_v45 = vld [vmem:[%s6454_s20] sm:$0xff] }
0x179a   :  { %4590 = vmatprep.mubr.msk.f32.mxu1 %vm5204_vm5, %v5205_v9  ;;  %4831 = vmatpush3.bf16.msra.mxu0 %v4830_v46  ;;  %v3345_v46 = vld [vmem:[%s6455_s18 + $0x8] sm:$0xff] }
0x179b   :  { %4832 = vmatprep.subr.bf16.mxu0 %v5203_v49 }
0x185f   :  { %v4553_v39 = vpop.f32.mrb[42].mxu1 }
0x1860   :  { %v3088_v26 = vadd.f32 %v4553_v39, %v4006_v44  ;;  %v3082_v21 = vpop.f32.mrb[43].mxu1  ;;  %v3430_v39 = vld [vmem:[%s6454_s20 + $0x10] sm:$0xff] }
0x1861   :  { %v3083_v53 = vadd.f32 %v4006_v44, %v3082_v21  ;;  %v3431_v21 = vld [vmem:[%s6454_s20 + $0x18] sm:$0xff] }
0x1862   :  { %v3112_v47 = vadd.f32 %v3088_v26, %v6188_v6 }
0x1863   :  { %v3111_v59 = vadd.f32 %v3083_v53, %v6186_v18  ;;  %v6326_v53 = vpack.c.bf16 %v3431_v21, %v3430_v39  ;;  %v3347_v39 = vld [vmem:[%s6455_s18 + $0x18] sm:$0xff] }
0x1864   :  { %v3124_v48 = vsel %vm94_vm0, %v3112_v47, 0.0 }
0x1865   :  { %3125 = vadd.xlane.f32.xlu0 %v3124_v48  ;;  %v3121_v63 = vsel %vm94_vm0, %v3111_v59, 0.0 }
0x1868   :  { %v4556_v60 = vpop.f32.mrb[44].mxu1 }
0x1869   :  { %v3098_v62 = vadd.f32 %v4556_v60, %v4006_v44  ;;  %v3092_v34 = vpop.f32.mrb[45].mxu1  ;;  %3122 = vadd.xlane.f32.xlu0 %v3121_v63 }
0x186a   :  { %v3093_v1 = vadd.f32 %v4006_v44, %v3092_v34 }
0x186b   :  { %v3114_v8 = vadd.f32 %v3098_v62, %v6199_v27 }
0x186c   :  { %v4559_v4 = vpop.f32.mrb[46].mxu1  ;;  %v3113_v5 = vadd.f32 %v3093_v1, %v6197_v13 }
0x186d   :  { %v3108_v7 = vadd.f32 %v4559_v4, %v4006_v44  ;;  %v3102_v22 = vpop.f32.mrb[47].mxu1  ;;  %v3130_v6 = vsel %vm94_vm0, %v3114_v8, 0.0 }
0x186e   :  { %v3103_v18 = vadd.f32 %v4006_v44, %v3102_v22  ;;  %3131 = vadd.xlane.f32.xlu1 %v3130_v6  ;;  %v3127_v23 = vsel %vm94_vm0, %v3113_v5, 0.0  ;;  %v3429_v44 = vld [vmem:[%s6454_s20 + $0x8] sm:$0xff] }
0x186f   :  { %v3116_v41 = vadd.f32 %v3108_v7, %v6209_v12  ;;  %v6320_v26 = vpack.c.bf16 %v3429_v44, %v3428_v45  ;;  %v3346_v45 = vld [vmem:[%s6455_s18 + $0x10] sm:$0xff]  ;;  %v4833_v44 = vpack.c.bf16 %v3345_v46, %v3344_v56 }
0x1870   :  { %v3115_v3 = vadd.f32 %v3103_v18, %v6205_v29  ;;  %v4836_v21 = vpack.c.bf16 %v3347_v39, %v3346_v45 }
0x1871   :  { %v3136_v27 = vsel %vm94_vm0, %v3116_v41, 0.0  ;;  %4840 = vmatpush3.bf16.msra.mxu1 %v6320_v26 }
0x1872   :  { %3128 = vadd.xlane.f32.xlu1 %v3127_v23  ;;  %v3133_v51 = vsel %vm94_vm0, %v3115_v3, 0.0  ;;  %4841 = vmatprep.subr.bf16.mxu1 %v5203_v49 }
0x1873   :  { %3134 = vadd.xlane.f32.xlu0 %v3133_v51 }
0x1875   :  { %4843 = vmatpush3.bf16.msra.mxu1 %v6326_v53 }
0x1876   :  { %3137 = vadd.xlane.f32.xlu1 %v3136_v27  ;;  %4850 = vmatprep.subr.bf16.mxu1 %v5203_v49 }
0x1878   :  { %4591 = vmatmul.mubr.f32.vlgmr.msra.gmra.mrb[48].mxu1 %v5205_v9 }
0x1879   :  { %4612 = vmatprep.mubr.msk.f32.mxu1 %vm5204_vm5, %v5205_v9 }
0x18f2   :  { %v3126_v13 = vpop.xlane.xlu0 %3125 }
0x18f3   :  { %v3140_v58 = vmul.f32 0.03125, %v3126_v13 }
0x18f5   :  { %v6261_v11 = vsub.f32 %v3112_v47, %v3140_v58  ;;  %v4015_v58 = vld [vmem:[%s6451_s14 + $0x1] ss:$0 sm:$0xff] }
0x18f6   :  { %v3123_v20 = vpop.xlane.xlu0 %3122 }
0x18f7   :  { %v3139_v25 = vmul.f32 0.03125, %v3123_v20  ;;  %v3152_v29 = vmul.f32 %v6261_v11, %v6261_v11 }
0x18f9   :  { %v6265_v17 = vsub.f32 %v3111_v59, %v3139_v25  ;;  %v3160_v12 = vsel %vm94_vm0, %v3152_v29, 0.0 }
0x18fa   :  { %3161 = vadd.xlane.f32.xlu0 %v3160_v12 }
0x18fb   :  { %v3132_v24 = vpop.xlane.xlu1 %3131  ;;  %v3151_v2 = vmul.f32 %v6265_v17, %v6265_v17 }
0x18fc   :  { %v3142_v55 = vmul.f32 0.03125, %v3132_v24  ;;  %v4016_v24 = vld [vmem:[%s6452_s15 + $0x1] ss:$0 sm:$0xff] }
0x18fd   :  { %v3157_v43 = vsel %vm94_vm0, %v3151_v2, 0.0 }
0x18fe   :  { %v6271_v57 = vsub.f32 %v3114_v8, %v3142_v55  ;;  %3158 = vadd.xlane.f32.xlu0 %v3157_v43 }
0x18ff   :  { %v3129_v10 = vpop.xlane.xlu1 %3128 }
0x1900   :  { %v3141_v54 = vmul.f32 0.03125, %v3129_v10  ;;  %v3135_v28 = vpop.xlane.xlu0 %3134  ;;  %v3154_v52 = vmul.f32 %v6271_v57, %v6271_v57 }
0x1901   :  { %v3143_v32 = vmul.f32 0.03125, %v3135_v28 }
0x1902   :  { %v6275_v30 = vsub.f32 %v3113_v5, %v3141_v54  ;;  %v3166_v15 = vsel %vm94_vm0, %v3154_v52, 0.0 }
0x1903   :  { %v6278_v31 = vsub.f32 %v3115_v3, %v3143_v32  ;;  %3167 = vadd.xlane.f32.xlu1 %v3166_v15  ;;  %v3138_v33 = vpop.xlane.xlu1 %3137 }
0x1904   :  { %v3144_v36 = vmul.f32 0.03125, %v3138_v33  ;;  %v3153_v14 = vmul.f32 %v6275_v30, %v6275_v30 }
0x1905   :  { %v3155_v37 = vmul.f32 %v6278_v31, %v6278_v31 }
0x1906   :  { %v6284_v0 = vsub.f32 %v3116_v41, %v3144_v36  ;;  %v3163_v38 = vsel %vm94_vm0, %v3153_v14, 0.0 }
0x1907   :  { %3164 = vadd.xlane.f32.xlu1 %v3163_v38  ;;  %v3169_v35 = vsel %vm94_vm0, %v3155_v37, 0.0 }
0x1908   :  { %3170 = vadd.xlane.f32.xlu0 %v3169_v35  ;;  %v3156_v40 = vmul.f32 %v6284_v0, %v6284_v0 }
0x190a   :  { %v3172_v42 = vsel %vm94_vm0, %v3156_v40, 0.0 }
0x190b   :  { %3173 = vadd.xlane.f32.xlu1 %v3172_v42 }
0x1987   :  { %v3162_v47 = vpop.xlane.xlu0 %3161 }
0x1988   :  { %v3176_v59 = vmul.f32 0.03125, %v3162_v47  ;;  %v3502_v47 = vpop.f32.mrb[48].mxu1 }
0x198a   :  { %v3182_v60 = vadd.f32 1e-12, %v3176_v59  ;;  %v3432_v59 = vld [vmem:[%s6456_s21] sm:$0x1] }
0x198b   :  { %v3159_v48 = vpop.xlane.xlu0 %3158 }
0x198c   :  { %v3175_v63 = vmul.f32 0.03125, %v3159_v48  ;;  %5159 = vrsqrt.f32 %v3182_v60  ;;  %v4592_v48 = vpop.f32.mrb[49].mxu1  ;;  %v3503_v60 = vadd.f32 %v3502_v47, %v3432_v59 }
0x198d   :  { %v4022_v48 = vld [vmem:[%s6460_s23] ss:$0 sm:$0xff] }
0x198e   :  { %v3181_v62 = vadd.f32 1e-12, %v3175_v63  ;;  %3514 = vrot.lane.b32.xlu0 %v3503_v60, %s6516_s10  ;;  %v4017_v63 = vld [vmem:[%s6457_s17] ss:$0 sm:$0xff] }
0x1990   :  { %v3168_v34 = vpop.xlane.xlu1 %3167  ;;  %5161 = vrsqrt.f32 %v3181_v62 }
0x1991   :  { %v3178_v1 = vmul.f32 0.03125, %v3168_v34 }
0x1993   :  { %v3184_v8 = vadd.f32 1e-12, %v3178_v1 }
0x1994   :  { %v3165_v4 = vpop.xlane.xlu1 %3164 }
0x1995   :  { %5163 = vrsqrt.f32 %v3184_v8  ;;  %v3177_v5 = vmul.f32 0.03125, %v3165_v4  ;;  %v3171_v7 = vpop.xlane.xlu0 %3170 }
0x1996   :  { %v3179_v22 = vmul.f32 0.03125, %v3171_v7  ;;  %v5160_v23 = vpop.eup %5159 }
0x1997   :  { %v3183_v6 = vadd.f32 1e-12, %v3177_v5  ;;  %v3194_v13 = vmul.f32 %v5160_v23, %v6261_v11 }
0x1998   :  { %v3185_v18 = vadd.f32 1e-12, %v3179_v22  ;;  %v3174_v3 = vpop.xlane.xlu1 %3173 }
0x1999   :  { %5165 = vrsqrt.f32 %v3183_v6  ;;  %v3180_v41 = vmul.f32 0.03125, %v3174_v3  ;;  %v3206_v12 = vmul.f32 %v4015_v58, %v3194_v13  ;;  %v4019_v3 = vld [vmem:[%s6458_s19] ss:$0 sm:$0xff] }
0x199a   :  { %5167 = vrsqrt.f32 %v3185_v18  ;;  %v5162_v27 = vpop.eup %5161 }
0x199b   :  { %v3186_v51 = vadd.f32 1e-12, %v3180_v41  ;;  %v3193_v25 = vmul.f32 %v5162_v27, %v6265_v17  ;;  %v3218_v54 = vadd.f32 %v4016_v24, %v3206_v12 }
0x199d   :  { %5169 = vrsqrt.f32 %v3186_v51  ;;  %v3205_v55 = vmul.f32 %v4015_v58, %v3193_v25  ;;  %v3224_v14 = vrot.slane %v3218_v54, 7 }
0x199f   :  { %v5164_v20 = vpop.eup %5163  ;;  %v3217_v15 = vadd.f32 %v4016_v24, %v3205_v55 }
0x19a0   :  { %v3196_v29 = vmul.f32 %v5164_v20, %v6271_v57 }
0x19a1   :  { %v3239_v42 = vsel %vm3238_vm6, %v3217_v15, %v3224_v14 }
0x19a2   :  { %v3208_v43 = vmul.f32 %v4015_v58, %v3196_v29 }
0x19a3   :  { %v5166_v2 = vpop.eup %5165 }
0x19a4   :  { %v5168_v10 = vpop.eup %5167  ;;  %v3195_v11 = vmul.f32 %v5166_v2, %v6275_v30  ;;  %v3220_v17 = vadd.f32 %v4016_v24, %v3208_v43 }
0x19a5   :  { %v3197_v28 = vmul.f32 %v5168_v10, %v6278_v31 }
0x19a6   :  { %v3207_v52 = vmul.f32 %v4015_v58, %v3195_v11  ;;  %v3230_v40 = vrot.slane %v3220_v17, 5 }
0x19a7   :  { %v5170_v32 = vpop.eup %5169  ;;  %v3209_v33 = vmul.f32 %v4015_v58, %v3197_v28 }
0x19a8   :  { %v3219_v57 = vadd.f32 %v4016_v24, %v3207_v52  ;;  %v3198_v36 = vmul.f32 %v5170_v32, %v6284_v0 }
0x19a9   :  { %v3221_v37 = vadd.f32 %v4016_v24, %v3209_v33 }
0x19aa   :  { %v3227_v38 = vrot.slane %v3219_v57, 6  ;;  %v3210_v35 = vmul.f32 %v4015_v58, %v3198_v36 }
0x19ab   :  { %v3233_v30 = vrot.slane %v3221_v37, 4 }
0x19ac   :  { %v3222_v31 = vadd.f32 %v4016_v24, %v3210_v35  ;;  %v3241_v61 = vsel %vm3240_vm7, %v3239_v42, %v3227_v38  ;;  %v3638_v42 = vld [vmem:[%s6459_s22] sm:$0xff] }
0x19ad   :  { %v3243_v19 = vsel %vm3242_vm8, %v3241_v61, %v3230_v40  ;;  %v3640_v61 = vld [vmem:[%s6459_s22 + $0x10] sm:$0xff] }
0x19ae   :  { %v3236_v16 = vrot.slane %v3222_v31, 3  ;;  %v3245_v50 = vsel %vm3244_vm9, %v3243_v19, %v3233_v30  ;;  %v3639_v31 = vld [vmem:[%s6459_s22 + $0x8] sm:$0xff] }
0x19af   :  { %v4851_v19 = vpack.c.bf16 %v3639_v31, %v3638_v42 }
0x19b0   :  { %v3247_v0 = vsel %vm3246_vm10, %v3245_v50, %v3236_v16  ;;  %v3641_v16 = vld [vmem:[%s6459_s22 + $0x18] sm:$0xff] }
0x19b1   :  { %4569 = vmatmul.mubr.msk.f32.vlgmr.msra.gmra.mrb[48].mxu0 %vm94_vm0, %v3247_v0  ;;  %4852 = vmatpush3.bf16.msra.mxu1 %v4851_v19  ;;  %v4854_v50 = vpack.c.bf16 %v3641_v16, %v3640_v61 }
0x19b2   :  { %4579 = vmatprep.mubr.msk.f32.mxu0 %vm5204_vm5, %v5205_v9  ;;  %4834 = vmatpush3.bf16.msra.mxu0 %v4833_v44 }
0x19b3   :  { %4835 = vmatprep.subr.bf16.mxu0 %v5203_v49  ;;  %4853 = vmatprep.subr.bf16.mxu1 %v5203_v49 }
0x19b5   :  { %4855 = vmatpush3.bf16.msra.mxu1 %v4854_v50 }
0x19b6   :  { %4837 = vmatpush3.bf16.msra.mxu0 %v4836_v21 }
0x19b7   :  { %4844 = vmatprep.subr.bf16.mxu0 %v5203_v49 }
0x1a00   :  { %v3515_v25 = vpop.permute.xlu0 %3514 }
0x1a84   :  { %v3328_v62 = vpop.f32.mrb[48].mxu0 }
0x1a85   :  { %v3329_v34 = vadd.f32 %v4017_v63, %v3328_v62  ;;  %v4570_v1 = vpop.f32.mrb[49].mxu0 }
0x1a87   :  { %5171 = vtanh.f32 %v3329_v34  ;;  %v4024_v34 = vld [vmem:[%s6461_s24] ss:$0 sm:$0xff] }
0x1a91   :  { %v5172_v8 = vpop.eup %5171 }
0x1a92   :  { %v3334_v4 = vrot.slane %v5172_v8, 1  ;;  %v3337_v7 = vrot.slane %v5172_v8, 2 }
0x1a94   :  { %v3336_v5 = vmax.f32 %v5172_v8, %v3334_v4 }
0x1a96   :  { %v3339_v22 = vmax.f32 %v3336_v5, %v3337_v7  ;;  %v3765_v5 = vld [vmem:[%s6462_s25] sm:$0xff]  ;;  %v3766_v7 = vld [vmem:[%s6462_s25 + $0x8] sm:$0xff] }
0x1a98   :  { %v3341_v6 = vrot.slane %v3339_v22, 2 }
0x1a9a   :  { %v3343_v18 = vsel %vm3238_vm6, %v3339_v22, %v3341_v6  ;;  %v3767_v22 = vld [vmem:[%s6462_s25 + $0x10] sm:$0xff]  ;;  %v4857_v6 = vpack.c.bf16 %v3766_v7, %v3765_v5 }
0x1a9b   :  { %4580 = vmatmul.mubr.msk.f32.vlgmr.msra.gmra.mrb[50].mxu0 %vm94_vm0, %v3343_v18  ;;  %v3768_v18 = vld [vmem:[%s6462_s25 + $0x18] sm:$0xff] }
0x1a9c   :  { %4846 = vmatpush3.bf16.msra.mxu0 %v6320_v26  ;;  %4601 = vmatprep.mubr.msk.f32.mxu0 %vm5204_vm5, %v5205_v9 }
0x1a9d   :  { %4847 = vmatprep.subr.bf16.mxu0 %v5203_v49 }
0x1aa0   :  { %4849 = vmatpush3.bf16.msra.mxu0 %v6326_v53 }
0x1aa1   :  { %4856 = vmatprep.subr.bf16.mxu0 %v5203_v49 }
0x1b6e   :  { %v3424_v41 = vpop.f32.mrb[50].mxu0 }
0x1b6f   :  { %v3425_v23 = vadd.f32 %v4019_v3, %v3424_v41  ;;  %v4581_v51 = vpop.f32.mrb[51].mxu0  ;;  %v4860_v3 = vpack.c.bf16 %v3768_v18, %v3767_v22 }
0x1b71   :  { %v3506_v27 = vadd.f32 %v3503_v60, %v3425_v23 }
0x1b73   :  { %v3507_v13 = vsub.f32 0.0, %v3506_v27 }
0x1b75   :  { %v3508_v58 = vmul.f32 1.442695, %v3507_v13 }
0x1b77   :  { %5173 = vpow2.f32 %v3508_v58 }
0x1b81   :  { %v5174_v26 = vpop.eup %5173 }
0x1b82   :  { %v3510_v20 = vadd.f32 1.0, %v5174_v26 }
0x1b84   :  { %5175 = vrcp.f32 %v3510_v20 }
0x1b8e   :  { %v5176_v29 = vpop.eup %5175 }
0x1b8f   :  { %v3517_v12 = vmul.f32 %v5176_v29, %v3515_v25  ;;  %v3524_v55 = vsub.f32 1.0, %v5176_v29  ;;  %v3530_v10 = vmul.f32 0.0, %v5176_v29 }
0x1b91   :  { %3519 = vrot.lane.b32.xlu1 %v3517_v12, %s6516_s10 }
0x1c03   :  { %v3520_v53 = vpop.permute.xlu1 %3519 }
0x1c04   :  { %v3522_v24 = vadd.f32 %v3520_v53, %v3425_v23 }
0x1c06   :  { %5177 = vtanh.f32 %v3522_v24 }
0x1c10   :  { %v5178_v2 = vpop.eup %5177 }
0x1c11   :  { %3526 = vrot.lane.b32.xlu1 %v5178_v2, %s6515_s9 }
0x1c83   :  { %v3527_v43 = vpop.permute.xlu1 %3526 }
0x1c84   :  { %v3529_v11 = vmul.f32 %v3527_v43, %v3524_v55 }
0x1c86   :  { %v3531_v54 = vadd.f32 %v3530_v10, %v3529_v11 }
0x1c88   :  { %3533 = vrot.lane.b32.xlu1 %v3531_v54, %s6515_s9  ;;  %v3633_v46 = vrot.slane %v3531_v54, 7 }
0x1cfa   :  { %v3534_v28 = vpop.permute.xlu1 %3533 }
0x1cfb   :  { %4602 = vmatmul.mubr.msk.f32.vlgmr.msra.gmra.mrb[52].mxu0 %vm94_vm0, %v3534_v28 }
0x1cfc   :  { %4623 = vmatprep.mubr.msk.f32.mxu0 %vm5204_vm5, %v5205_v9  ;;  %4858 = vmatpush3.bf16.msra.mxu0 %v4857_v6 }
0x1cfd   :  { %4859 = vmatprep.subr.bf16.mxu0 %v5203_v49 }
0x1d00   :  { %4861 = vmatpush3.bf16.msra.mxu0 %v4860_v3 }
0x1dce   :  { %v3603_v52 = vpop.f32.mrb[52].mxu0 }
0x1dcf   :  { %v3604_v32 = vadd.f32 %v3603_v52, %v3432_v59  ;;  %v4603_v15 = vpop.f32.mrb[53].mxu0 }
0x1dd1   :  { %v3608_v17 = vrot.slane %v3604_v32, 7 }
0x1dd3   :  { %3617 = vrot.lane.b32.xlu0 %v3608_v17, %s6516_s10  ;;  %v3610_v33 = vadd.f32 %v3608_v17, %v3425_v23 }
0x1dd5   :  { %v3611_v57 = vsub.f32 0.0, %v3610_v33 }
0x1dd7   :  { %v3612_v36 = vmul.f32 1.442695, %v3611_v57 }
0x1dd9   :  { %5179 = vpow2.f32 %v3612_v36 }
0x1de3   :  { %v5180_v14 = vpop.eup %5179 }
0x1de4   :  { %v3614_v37 = vadd.f32 1.0, %v5180_v14 }
0x1de6   :  { %5181 = vrcp.f32 %v3614_v37  ;;  %v3769_v37 = vld [vmem:[%s6521_s1] sm:$0x1] }
0x1df0   :  { %v5182_v38 = vpop.eup %5181 }
0x1df1   :  { %v3627_v56 = vsub.f32 1.0, %v5182_v38  ;;  %v3635_v39 = vmul.f32 %v5182_v38, %v3633_v46 }
0x1e45   :  { %v3618_v35 = vpop.permute.xlu0 %3617 }
0x1e46   :  { %v3620_v40 = vmul.f32 %v5182_v38, %v3618_v35 }
0x1e48   :  { %3622 = vrot.lane.b32.xlu1 %v3620_v40, %s6516_s10 }
0x1eba   :  { %v3623_v30 = vpop.permute.xlu1 %3622 }
0x1ebb   :  { %v3625_v9 = vadd.f32 %v3623_v30, %v3425_v23 }
0x1ebd   :  { %5183 = vtanh.f32 %v3625_v9 }
0x1ec7   :  { %v5184_v0 = vpop.eup %5183 }
0x1ec8   :  { %3629 = vrot.lane.b32.xlu0 %v5184_v0, %s6515_s9 }
0x1f3a   :  { %v3630_v45 = vpop.permute.xlu0 %3629 }
0x1f3b   :  { %v3632_v44 = vmul.f32 %v3630_v45, %v3627_v56 }
0x1f3d   :  { %v3636_v21 = vadd.f32 %v3635_v39, %v3632_v44 }
0x1f3f   :  { %v3637_v47 = vsel %vm3238_vm6, %v3531_v54, %v3636_v21 }
0x1f40   :  { %3650 = vrot.lane.b32.xlu1 %v3637_v47, %s6515_s9 }
0x1fb2   :  { %v3651_v59 = vpop.permute.xlu1 %3650 }
0x1fb3   :  { %4613 = vmatmul.mubr.msk.f32.vlgmr.msra.gmra.mrb[50].mxu1 %vm94_vm0, %v3651_v59 }
0x2086   :  { %v3720_v60 = vpop.f32.mrb[50].mxu1 }
0x2087   :  { %v3721_v63 = vadd.f32 %v4022_v48, %v3720_v60  ;;  %v4614_v62 = vpop.f32.mrb[51].mxu1 }
0x2089   :  { %5185 = vtanh.f32 %v3721_v63 }
0x2093   :  { %v5186_v1 = vpop.eup %5185 }
0x2094   :  { %v3732_v8 = vmul.f32 %v5186_v1, %v4024_v34 }
0x2096   :  { %v3734_v4 = vsel %vm3733_vm11, %v3732_v8, 0.0 }
0x2097   :  { %3735 = vadd.xlane.f32.xlu0 %v3734_v4 }
0x2124   :  { %v3736_v41 = vpop.xlane.xlu0 %3735 }
0x2125   :  { %v3737_v23 = vsel %vm3240_vm7, %v3736_v41, -inf }
0x2126   :  { %v3738_v51 = vrot.slane %v3737_v23, 4 }
0x2128   :  { %v3739_v27 = vmax.f32 %v3737_v23, %v3738_v51 }
0x212a   :  { %v3740_v13 = vrot.slane %v3739_v27, 2 }
0x212c   :  { %v3741_v58 = vmax.f32 %v3739_v27, %v3740_v13 }
0x212e   :  { %v3742_v26 = vrot.slane %v3741_v58, 1 }
0x2130   :  { %v3743_v20 = vmax.f32 %v3741_v58, %v3742_v26 }
0x2132   :  { %v3744_v25 = vsub.f32 %v3736_v41, %v3743_v20 }
0x2134   :  { %v3745_v29 = vmul.f32 1.442695, %v3744_v25 }
0x2136   :  { %5187 = vpow2.f32 %v3745_v29 }
0x2140   :  { %v5188_v12 = vpop.eup %5187 }
0x2141   :  { %v3747_v53 = vsel %vm3240_vm7, %v5188_v12, 0.0 }
0x2142   :  { %v3748_v24 = vrot.slane %v3747_v53, 4 }
0x2144   :  { %v3749_v2 = vadd.f32 %v3748_v24, %v3747_v53 }
0x2146   :  { %v3750_v55 = vrot.slane %v3749_v2, 2 }
0x2148   :  { %v3751_v49 = vadd.f32 %v3750_v55, %v3749_v2 }
0x214a   :  { %v3752_v43 = vrot.slane %v3751_v49, 1 }
0x214c   :  { %v3753_v10 = vadd.f32 %v3752_v43, %v3751_v49 }
0x214e   :  { %5189 = vrcp.f32 %v3753_v10 }
0x2158   :  { %v5190_v11 = vpop.eup %5189 }
0x2159   :  { %v3755_v54 = vmul.f32 %v5190_v11, %v5188_v12 }
0x215b   :  { %v3756_v28 = vmul.f32 %v3755_v54, %v3637_v47 }
0x215d   :  { %v3758_v52 = vsel %vm3757_vm12, %v3756_v28, 0.0 }
0x215e   :  { %v3759_v32 = vrot.slane %v3758_v52, 4 }
0x2160   :  { %v3760_v15 = vadd.f32 %v3759_v32, %v3758_v52 }
0x2162   :  { %v3761_v17 = vrot.slane %v3760_v15, 2 }
0x2164   :  { %v3762_v33 = vadd.f32 %v3761_v17, %v3760_v15 }
0x2166   :  { %v3763_v57 = vrot.slane %v3762_v33, 1 }
0x2168   :  { %v3764_v36 = vadd.f32 %v3763_v57, %v3762_v33 }
0x216a   :  { %3771 = vrot.lane.b32.xlu1 %v3764_v36, %s6515_s9 }
0x21dc   :  { %v3772_v14 = vpop.permute.xlu1 %3771 }
0x21dd   :  { %4624 = vmatmul.mubr.msk.f32.vlgmr.msra.gmra.mrb[54].mxu0 %vm94_vm0, %v3772_v14 }
0x22b0   :  { %v3841_v38 = vpop.f32.mrb[54].mxu0 }
0x22b1   :  { %v3842_v35 = vadd.f32 %v3841_v38, %v3769_v37  ;;  %v4625_v40 = vpop.f32.mrb[55].mxu0 }
0x22b3   :  { %3846 = vst.msk [vmem:[%s6522_s7] sm:$0x1] %vm3845_vm13, %v3842_v35 }

</bundles_post_ra>
